<compile_context>
chip_gen: v7x
topology: tpu7x:2x2x1
jax: 0.10.0
libtpu: 0.0.40
codegen_flags: <defaults>
</compile_context>

<pallas_src>
import functools

import numpy as np
import jax
import jax.numpy as jnp
from jax.experimental import pallas as pl
from jax.experimental.pallas import tpu as pltpu


# ----------------------------- Pallas kernels ------------------------------

def _elu(y):
    # ELU(alpha=1) in f32 (exp lowers on all TPU generations).
    return jnp.where(y > 0.0, y, jnp.exp(jnp.minimum(y, 0.0)) - 1.0)


def _conv_post_kernel(colsT_ref, wT_ref, b_ref, postT_ref, o_ref):
    """Channel-major conv + ELU + constant post-op (avg-pool / bilinear upsample).
    colsT (Bt,K,M) bf16, wT (N,K) bf16, b (N,1) f32, postT (M,P) bf16 -> o (Bt,N,P)."""
    w = wT_ref[...]
    b = b_ref[...]
    post = postT_ref[...]
    for bi in range(colsT_ref.shape[0]):          # Bt is static & small
        y = jnp.dot(w, colsT_ref[bi], preferred_element_type=jnp.float32)   # (N,M)
        y = _elu(y + b)
        o = jnp.dot(y.astype(post.dtype), post, preferred_element_type=jnp.float32)  # (N,P)
        o_ref[bi] = o.astype(o_ref.dtype)


def _conv_elu_kernel(colsT_ref, wT_ref, b_ref, o_ref):
    """Channel-major conv + ELU (no post-op)."""
    w = wT_ref[...]
    b = b_ref[...]
    for bi in range(colsT_ref.shape[0]):
        y = jnp.dot(w, colsT_ref[bi], preferred_element_type=jnp.float32)
        o_ref[bi] = _elu(y + b).astype(o_ref.dtype)


def _final_conv_kernel(colsT_ref, wT_ref, b_ref, o_ref):
    """Final 16->1 conv, batch folded into lanes: (1,K)@(K,B*784) + b (SMEM scalar)."""
    y = jnp.dot(wT_ref[...], colsT_ref[...], preferred_element_type=jnp.float32)
    o_ref[...] = y + b_ref[0, 0]


def _middle_kernel(h_ref, eps_ref, w3_ref, b3_ref, wmu_ref, bmu_ref, wls_ref, bls_ref,
                   wd_ref, bd_ref, w1_ref, b1_ref, mu_ref, ls_ref, d1_ref):
    """Fused: conv3(5x5 on 5x5)-as-linear + ELU -> enc linear (mu / log_sigma halves)
    -> reparam -> dec linear + ELU -> dconv1(5x5 on 1x1, pad=4)-as-linear + ELU.
    All intermediates stay in VMEM / vregs."""
    h3 = _elu(jnp.dot(h_ref[...], w3_ref[...],
                      preferred_element_type=jnp.float32) + b3_ref[...])          # (B,256)
    h3b = h3.astype(wmu_ref.dtype)
    mu = jnp.dot(h3b, wmu_ref[...], preferred_element_type=jnp.float32) + bmu_ref[...]   # (B,dimz)
    ls = jnp.dot(h3b, wls_ref[...], preferred_element_type=jnp.float32) + bls_ref[...]   # (B,dimz)
    sigma = jnp.exp(ls) + 1e-7
    z = mu + sigma * eps_ref[...]                                                  # reparam (f32)
    d0 = _elu(jnp.dot(z.astype(wd_ref.dtype), wd_ref[...],
                      preferred_element_type=jnp.float32) + bd_ref[...])           # (B,256)
    d1 = _elu(jnp.dot(d0.astype(w1_ref.dtype), w1_ref[...],
                      preferred_element_type=jnp.float32) + b1_ref[...])           # (B,1600)
    mu_ref[...] = mu
    ls_ref[...] = ls
    d1_ref[...] = d1.astype(d1_ref.dtype)


# ------------------------------ call wrappers -------------------------------

_VMEM = pl.BlockSpec(memory_space=pltpu.MemorySpace.VMEM)
_SMEM = pl.BlockSpec(memory_space=pltpu.MemorySpace.SMEM)
_PARALLEL = pltpu.CompilerParams(dimension_semantics=("parallel",))


def _split_batch(B):
    """Batch block size / #grid steps: keep a 2-way 'parallel' axis (v7x) when possible."""
    nsteps = 2 if (B % 2 == 0 and B >= 2) else 1
    return B // nsteps, nsteps


def conv_post(colsT, wT, b, postT, out_dtype=jnp.bfloat16):
    """colsT (B,K,M) bf16, wT (N,K) bf16, b (N,1) f32, postT (M,P) bf16 -> (B,N,P)."""
    B, K, M = colsT.shape
    N = wT.shape[0]
    P = postT.shape[1]
    Bt, nsteps = _split_batch(B)
    return pl.pallas_call(
        _conv_post_kernel,
        grid=(nsteps,),
        in_specs=[pl.BlockSpec((Bt, K, M), lambda i: (i, 0, 0)),
                  pl.BlockSpec((N, K), lambda i: (0, 0)),
                  pl.BlockSpec((N, 1), lambda i: (0, 0)),
                  pl.BlockSpec((M, P), lambda i: (0, 0))],
        out_specs=pl.BlockSpec((Bt, N, P), lambda i: (i, 0, 0)),
        out_shape=jax.ShapeDtypeStruct((B, N, P), out_dtype),
        compiler_params=_PARALLEL,
    )(colsT, wT, b, postT)


def conv_elu(colsT, wT, b, out_dtype=jnp.bfloat16):
    """colsT (B,K,M) bf16, wT (N,K) bf16, b (N,1) f32 -> (B,N,M)."""
    B, K, M = colsT.shape
    N = wT.shape[0]
    Bt, nsteps = _split_batch(B)
    return pl.pallas_call(
        _conv_elu_kernel,
        grid=(nsteps,),
        in_specs=[pl.BlockSpec((Bt, K, M), lambda i: (i, 0, 0)),
                  pl.BlockSpec((N, K), lambda i: (0, 0)),
                  pl.BlockSpec((N, 1), lambda i: (0, 0))],
        out_specs=pl.BlockSpec((Bt, N, M), lambda i: (i, 0, 0)),
        out_shape=jax.ShapeDtypeStruct((B, N, M), out_dtype),
        compiler_params=_PARALLEL,
    )(colsT, wT, b)


def final_conv(colsT_flat, wT, b):
    """colsT_flat (K, B*784) bf16, wT (1,K) bf16, b (1,1) f32 (SMEM) -> (1, B*784) f32."""
    K, L = colsT_flat.shape
    return pl.pallas_call(
        _final_conv_kernel,
        in_specs=[_VMEM, _VMEM, _SMEM],
        out_specs=_VMEM,
        out_shape=jax.ShapeDtypeStruct((1, L), jnp.float32),
    )(colsT_flat, wT, b)


def middle_block(h, eps, w3, b3, wmu, bmu, wls, bls, wd, bd, w1, b1):
    # TODO(synk): grid-less (single step) — a 2-way batch grid would need block
    # shapes like (1, dimz) that violate the (8,128) blocking rule at B=2.
    B = h.shape[0]
    dimz = wmu.shape[1]
    return pl.pallas_call(
        _middle_kernel,
        in_specs=[_VMEM] * 12,
        out_specs=(_VMEM, _VMEM, _VMEM),
        out_shape=(jax.ShapeDtypeStruct((B, dimz), jnp.float32),
                   jax.ShapeDtypeStruct((B, dimz), jnp.float32),
                   jax.ShapeDtypeStruct((B, w1.shape[1]), jnp.float32)),
    )(h, eps, w3, b3, wmu, bmu, wls, bls, wd, bd, w1, b1)


# ----------------------------- layout glue (XLA) -----------------------------

def _im2col_cm(x, kh, kw):
    """Channel-major im2col: x (B,C,Hp,Wp) already padded ->
    (B, kh*kw*C, Ho*Wo); row order (ky, kx, ci), col order row-major (y, x)."""
    B, C, Hp, Wp = x.shape
    Ho, Wo = Hp - kh + 1, Wp - kw + 1
    slabs = [x[:, :, i:i + Ho, j:j + Wo] for i in range(kh) for j in range(kw)]
    patches = jnp.concatenate(slabs, axis=1)            # (B, kh*kw*C, Ho, Wo)
    return patches.reshape(B, kh * kw * C, Ho * Wo)


def _pad_hw(x, p):
    return jnp.pad(x, ((0, 0), (0, 0), (p, p), (p, p)))


def _pool_matrix(n_in):
    """AvgPool2d(2,2) floor mode along one axis: (n_out, n_in) with 0.5 entries."""
    n_out = (n_in - 2) // 2 + 1
    P = np.zeros((n_out, n_in), np.float32)
    for i in range(n_out):
        P[i, 2 * i] = 0.5
        P[i, 2 * i + 1] = 0.5
    return P


def _bilinear_matrix(n_in, n_out):
    """UpsamplingBilinear2d (align_corners=True) 1-D interpolation matrix."""
    U = np.zeros((n_out, n_in), np.float32)
    if n_in == 1:
        U[:, 0] = 1.0
        return U
    for i in range(n_out):
        src = i * (n_in - 1) / (n_out - 1)
        i0 = min(int(np.floor(src)), n_in - 2)
        f = src - i0
        U[i, i0] += 1.0 - f
        U[i, i0 + 1] += f
    return U


# --------------------------------- forward ----------------------------------

def vae_forward(params, x_nchw, eps):
    """Mirrors VAE.forward: returns (mu, log_sigma, x_out) with x_out (B,28,28)."""
    f32, bf16 = jnp.float32, jnp.bfloat16
    B = x_nchw.shape[0]
    dimz = eps.shape[1]

    # Constant fused pool / upsample operators (bf16, f32 accumulate in-kernel),
    # transposed so they apply on the right of channel-major activations.
    postT_e1 = jnp.asarray(np.kron(_pool_matrix(26), _pool_matrix(26)).T, bf16)        # (676,169)
    postT_e2 = jnp.asarray(np.kron(_pool_matrix(11), _pool_matrix(11)).T, bf16)        # (121, 25)
    postT_d2 = jnp.asarray(np.kron(_bilinear_matrix(12, 24), _bilinear_matrix(12, 24)).T, bf16)  # (144,576)
    U5 = jnp.asarray(_bilinear_matrix(5, 10), f32)                                     # (10, 5)

    # Weight preprocessing (tiny constants; channel-major / transposed forms).
    wT1 = params["ew1"].reshape(9, 32).T.astype(bf16)                  # (32, 9)
    b1e = params["eb1"].reshape(32, 1)
    wT2 = params["ew2"].reshape(288, 64).T.astype(bf16)                # (64, 288)
    b2e = params["eb2"].reshape(64, 1)
    w3 = jnp.transpose(params["ew3"], (2, 0, 1, 3)).reshape(1600, 256).astype(bf16)
    b3 = params["eb3"].reshape(1, 256)
    wmu = params["elw"][:, :dimz].astype(bf16)                         # (256, dimz)
    wls = params["elw"][:, dimz:].astype(bf16)                         # (256, dimz)
    bmu = params["elb"][:dimz].reshape(1, dimz)
    bls = params["elb"][dimz:].reshape(1, dimz)
    wd = params["dlw"].astype(bf16)                                    # (dimz, 256)
    bd = params["dlb"].reshape(1, 256)
    # dconv1 on a 1x1 input with pad=4: out[co,oy,ox] = sum_ci in[ci]*dw1[4-oy,4-ox,ci,co]+db1[co]
    w1d = jnp.transpose(params["dw1"][::-1, ::-1, :, :], (2, 3, 0, 1)).reshape(256, 1600).astype(bf16)
    b1d = jnp.repeat(params["db1"], 25).reshape(1, 1600)
    wT2d = params["dw2"].reshape(576, 32).T.astype(bf16)               # (32, 576)
    b2d = params["db2"].reshape(32, 1)
    wT3d = params["dw3"].reshape(288, 16).T.astype(bf16)               # (16, 288)
    b3d = params["db3"].reshape(16, 1)
    wT4d = params["dw4"].reshape(144, 1).T.astype(bf16)                # (1, 144)
    b4d = params["db4"].reshape(1, 1)

    # --- encoder stage 1: conv3x3(1->32) + ELU + avgpool2 (one kernel) ---
    colsT = _im2col_cm(x_nchw, 3, 3).astype(bf16)                      # (B, 9, 676)
    h = conv_post(colsT, wT1, b1e, postT_e1)                           # (B, 32, 169)
    h = h.reshape(B, 32, 13, 13)

    # --- encoder stage 2: conv3x3(32->64) + ELU + avgpool2 (one kernel) ---
    colsT = _im2col_cm(h, 3, 3)                                        # (B, 288, 121) bf16
    h = conv_post(colsT, wT2, b2e, postT_e2)                           # (B, 64, 25)
    h = h.reshape(B, 1600)                                             # (ci, y, x) order

    # --- fused middle block (enc conv3 + linear, reparam, dec linear + dconv1) ---
    mu, log_sigma, d = middle_block(h, eps, w3, b3, wmu, bmu, wls, bls,
                                    wd, bd, w1d, b1d)                  # d: (B,1600) f32

    # --- bilinear upsample 5->10 (align_corners): tiny, pure layout glue ---
    # TODO(synk): this 25->100-pixel upsample stays in XLA; folding it into the
    # middle kernel would need in-kernel minor-dim reshapes for no measurable gain.
    d = d.reshape(B, 64, 5, 5)
    d = jnp.einsum("ph,bchw->bcpw", U5, d)
    d = jnp.einsum("qw,bcpw->bcpq", U5, d)                             # (B,64,10,10) f32

    # --- decoder: conv3x3(64->32, pad=2) + ELU + upsample 12->24 (one kernel) ---
    colsT = _im2col_cm(_pad_hw(d, 2), 3, 3).astype(bf16)               # (B, 576, 144)
    d = conv_post(colsT, wT2d, b2d, postT_d2)                          # (B, 32, 576)
    d = d.reshape(B, 32, 24, 24)

    # --- conv3x3(32->16, pad=2) + ELU ---
    # TODO(synk): pad+im2col kept in XLA instead of in-kernel pltpu.roll convs.
    colsT = _im2col_cm(_pad_hw(d, 2), 3, 3)                            # (B, 288, 676) bf16
    d = conv_elu(colsT, wT3d, b3d)                                     # (B, 16, 676)
    d = d.reshape(B, 16, 26, 26)

    # --- conv3x3(16->1, pad=2), no activation — batch folded into lanes ---
    colsT = _im2col_cm(_pad_hw(d, 2), 3, 3)                            # (B, 144, 784) bf16
    colsT_flat = jnp.transpose(colsT, (1, 0, 2)).reshape(144, B * 784)
    y = final_conv(colsT_flat, wT4d, b4d)                              # (1, B*784) f32
    x_out = y.reshape(B, 28, 28)

    return mu, log_sigma, x_out


# ------------------------------ parameter init -------------------------------

def init_params(key, dimz):
    """Shapes match the PyTorch module: conv weights stored as (KH,KW,Cin,Cout)
    (== torch weight.permute(2,3,1,0)), linear weights as (in,out).
    Uniform(+-1/sqrt(fan_in)) like PyTorch's default init."""
    keys = jax.random.split(key, 18)

    def u(k, shape, fan_in):
        bound = 1.0 / float(np.sqrt(fan_in))
        return jax.random.uniform(k, shape, jnp.float32, -bound, bound)

    p = {}
    p["ew1"] = u(keys[0], (3, 3, 1, 32), 3 * 3 * 1)
    p["eb1"] = u(keys[1], (32,), 3 * 3 * 1)
    p["ew2"] = u(keys[2], (3, 3, 32, 64), 3 * 3 * 32)
    p["eb2"] = u(keys[3], (64,), 3 * 3 * 32)
    p["ew3"] = u(keys[4], (5, 5, 64, 256), 5 * 5 * 64)
    p["eb3"] = u(keys[5], (256,), 5 * 5 * 64)
    p["elw"] = u(keys[6], (256, 2 * dimz), 256)
    p["elb"] = u(keys[7], (2 * dimz,), 256)
    p["dlw"] = u(keys[8], (dimz, 256), dimz)
    p["dlb"] = u(keys[9], (256,), dimz)
    p["dw1"] = u(keys[10], (5, 5, 256, 64), 5 * 5 * 256)
    p["db1"] = u(keys[11], (64,), 5 * 5 * 256)
    p["dw2"] = u(keys[12], (3, 3, 64, 32), 3 * 3 * 64)
    p["db2"] = u(keys[13], (32,), 3 * 3 * 64)
    p["dw3"] = u(keys[14], (3, 3, 32, 16), 3 * 3 * 32)
    p["db3"] = u(keys[15], (16,), 3 * 3 * 32)
    p["dw4"] = u(keys[16], (3, 3, 16, 1), 3 * 3 * 16)
    p["db4"] = u(keys[17], (1,), 3 * 3 * 16)
    return p


# ----------------------------------- main ------------------------------------

if __name__ == "__main__":
    B, dimz = 2, 8
    key = jax.random.PRNGKey(0)
    k_params, k_x, k_eps = jax.random.split(key, 3)

    params = init_params(k_params, dimz)
    # Encoder (3x3 conv, pool, 3x3 conv, pool, 5x5 conv -> 1x1) implies 28x28x1 input, NCHW.
    x = jax.random.uniform(k_x, (B, 1, 28, 28), jnp.float32)
    # torch.randn_like(mu): drawn in the wrapper, consumed by the fused middle kernel.
    eps = jax.random.normal(k_eps, (B, dimz), jnp.float32)

    fwd = jax.jit(vae_forward)
    mu, log_sigma, x_out = fwd(params, x, eps)
    jax.block_until_ready((mu, log_sigma, x_out))

    assert mu.shape == (B, dimz)
    assert log_sigma.shape == (B, dimz)
    assert x_out.shape == (B, 28, 28)
    assert all(bool(jnp.isfinite(a).all()) for a in (mu, log_sigma, x_out))
    print("KERNEL_OK")
</pallas_src>

<mosaic_0001>
module attributes {stable_mosaic.version = 11 : i64} {
  func.func @_conv_post_kernel(%arg0: i32, %arg1: memref<1x9x676xbf16, #tpu.memory_space<vmem>>, %arg2: memref<32x9xbf16, #tpu.memory_space<vmem>>, %arg3: memref<32x1xf32, #tpu.memory_space<vmem>>, %arg4: memref<676x169xbf16, #tpu.memory_space<vmem>>, %arg5: memref<1x32x169xbf16, #tpu.memory_space<vmem>>) attributes {dimension_semantics = [#tpu.dimension_semantics<parallel>], iteration_bounds = array<i64: 2>, scalar_prefetch = 0 : i64, scratch_operands = 0 : i64, tpu.core_type = #tpu.core_type<tc>, window_params = [{transform_indices = @transform_0, window_bounds = array<i64: 1, 9, 676>}, {pipeline_mode = #tpu.pipeline_mode<synchronous>, transform_indices = @transform_1, window_bounds = array<i64: 32, 9>}, {pipeline_mode = #tpu.pipeline_mode<synchronous>, transform_indices = @transform_2, window_bounds = array<i64: 32, 1>}, {pipeline_mode = #tpu.pipeline_mode<synchronous>, transform_indices = @transform_3, window_bounds = array<i64: 676, 169>}, {transform_indices = @transform_4, window_bounds = array<i64: 1, 32, 169>}]} {
    %c0 = arith.constant 0 : index
    %c0_0 = arith.constant 0 : index
    %0 = vector.load %arg2[%c0, %c0_0] : memref<32x9xbf16, #tpu.memory_space<vmem>>, vector<32x9xbf16>
    %c0_1 = arith.constant 0 : index
    %c0_2 = arith.constant 0 : index
    %1 = vector.load %arg3[%c0_1, %c0_2] : memref<32x1xf32, #tpu.memory_space<vmem>>, vector<32x1xf32>
    %c0_3 = arith.constant 0 : index
    %c0_4 = arith.constant 0 : index
    %2 = vector.load %arg4[%c0_3, %c0_4] : memref<676x169xbf16, #tpu.memory_space<vmem>>, vector<676x169xbf16>
    %c0_5 = arith.constant 0 : index
    %c0_6 = arith.constant 0 : index
    %c0_7 = arith.constant 0 : index
    %3 = vector.load %arg1[%c0_5, %c0_6, %c0_7] : memref<1x9x676xbf16, #tpu.memory_space<vmem>>, vector<1x9x676xbf16>
    %4 = vector.shape_cast %3 : vector<1x9x676xbf16> to vector<9x676xbf16>
    %cst = arith.constant dense<0.000000e+00> : vector<32x676xf32>
    %5 = tpu.matmul %0, %4, %cst {dimension_numbers = #tpu.dot_dimension_numbers<[1], [0], [0], [1], [0, 0, 1, 1], [], []>} : vector<32x9xbf16>, vector<9x676xbf16>, vector<32x676xf32> -> vector<32x676xf32>
    %6 = vector.broadcast %1 : vector<32x1xf32> to vector<32x676xf32>
    %7 = arith.addf %5, %6 : vector<32x676xf32>
    %cst_8 = arith.constant 0.000000e+00 : f32
    %8 = vector.broadcast %cst_8 : f32 to vector<32x676xf32>
    %9 = arith.cmpf ogt, %7, %8 : vector<32x676xf32>
    %cst_9 = arith.constant 0.000000e+00 : f32
    %10 = vector.broadcast %cst_9 : f32 to vector<32x676xf32>
    %11 = arith.minimumf %7, %10 : vector<32x676xf32>
    %12 = math.exp %11 : vector<32x676xf32>
    %cst_10 = arith.constant 1.000000e+00 : f32
    %13 = vector.broadcast %cst_10 : f32 to vector<32x676xf32>
    %14 = arith.subf %12, %13 : vector<32x676xf32>
    %15 = arith.select %9, %7, %14 : vector<32x676xi1>, vector<32x676xf32>
    %16 = arith.truncf %15 : vector<32x676xf32> to vector<32x676xbf16>
    %cst_11 = arith.constant dense<0.000000e+00> : vector<32x169xf32>
    %17 = tpu.matmul %16, %2, %cst_11 {dimension_numbers = #tpu.dot_dimension_numbers<[1], [0], [0], [1], [0, 0, 1, 1], [], []>} : vector<32x676xbf16>, vector<676x169xbf16>, vector<32x169xf32> -> vector<32x169xf32>
    %18 = arith.truncf %17 : vector<32x169xf32> to vector<32x169xbf16>
    %c0_12 = arith.constant 0 : index
    %c0_13 = arith.constant 0 : index
    %c0_14 = arith.constant 0 : index
    %19 = vector.load %arg5[%c0_12, %c0_13, %c0_14] : memref<1x32x169xbf16, #tpu.memory_space<vmem>>, vector<1x32x169xbf16>
    %20 = vector.shape_cast %19 : vector<1x32x169xbf16> to vector<32x169xbf16>
    %21 = vector.shape_cast %18 : vector<32x169xbf16> to vector<1x32x169xbf16>
    tpu.vector_store %arg5[%c0_12, %c0_13, %c0_14], %21 {strides = array<i32>} : memref<1x32x169xbf16, #tpu.memory_space<vmem>>, vector<1x32x169xbf16>,
    return
  }
  func.func @transform_0(%arg0: i32) -> (i32, i32, i32) {
    %c0_i32 = arith.constant 0 : i32
    %c0_i32_0 = arith.constant 0 : i32
    %c0_i32_1 = arith.constant 0 : i32
    return %arg0, %c0_i32, %c0_i32_0 : i32, i32, i32
  }
  func.func @transform_1(%arg0: i32) -> (i32, i32) {
    %c0_i32 = arith.constant 0 : i32
    %c0_i32_0 = arith.constant 0 : i32
    %c0_i32_1 = arith.constant 0 : i32
    return %c0_i32, %c0_i32_0 : i32, i32
  }
  func.func @transform_2(%arg0: i32) -> (i32, i32) {
    %c0_i32 = arith.constant 0 : i32
    %c0_i32_0 = arith.constant 0 : i32
    %c0_i32_1 = arith.constant 0 : i32
    return %c0_i32, %c0_i32_0 : i32, i32
  }
  func.func @transform_3(%arg0: i32) -> (i32, i32) {
    %c0_i32 = arith.constant 0 : i32
    %c0_i32_0 = arith.constant 0 : i32
    %c0_i32_1 = arith.constant 0 : i32
    return %c0_i32, %c0_i32_0 : i32, i32
  }
  func.func @transform_4(%arg0: i32) -> (i32, i32, i32) {
    %c0_i32 = arith.constant 0 : i32
    %c0_i32_0 = arith.constant 0 : i32
    %c0_i32_1 = arith.constant 0 : i32
    return %arg0, %c0_i32, %c0_i32_0 : i32, i32, i32
  }
}

module attributes {stable_mosaic.version = 11 : i64} {
  func.func @_conv_post_kernel(%arg0: i32, %arg1: memref<1x288x121xbf16, #tpu.memory_space<vmem>>, %arg2: memref<64x288xbf16, #tpu.memory_space<vmem>>, %arg3: memref<64x1xf32, #tpu.memory_space<vmem>>, %arg4: memref<121x25xbf16, #tpu.memory_space<vmem>>, %arg5: memref<1x64x25xbf16, #tpu.memory_space<vmem>>) attributes {dimension_semantics = [#tpu.dimension_semantics<parallel>], iteration_bounds = array<i64: 2>, scalar_prefetch = 0 : i64, scratch_operands = 0 : i64, tpu.core_type = #tpu.core_type<tc>, window_params = [{transform_indices = @transform_0, window_bounds = array<i64: 1, 288, 121>}, {pipeline_mode = #tpu.pipeline_mode<synchronous>, transform_indices = @transform_1, window_bounds = array<i64: 64, 288>}, {pipeline_mode = #tpu.pipeline_mode<synchronous>, transform_indices = @transform_2, window_bounds = array<i64: 64, 1>}, {pipeline_mode = #tpu.pipeline_mode<synchronous>, transform_indices = @transform_3, window_bounds = array<i64: 121, 25>}, {transform_indices = @transform_4, window_bounds = array<i64: 1, 64, 25>}]} {
    %c0 = arith.constant 0 : index
    %c0_0 = arith.constant 0 : index
    %0 = vector.load %arg2[%c0, %c0_0] : memref<64x288xbf16, #tpu.memory_space<vmem>>, vector<64x288xbf16>
    %c0_1 = arith.constant 0 : index
    %c0_2 = arith.constant 0 : index
    %1 = vector.load %arg3[%c0_1, %c0_2] : memref<64x1xf32, #tpu.memory_space<vmem>>, vector<64x1xf32>
    %c0_3 = arith.constant 0 : index
    %c0_4 = arith.constant 0 : index
    %2 = vector.load %arg4[%c0_3, %c0_4] : memref<121x25xbf16, #tpu.memory_space<vmem>>, vector<121x25xbf16>
    %c0_5 = arith.constant 0 : index
    %c0_6 = arith.constant 0 : index
    %c0_7 = arith.constant 0 : index
    %3 = vector.load %arg1[%c0_5, %c0_6, %c0_7] : memref<1x288x121xbf16, #tpu.memory_space<vmem>>, vector<1x288x121xbf16>
    %4 = vector.shape_cast %3 : vector<1x288x121xbf16> to vector<288x121xbf16>
    %cst = arith.constant dense<0.000000e+00> : vector<64x121xf32>
    %5 = tpu.matmul %0, %4, %cst {dimension_numbers = #tpu.dot_dimension_numbers<[1], [0], [0], [1], [0, 0, 1, 1], [], []>} : vector<64x288xbf16>, vector<288x121xbf16>, vector<64x121xf32> -> vector<64x121xf32>
    %6 = vector.broadcast %1 : vector<64x1xf32> to vector<64x121xf32>
    %7 = arith.addf %5, %6 : vector<64x121xf32>
    %cst_8 = arith.constant 0.000000e+00 : f32
    %8 = vector.broadcast %cst_8 : f32 to vector<64x121xf32>
    %9 = arith.cmpf ogt, %7, %8 : vector<64x121xf32>
    %cst_9 = arith.constant 0.000000e+00 : f32
    %10 = vector.broadcast %cst_9 : f32 to vector<64x121xf32>
    %11 = arith.minimumf %7, %10 : vector<64x121xf32>
    %12 = math.exp %11 : vector<64x121xf32>
    %cst_10 = arith.constant 1.000000e+00 : f32
    %13 = vector.broadcast %cst_10 : f32 to vector<64x121xf32>
    %14 = arith.subf %12, %13 : vector<64x121xf32>
    %15 = arith.select %9, %7, %14 : vector<64x121xi1>, vector<64x121xf32>
    %16 = arith.truncf %15 : vector<64x121xf32> to vector<64x121xbf16>
    %cst_11 = arith.constant dense<0.000000e+00> : vector<64x25xf32>
    %17 = tpu.matmul %16, %2, %cst_11 {dimension_numbers = #tpu.dot_dimension_numbers<[1], [0], [0], [1], [0, 0, 1, 1], [], []>} : vector<64x121xbf16>, vector<121x25xbf16>, vector<64x25xf32> -> vector<64x25xf32>
    %18 = arith.truncf %17 : vector<64x25xf32> to vector<64x25xbf16>
    %c0_12 = arith.constant 0 : index
    %c0_13 = arith.constant 0 : index
    %c0_14 = arith.constant 0 : index
    %19 = vector.load %arg5[%c0_12, %c0_13, %c0_14] : memref<1x64x25xbf16, #tpu.memory_space<vmem>>, vector<1x64x25xbf16>
    %20 = vector.shape_cast %19 : vector<1x64x25xbf16> to vector<64x25xbf16>
    %21 = vector.shape_cast %18 : vector<64x25xbf16> to vector<1x64x25xbf16>
    tpu.vector_store %arg5[%c0_12, %c0_13, %c0_14], %21 {strides = array<i32>} : memref<1x64x25xbf16, #tpu.memory_space<vmem>>, vector<1x64x25xbf16>,
    return
  }
  func.func @transform_0(%arg0: i32) -> (i32, i32, i32) {
    %c0_i32 = arith.constant 0 : i32
    %c0_i32_0 = arith.constant 0 : i32
    %c0_i32_1 = arith.constant 0 : i32
    return %arg0, %c0_i32, %c0_i32_0 : i32, i32, i32
  }
  func.func @transform_1(%arg0: i32) -> (i32, i32) {
    %c0_i32 = arith.constant 0 : i32
    %c0_i32_0 = arith.constant 0 : i32
    %c0_i32_1 = arith.constant 0 : i32
    return %c0_i32, %c0_i32_0 : i32, i32
  }
  func.func @transform_2(%arg0: i32) -> (i32, i32) {
    %c0_i32 = arith.constant 0 : i32
    %c0_i32_0 = arith.constant 0 : i32
    %c0_i32_1 = arith.constant 0 : i32
    return %c0_i32, %c0_i32_0 : i32, i32
  }
  func.func @transform_3(%arg0: i32) -> (i32, i32) {
    %c0_i32 = arith.constant 0 : i32
    %c0_i32_0 = arith.constant 0 : i32
    %c0_i32_1 = arith.constant 0 : i32
    return %c0_i32, %c0_i32_0 : i32, i32
  }
  func.func @transform_4(%arg0: i32) -> (i32, i32, i32) {
    %c0_i32 = arith.constant 0 : i32
    %c0_i32_0 = arith.constant 0 : i32
    %c0_i32_1 = arith.constant 0 : i32
    return %arg0, %c0_i32, %c0_i32_0 : i32, i32, i32
  }
}

module attributes {stable_mosaic.version = 11 : i64} {
  func.func @_middle_kernel(%arg0: memref<2x1600xbf16, #tpu.memory_space<vmem>>, %arg1: memref<2x8xf32, #tpu.memory_space<vmem>>, %arg2: memref<1600x256xbf16, #tpu.memory_space<vmem>>, %arg3: memref<1x256xf32, #tpu.memory_space<vmem>>, %arg4: memref<256x8xbf16, #tpu.memory_space<vmem>>, %arg5: memref<1x8xf32, #tpu.memory_space<vmem>>, %arg6: memref<256x8xbf16, #tpu.memory_space<vmem>>, %arg7: memref<1x8xf32, #tpu.memory_space<vmem>>, %arg8: memref<8x256xbf16, #tpu.memory_space<vmem>>, %arg9: memref<1x256xf32, #tpu.memory_space<vmem>>, %arg10: memref<256x1600xbf16, #tpu.memory_space<vmem>>, %arg11: memref<1x1600xf32, #tpu.memory_space<vmem>>, %arg12: memref<2x8xf32, #tpu.memory_space<vmem>>, %arg13: memref<2x8xf32, #tpu.memory_space<vmem>>, %arg14: memref<2x1600xf32, #tpu.memory_space<vmem>>) attributes {dimension_semantics = [], scalar_prefetch = 0 : i64, scratch_operands = 0 : i64, tpu.core_type = #tpu.core_type<tc>} {
    %c0 = arith.constant 0 : index
    %c0_0 = arith.constant 0 : index
    %0 = vector.load %arg0[%c0, %c0_0] : memref<2x1600xbf16, #tpu.memory_space<vmem>>, vector<2x1600xbf16>
    %c0_1 = arith.constant 0 : index
    %c0_2 = arith.constant 0 : index
    %1 = vector.load %arg2[%c0_1, %c0_2] : memref<1600x256xbf16, #tpu.memory_space<vmem>>, vector<1600x256xbf16>
    %cst = arith.constant dense<0.000000e+00> : vector<2x256xf32>
    %2 = tpu.matmul %0, %1, %cst {dimension_numbers = #tpu.dot_dimension_numbers<[1], [0], [0], [1], [0, 0, 1, 1], [], []>} : vector<2x1600xbf16>, vector<1600x256xbf16>, vector<2x256xf32> -> vector<2x256xf32>
    %c0_3 = arith.constant 0 : index
    %c0_4 = arith.constant 0 : index
    %3 = vector.load %arg3[%c0_3, %c0_4] : memref<1x256xf32, #tpu.memory_space<vmem>>, vector<1x256xf32>
    %4 = vector.broadcast %3 : vector<1x256xf32> to vector<2x256xf32>
    %5 = arith.addf %2, %4 : vector<2x256xf32>
    %cst_5 = arith.constant 0.000000e+00 : f32
    %6 = vector.broadcast %cst_5 : f32 to vector<2x256xf32>
    %7 = arith.cmpf ogt, %5, %6 : vector<2x256xf32>
    %cst_6 = arith.constant 0.000000e+00 : f32
    %8 = vector.broadcast %cst_6 : f32 to vector<2x256xf32>
    %9 = arith.minimumf %5, %8 : vector<2x256xf32>
    %10 = math.exp %9 : vector<2x256xf32>
    %cst_7 = arith.constant 1.000000e+00 : f32
    %11 = vector.broadcast %cst_7 : f32 to vector<2x256xf32>
    %12 = arith.subf %10, %11 : vector<2x256xf32>
    %13 = arith.select %7, %5, %12 : vector<2x256xi1>, vector<2x256xf32>
    %14 = arith.truncf %13 : vector<2x256xf32> to vector<2x256xbf16>
    %c0_8 = arith.constant 0 : index
    %c0_9 = arith.constant 0 : index
    %15 = vector.load %arg4[%c0_8, %c0_9] : memref<256x8xbf16, #tpu.memory_space<vmem>>, vector<256x8xbf16>
    %cst_10 = arith.constant dense<0.000000e+00> : vector<2x8xf32>
    %16 = tpu.matmul %14, %15, %cst_10 {dimension_numbers = #tpu.dot_dimension_numbers<[1], [0], [0], [1], [0, 0, 1, 1], [], []>} : vector<2x256xbf16>, vector<256x8xbf16>, vector<2x8xf32> -> vector<2x8xf32>
    %c0_11 = arith.constant 0 : index
    %c0_12 = arith.constant 0 : index
    %17 = vector.load %arg5[%c0_11, %c0_12] : memref<1x8xf32, #tpu.memory_space<vmem>>, vector<1x8xf32>
    %18 = vector.broadcast %17 : vector<1x8xf32> to vector<2x8xf32>
    %19 = arith.addf %16, %18 : vector<2x8xf32>
    %c0_13 = arith.constant 0 : index
    %c0_14 = arith.constant 0 : index
    %20 = vector.load %arg6[%c0_13, %c0_14] : memref<256x8xbf16, #tpu.memory_space<vmem>>, vector<256x8xbf16>
    %cst_15 = arith.constant dense<0.000000e+00> : vector<2x8xf32>
    %21 = tpu.matmul %14, %20, %cst_15 {dimension_numbers = #tpu.dot_dimension_numbers<[1], [0], [0], [1], [0, 0, 1, 1], [], []>} : vector<2x256xbf16>, vector<256x8xbf16>, vector<2x8xf32> -> vector<2x8xf32>
    %c0_16 = arith.constant 0 : index
    %c0_17 = arith.constant 0 : index
    %22 = vector.load %arg7[%c0_16, %c0_17] : memref<1x8xf32, #tpu.memory_space<vmem>>, vector<1x8xf32>
    %23 = vector.broadcast %22 : vector<1x8xf32> to vector<2x8xf32>
    %24 = arith.addf %21, %23 : vector<2x8xf32>
    %25 = math.exp %24 : vector<2x8xf32>
    %cst_18 = arith.constant 1.000000e-07 : f32
    %26 = vector.broadcast %cst_18 : f32 to vector<2x8xf32>
    %27 = arith.addf %25, %26 : vector<2x8xf32>
    %c0_19 = arith.constant 0 : index
    %c0_20 = arith.constant 0 : index
    %28 = vector.load %arg1[%c0_19, %c0_20] : memref<2x8xf32, #tpu.memory_space<vmem>>, vector<2x8xf32>
    %29 = arith.mulf %27, %28 : vector<2x8xf32>
    %30 = arith.addf %19, %29 : vector<2x8xf32>
    %31 = arith.truncf %30 : vector<2x8xf32> to vector<2x8xbf16>
    %c0_21 = arith.constant 0 : index
    %c0_22 = arith.constant 0 : index
    %32 = vector.load %arg8[%c0_21, %c0_22] : memref<8x256xbf16, #tpu.memory_space<vmem>>, vector<8x256xbf16>
    %cst_23 = arith.constant dense<0.000000e+00> : vector<2x256xf32>
    %33 = tpu.matmul %31, %32, %cst_23 {dimension_numbers = #tpu.dot_dimension_numbers<[1], [0], [0], [1], [0, 0, 1, 1], [], []>} : vector<2x8xbf16>, vector<8x256xbf16>, vector<2x256xf32> -> vector<2x256xf32>
    %c0_24 = arith.constant 0 : index
    %c0_25 = arith.constant 0 : index
    %34 = vector.load %arg9[%c0_24, %c0_25] : memref<1x256xf32, #tpu.memory_space<vmem>>, vector<1x256xf32>
    %35 = vector.broadcast %34 : vector<1x256xf32> to vector<2x256xf32>
    %36 = arith.addf %33, %35 : vector<2x256xf32>
    %cst_26 = arith.constant 0.000000e+00 : f32
    %37 = vector.broadcast %cst_26 : f32 to vector<2x256xf32>
    %38 = arith.cmpf ogt, %36, %37 : vector<2x256xf32>
    %cst_27 = arith.constant 0.000000e+00 : f32
    %39 = vector.broadcast %cst_27 : f32 to vector<2x256xf32>
    %40 = arith.minimumf %36, %39 : vector<2x256xf32>
    %41 = math.exp %40 : vector<2x256xf32>
    %cst_28 = arith.constant 1.000000e+00 : f32
    %42 = vector.broadcast %cst_28 : f32 to vector<2x256xf32>
    %43 = arith.subf %41, %42 : vector<2x256xf32>
    %44 = arith.select %38, %36, %43 : vector<2x256xi1>, vector<2x256xf32>
    %45 = arith.truncf %44 : vector<2x256xf32> to vector<2x256xbf16>
    %c0_29 = arith.constant 0 : index
    %c0_30 = arith.constant 0 : index
    %46 = vector.load %arg10[%c0_29, %c0_30] : memref<256x1600xbf16, #tpu.memory_space<vmem>>, vector<256x1600xbf16>
    %cst_31 = arith.constant dense<0.000000e+00> : vector<2x1600xf32>
    %47 = tpu.matmul %45, %46, %cst_31 {dimension_numbers = #tpu.dot_dimension_numbers<[1], [0], [0], [1], [0, 0, 1, 1], [], []>} : vector<2x256xbf16>, vector<256x1600xbf16>, vector<2x1600xf32> -> vector<2x1600xf32>
    %c0_32 = arith.constant 0 : index
    %c0_33 = arith.constant 0 : index
    %48 = vector.load %arg11[%c0_32, %c0_33] : memref<1x1600xf32, #tpu.memory_space<vmem>>, vector<1x1600xf32>
    %49 = vector.broadcast %48 : vector<1x1600xf32> to vector<2x1600xf32>
    %50 = arith.addf %47, %49 : vector<2x1600xf32>
    %cst_34 = arith.constant 0.000000e+00 : f32
    %51 = vector.broadcast %cst_34 : f32 to vector<2x1600xf32>
    %52 = arith.cmpf ogt, %50, %51 : vector<2x1600xf32>
    %cst_35 = arith.constant 0.000000e+00 : f32
    %53 = vector.broadcast %cst_35 : f32 to vector<2x1600xf32>
    %54 = arith.minimumf %50, %53 : vector<2x1600xf32>
    %55 = math.exp %54 : vector<2x1600xf32>
    %cst_36 = arith.constant 1.000000e+00 : f32
    %56 = vector.broadcast %cst_36 : f32 to vector<2x1600xf32>
    %57 = arith.subf %55, %56 : vector<2x1600xf32>
    %58 = arith.select %52, %50, %57 : vector<2x1600xi1>, vector<2x1600xf32>
    %c0_37 = arith.constant 0 : index
    %c0_38 = arith.constant 0 : index
    %59 = vector.load %arg12[%c0_37, %c0_38] : memref<2x8xf32, #tpu.memory_space<vmem>>, vector<2x8xf32>
    tpu.vector_store %arg12[%c0_37, %c0_38], %19 {strides = array<i32>} : memref<2x8xf32, #tpu.memory_space<vmem>>, vector<2x8xf32>,
    %c0_39 = arith.constant 0 : index
    %c0_40 = arith.constant 0 : index
    %60 = vector.load %arg13[%c0_39, %c0_40] : memref<2x8xf32, #tpu.memory_space<vmem>>, vector<2x8xf32>
    tpu.vector_store %arg13[%c0_39, %c0_40], %24 {strides = array<i32>} : memref<2x8xf32, #tpu.memory_space<vmem>>, vector<2x8xf32>,
    %c0_41 = arith.constant 0 : index
    %c0_42 = arith.constant 0 : index
    %61 = vector.load %arg14[%c0_41, %c0_42] : memref<2x1600xf32, #tpu.memory_space<vmem>>, vector<2x1600xf32>
    tpu.vector_store %arg14[%c0_41, %c0_42], %58 {strides = array<i32>} : memref<2x1600xf32, #tpu.memory_space<vmem>>, vector<2x1600xf32>,
    return
  }
}

module attributes {stable_mosaic.version = 11 : i64} {
  func.func @_conv_post_kernel(%arg0: i32, %arg1: memref<1x576x144xbf16, #tpu.memory_space<vmem>>, %arg2: memref<32x576xbf16, #tpu.memory_space<vmem>>, %arg3: memref<32x1xf32, #tpu.memory_space<vmem>>, %arg4: memref<144x576xbf16, #tpu.memory_space<vmem>>, %arg5: memref<1x32x576xbf16, #tpu.memory_space<vmem>>) attributes {dimension_semantics = [#tpu.dimension_semantics<parallel>], iteration_bounds = array<i64: 2>, scalar_prefetch = 0 : i64, scratch_operands = 0 : i64, tpu.core_type = #tpu.core_type<tc>, window_params = [{transform_indices = @transform_0, window_bounds = array<i64: 1, 576, 144>}, {pipeline_mode = #tpu.pipeline_mode<synchronous>, transform_indices = @transform_1, window_bounds = array<i64: 32, 576>}, {pipeline_mode = #tpu.pipeline_mode<synchronous>, transform_indices = @transform_2, window_bounds = array<i64: 32, 1>}, {pipeline_mode = #tpu.pipeline_mode<synchronous>, transform_indices = @transform_3, window_bounds = array<i64: 144, 576>}, {transform_indices = @transform_4, window_bounds = array<i64: 1, 32, 576>}]} {
    %c0 = arith.constant 0 : index
    %c0_0 = arith.constant 0 : index
    %0 = vector.load %arg2[%c0, %c0_0] : memref<32x576xbf16, #tpu.memory_space<vmem>>, vector<32x576xbf16>
    %c0_1 = arith.constant 0 : index
    %c0_2 = arith.constant 0 : index
    %1 = vector.load %arg3[%c0_1, %c0_2] : memref<32x1xf32, #tpu.memory_space<vmem>>, vector<32x1xf32>
    %c0_3 = arith.constant 0 : index
    %c0_4 = arith.constant 0 : index
    %2 = vector.load %arg4[%c0_3, %c0_4] : memref<144x576xbf16, #tpu.memory_space<vmem>>, vector<144x576xbf16>
    %c0_5 = arith.constant 0 : index
    %c0_6 = arith.constant 0 : index
    %c0_7 = arith.constant 0 : index
    %3 = vector.load %arg1[%c0_5, %c0_6, %c0_7] : memref<1x576x144xbf16, #tpu.memory_space<vmem>>, vector<1x576x144xbf16>
    %4 = vector.shape_cast %3 : vector<1x576x144xbf16> to vector<576x144xbf16>
    %cst = arith.constant dense<0.000000e+00> : vector<32x144xf32>
    %5 = tpu.matmul %0, %4, %cst {dimension_numbers = #tpu.dot_dimension_numbers<[1], [0], [0], [1], [0, 0, 1, 1], [], []>} : vector<32x576xbf16>, vector<576x144xbf16>, vector<32x144xf32> -> vector<32x144xf32>
    %6 = vector.broadcast %1 : vector<32x1xf32> to vector<32x144xf32>
    %7 = arith.addf %5, %6 : vector<32x144xf32>
    %cst_8 = arith.constant 0.000000e+00 : f32
    %8 = vector.broadcast %cst_8 : f32 to vector<32x144xf32>
    %9 = arith.cmpf ogt, %7, %8 : vector<32x144xf32>
    %cst_9 = arith.constant 0.000000e+00 : f32
    %10 = vector.broadcast %cst_9 : f32 to vector<32x144xf32>
    %11 = arith.minimumf %7, %10 : vector<32x144xf32>
    %12 = math.exp %11 : vector<32x144xf32>
    %cst_10 = arith.constant 1.000000e+00 : f32
    %13 = vector.broadcast %cst_10 : f32 to vector<32x144xf32>
    %14 = arith.subf %12, %13 : vector<32x144xf32>
    %15 = arith.select %9, %7, %14 : vector<32x144xi1>, vector<32x144xf32>
    %16 = arith.truncf %15 : vector<32x144xf32> to vector<32x144xbf16>
    %cst_11 = arith.constant dense<0.000000e+00> : vector<32x576xf32>
    %17 = tpu.matmul %16, %2, %cst_11 {dimension_numbers = #tpu.dot_dimension_numbers<[1], [0], [0], [1], [0, 0, 1, 1], [], []>} : vector<32x144xbf16>, vector<144x576xbf16>, vector<32x576xf32> -> vector<32x576xf32>
    %18 = arith.truncf %17 : vector<32x576xf32> to vector<32x576xbf16>
    %c0_12 = arith.constant 0 : index
    %c0_13 = arith.constant 0 : index
    %c0_14 = arith.constant 0 : index
    %19 = vector.load %arg5[%c0_12, %c0_13, %c0_14] : memref<1x32x576xbf16, #tpu.memory_space<vmem>>, vector<1x32x576xbf16>
    %20 = vector.shape_cast %19 : vector<1x32x576xbf16> to vector<32x576xbf16>
    %21 = vector.shape_cast %18 : vector<32x576xbf16> to vector<1x32x576xbf16>
    tpu.vector_store %arg5[%c0_12, %c0_13, %c0_14], %21 {strides = array<i32>} : memref<1x32x576xbf16, #tpu.memory_space<vmem>>, vector<1x32x576xbf16>,
    return
  }
  func.func @transform_0(%arg0: i32) -> (i32, i32, i32) {
    %c0_i32 = arith.constant 0 : i32
    %c0_i32_0 = arith.constant 0 : i32
    %c0_i32_1 = arith.constant 0 : i32
    return %arg0, %c0_i32, %c0_i32_0 : i32, i32, i32
  }
  func.func @transform_1(%arg0: i32) -> (i32, i32) {
    %c0_i32 = arith.constant 0 : i32
    %c0_i32_0 = arith.constant 0 : i32
    %c0_i32_1 = arith.constant 0 : i32
    return %c0_i32, %c0_i32_0 : i32, i32
  }
  func.func @transform_2(%arg0: i32) -> (i32, i32) {
    %c0_i32 = arith.constant 0 : i32
    %c0_i32_0 = arith.constant 0 : i32
    %c0_i32_1 = arith.constant 0 : i32
    return %c0_i32, %c0_i32_0 : i32, i32
  }
  func.func @transform_3(%arg0: i32) -> (i32, i32) {
    %c0_i32 = arith.constant 0 : i32
    %c0_i32_0 = arith.constant 0 : i32
    %c0_i32_1 = arith.constant 0 : i32
    return %c0_i32, %c0_i32_0 : i32, i32
  }
  func.func @transform_4(%arg0: i32) -> (i32, i32, i32) {
    %c0_i32 = arith.constant 0 : i32
    %c0_i32_0 = arith.constant 0 : i32
    %c0_i32_1 = arith.constant 0 : i32
    return %arg0, %c0_i32, %c0_i32_0 : i32, i32, i32
  }
}

module attributes {stable_mosaic.version = 11 : i64} {
  func.func @_conv_elu_kernel(%arg0: i32, %arg1: memref<1x288x676xbf16, #tpu.memory_space<vmem>>, %arg2: memref<16x288xbf16, #tpu.memory_space<vmem>>, %arg3: memref<16x1xf32, #tpu.memory_space<vmem>>, %arg4: memref<1x16x676xbf16, #tpu.memory_space<vmem>>) attributes {dimension_semantics = [#tpu.dimension_semantics<parallel>], iteration_bounds = array<i64: 2>, scalar_prefetch = 0 : i64, scratch_operands = 0 : i64, tpu.core_type = #tpu.core_type<tc>, window_params = [{transform_indices = @transform_0, window_bounds = array<i64: 1, 288, 676>}, {pipeline_mode = #tpu.pipeline_mode<synchronous>, transform_indices = @transform_1, window_bounds = array<i64: 16, 288>}, {pipeline_mode = #tpu.pipeline_mode<synchronous>, transform_indices = @transform_2, window_bounds = array<i64: 16, 1>}, {transform_indices = @transform_3, window_bounds = array<i64: 1, 16, 676>}]} {
    %c0 = arith.constant 0 : index
    %c0_0 = arith.constant 0 : index
    %0 = vector.load %arg2[%c0, %c0_0] : memref<16x288xbf16, #tpu.memory_space<vmem>>, vector<16x288xbf16>
    %c0_1 = arith.constant 0 : index
    %c0_2 = arith.constant 0 : index
    %1 = vector.load %arg3[%c0_1, %c0_2] : memref<16x1xf32, #tpu.memory_space<vmem>>, vector<16x1xf32>
    %c0_3 = arith.constant 0 : index
    %c0_4 = arith.constant 0 : index
    %c0_5 = arith.constant 0 : index
    %2 = vector.load %arg1[%c0_3, %c0_4, %c0_5] : memref<1x288x676xbf16, #tpu.memory_space<vmem>>, vector<1x288x676xbf16>
    %3 = vector.shape_cast %2 : vector<1x288x676xbf16> to vector<288x676xbf16>
    %cst = arith.constant dense<0.000000e+00> : vector<16x676xf32>
    %4 = tpu.matmul %0, %3, %cst {dimension_numbers = #tpu.dot_dimension_numbers<[1], [0], [0], [1], [0, 0, 1, 1], [], []>} : vector<16x288xbf16>, vector<288x676xbf16>, vector<16x676xf32> -> vector<16x676xf32>
    %5 = vector.broadcast %1 : vector<16x1xf32> to vector<16x676xf32>
    %6 = arith.addf %4, %5 : vector<16x676xf32>
    %cst_6 = arith.constant 0.000000e+00 : f32
    %7 = vector.broadcast %cst_6 : f32 to vector<16x676xf32>
    %8 = arith.cmpf ogt, %6, %7 : vector<16x676xf32>
    %cst_7 = arith.constant 0.000000e+00 : f32
    %9 = vector.broadcast %cst_7 : f32 to vector<16x676xf32>
    %10 = arith.minimumf %6, %9 : vector<16x676xf32>
    %11 = math.exp %10 : vector<16x676xf32>
    %cst_8 = arith.constant 1.000000e+00 : f32
    %12 = vector.broadcast %cst_8 : f32 to vector<16x676xf32>
    %13 = arith.subf %11, %12 : vector<16x676xf32>
    %14 = arith.select %8, %6, %13 : vector<16x676xi1>, vector<16x676xf32>
    %15 = arith.truncf %14 : vector<16x676xf32> to vector<16x676xbf16>
    %c0_9 = arith.constant 0 : index
    %c0_10 = arith.constant 0 : index
    %c0_11 = arith.constant 0 : index
    %16 = vector.load %arg4[%c0_9, %c0_10, %c0_11] : memref<1x16x676xbf16, #tpu.memory_space<vmem>>, vector<1x16x676xbf16>
    %17 = vector.shape_cast %16 : vector<1x16x676xbf16> to vector<16x676xbf16>
    %18 = vector.shape_cast %15 : vector<16x676xbf16> to vector<1x16x676xbf16>
    tpu.vector_store %arg4[%c0_9, %c0_10, %c0_11], %18 {strides = array<i32>} : memref<1x16x676xbf16, #tpu.memory_space<vmem>>, vector<1x16x676xbf16>,
    return
  }
  func.func @transform_0(%arg0: i32) -> (i32, i32, i32) {
    %c0_i32 = arith.constant 0 : i32
    %c0_i32_0 = arith.constant 0 : i32
    %c0_i32_1 = arith.constant 0 : i32
    return %arg0, %c0_i32, %c0_i32_0 : i32, i32, i32
  }
  func.func @transform_1(%arg0: i32) -> (i32, i32) {
    %c0_i32 = arith.constant 0 : i32
    %c0_i32_0 = arith.constant 0 : i32
    %c0_i32_1 = arith.constant 0 : i32
    return %c0_i32, %c0_i32_0 : i32, i32
  }
  func.func @transform_2(%arg0: i32) -> (i32, i32) {
    %c0_i32 = arith.constant 0 : i32
    %c0_i32_0 = arith.constant 0 : i32
    %c0_i32_1 = arith.constant 0 : i32
    return %c0_i32, %c0_i32_0 : i32, i32
  }
  func.func @transform_3(%arg0: i32) -> (i32, i32, i32) {
    %c0_i32 = arith.constant 0 : i32
    %c0_i32_0 = arith.constant 0 : i32
    %c0_i32_1 = arith.constant 0 : i32
    return %arg0, %c0_i32, %c0_i32_0 : i32, i32, i32
  }
}

module attributes {stable_mosaic.version = 11 : i64} {
  func.func @_final_conv_kernel(%arg0: memref<144x1568xbf16, #tpu.memory_space<vmem>>, %arg1: memref<1x144xbf16, #tpu.memory_space<vmem>>, %arg2: memref<1x1xf32, #tpu.memory_space<smem>>, %arg3: memref<1x1568xf32, #tpu.memory_space<vmem>>) attributes {dimension_semantics = [], scalar_prefetch = 0 : i64, scratch_operands = 0 : i64, tpu.core_type = #tpu.core_type<tc>} {
    %c0 = arith.constant 0 : index
    %c0_0 = arith.constant 0 : index
    %0 = vector.load %arg1[%c0, %c0_0] : memref<1x144xbf16, #tpu.memory_space<vmem>>, vector<1x144xbf16>
    %c0_1 = arith.constant 0 : index
    %c0_2 = arith.constant 0 : index
    %1 = vector.load %arg0[%c0_1, %c0_2] : memref<144x1568xbf16, #tpu.memory_space<vmem>>, vector<144x1568xbf16>
    %cst = arith.constant dense<0.000000e+00> : vector<1x1568xf32>
    %2 = tpu.matmul %0, %1, %cst {dimension_numbers = #tpu.dot_dimension_numbers<[1], [0], [0], [1], [0, 0, 1, 1], [], []>} : vector<1x144xbf16>, vector<144x1568xbf16>, vector<1x1568xf32> -> vector<1x1568xf32>
    %c0_3 = arith.constant 0 : index
    %c0_4 = arith.constant 0 : index
    %3 = memref.load %arg2[%c0_3, %c0_4] : memref<1x1xf32, #tpu.memory_space<smem>>
    %4 = vector.broadcast %3 : f32 to vector<1x1568xf32>
    %5 = arith.addf %2, %4 : vector<1x1568xf32>
    %c0_5 = arith.constant 0 : index
    %c0_6 = arith.constant 0 : index
    %6 = vector.load %arg3[%c0_5, %c0_6] : memref<1x1568xf32, #tpu.memory_space<vmem>>, vector<1x1568xf32>
    tpu.vector_store %arg3[%c0_5, %c0_6], %5 {strides = array<i32>} : memref<1x1568xf32, #tpu.memory_space<vmem>>, vector<1x1568xf32>,
    return
  }
}

</mosaic_0001>

<bundles_post_ra>
// kernel: vae_forward.6
= control target key start
LH: loop header
LB: loop body
LE: loop exit
PB: predicated region body
PF: predicated region fallthrough
CT: control target
= control target key end

     0   :  { %s1776_s15 = smov 0   ;;  %s2273_s0 = inlined_call_operand.vmem [shape: bf16[2,9,676], index: 0, kind: input, shape index: {}]   ;;  %s2274_s1 = inlined_call_operand.vmem [shape: bf16[32,9], index: 1, kind: input, shape index: {}]   ;;  %s2275_s2 = inlined_call_operand.vmem [shape: f32[32,1], index: 2, kind: input, shape index: {}]   ;;  %s2276_s3 = inlined_call_operand.vmem [shape: bf16[676,169], index: 3, kind: input, shape index: {}]   ;;  %s2277_s4 = inlined_call_operand.vmem [shape: bf16[2,32,169], index: 4, kind: output, shape index: {}]  }
   0x1 LB: > { %s1379_s16 = sadd.s32 4294967295, %s1747_s15   ;;  %p1383_p0 = scmp.ge.s32.totalorder %s1747_s15, 1  ;;  %s1747_s15 = sphi %s1776_s15, %s14_s15  }
   0x2   : > { %p162_p1 = scmp.lt.s32.totalorder %s1747_s15, 3 }
   0x4   : > { %p163_p2 = pnand %p1383_p0, %p162_p1 }
   0x5   : > { %p188_p3 = scmp.lt.s32.totalorder (!%p163_p2), %s1379_s16, 1  ;;  %vm359_vm0 = vcmask (!%p163_p2), 1043456   ;;  %v1749_v0 = vmov (!%p163_p2), 0   ;;  %vm360_vm1 = vcmask (!%p163_p2), 1044480   ;;  %v1750_v1 = vmov (!%p163_p2), 65535   ;;  %v203_v3 = vld [vmem:[%s2275_s2] sm:$0xff] (!%p163_p2) }
   0x6   : > { %166 = sbr.rel (%p163_p2) target bundleno = 550 (0x226), region = 36  ;;  %413 = vmatprep.mubr.bf16.mxu0 (!%p163_p2), %v1749_v0  ;;  %1552 = vset.pattern.permute.xlu0 (!%p163_p2), %v1749_v0  ;;  %v361_v2 = vsel (!%p163_p2), %vm359_vm0, 4294967295, %v1750_v1  ;;  %v205_v4 = vld [vmem:[%s2275_s2 + $0x10] sm:$0xff] (!%p163_p2)  ;;  %v204_v5 = vld [vmem:[%s2275_s2 + $0x8] sm:$0xff] (!%p163_p2)  ;;  %v206_v7 = vld [vmem:[%s2275_s2 + $0x18] sm:$0xff] (!%p163_p2)  ;;  %vm352_vm2 = vcmask (!%p163_p2), 72704  }
   0x7   : > { %1553 = vset.pattern.permute.xlu1 (!%p163_p2), %v1749_v0  ;;  %300 = vperm.xlu0 (!%p163_p2), %1552, %v203_v3   ;;  %v362_v6 = vsel (!%p163_p2), %vm360_vm1, %v361_v2, 0  ;;  %v1557_v14 = vld [vmem:[%s2274_s1] sm:$0xff] (!%p163_p2)   ;;  %v1583_v21 = vld [vmem:[%s2276_s3 + $0x114] ss:$8 sps:$4 sm:$0xff] (!%p163_p2)   ;;  %v1561_v22 = vld [vmem:[%s2274_s1 + $0x8] sm:$0xff] (!%p163_p2)  }
   0x8   : > { %310 = vperm.xlu1 (!%p163_p2), %1553, %v205_v4   ;;  %v1577_v19 = vld [vmem:[%s2276_s3 + $0x104] ss:$8 sps:$4 sm:$0xff] (!%p163_p2)   ;;  %v1582_v20 = vld [vmem:[%s2276_s3 + $0x100] ss:$8 sps:$4 sm:$0xff] (!%p163_p2)   ;;  %v1588_v23 = vld [vmem:[%s2276_s3 + $0x110] ss:$8 sps:$4 sm:$0xff] (!%p163_p2)  }
   0x9   : > { %1188 = vmatprep.subr.bf16.mxu1 (!%p163_p2), %v1577_v19  ;;  %v1589_v24 = vld [vmem:[%s2276_s3 + $0x124] ss:$8 sps:$4 sm:$0xff] (!%p163_p2)   ;;  %v1594_v25 = vld [vmem:[%s2276_s3 + $0x120] ss:$8 sps:$4 sm:$0xff] (!%p163_p2)   ;;  %v1595_v26 = vld [vmem:[%s2276_s3 + $0x134] ss:$8 sps:$4 sm:$0xff] (!%p163_p2)  }
   0xa   : > { %1189 = vmatpush1.bf16.msra.mxu1 (!%p163_p2), %v1582_v20  ;;  %v1600_v28 = vld [vmem:[%s2276_s3 + $0x130] ss:$8 sps:$4 sm:$0xff] (!%p163_p2)   ;;  %v1601_v29 = vld [vmem:[%s2276_s3 + $0x144] ss:$8 sps:$4 sm:$0xff] (!%p163_p2)   ;;  %v1606_v32 = vld [vmem:[%s2276_s3 + $0x140] ss:$8 sps:$4 sm:$0xff] (!%p163_p2)  }
   0xb   : > { %305 = vperm.xlu0 (!%p163_p2), %1552, %v204_v5   ;;  %1190 = vmatprep.subr.bf16.mxu1 (!%p163_p2), %v1583_v21  ;;  %v1567_v31 = vld [vmem:[%s2276_s3 + $0x4] ss:$8 sps:$4 sm:$0xff] (!%p163_p2)   ;;  %v1607_v33 = vld [vmem:[%s2276_s3 + $0x154] ss:$8 sps:$4 sm:$0xff] (!%p163_p2)   ;;  %v1612_v34 = vld [vmem:[%s2276_s3 + $0x150] ss:$8 sps:$4 sm:$0xff] (!%p163_p2)  }
   0xc   : > { %315 = vperm.xlu1 (!%p163_p2), %1553, %v206_v7   ;;  %v1565_v35 = vld [vmem:[%s2276_s3] ss:$8 sps:$4 sm:$0xff] (!%p163_p2)   ;;  %v1570_v36 = vld [vmem:[%s2276_s3 + $0x14] ss:$8 sps:$4 sm:$0xff] (!%p163_p2)   ;;  %v1568_v37 = vld [vmem:[%s2276_s3 + $0x10] ss:$8 sps:$4 sm:$0xff] (!%p163_p2)  }
   0xd   : > { %s2281_s16 = smov (!%p188_p3, %s1379_s16), 1  ;;  %v1573_v38 = vld [vmem:[%s2276_s3 + $0x24] ss:$8 sps:$4 sm:$0xff]   ;;  %v1571_v39 = vld [vmem:[%s2276_s3 + $0x20] ss:$8 sps:$4 sm:$0xff]  }
   0xe   : > { %s1541_s19 = smul.u32 48, %s2281_s16  ;;  %1191 = vmatpush1.bf16.msra.mxu1 %v1588_v23  ;;  %v1576_v40 = vld [vmem:[%s2276_s3 + $0x34] ss:$8 sps:$4 sm:$0xff]   ;;  %v1574_v41 = vld [vmem:[%s2276_s3 + $0x30] ss:$8 sps:$4 sm:$0xff]   ;;  %s1520_s9 = sshll.u32 %s2281_s16, 5 }
   0xf   : > { %1192 = vmatprep.subr.bf16.mxu1 %v1589_v24  ;;  %v1581_v42 = vld [vmem:[%s2276_s3 + $0x44] ss:$8 sps:$4 sm:$0xff]   ;;  %v1579_v43 = vld [vmem:[%s2276_s3 + $0x40] ss:$8 sps:$4 sm:$0xff]   ;;  %v1587_v44 = vld [vmem:[%s2276_s3 + $0x54] ss:$8 sps:$4 sm:$0xff]   ;;  %s197_s12 = scalar_lea.vmem %s2277_s4, %s1520_s9 }
  0x10   : > { %s1803_s26 = scalar_lea.vmem %s2273_s0, %s1541_s19  ;;  %v1585_v45 = vld [vmem:[%s2276_s3 + $0x50] ss:$8 sps:$4 sm:$0xff]   ;;  %v1593_v46 = vld [vmem:[%s2276_s3 + $0x64] ss:$8 sps:$4 sm:$0xff]   ;;  %v1591_v47 = vld [vmem:[%s2276_s3 + $0x60] ss:$8 sps:$4 sm:$0xff]  }
  0x11   : > { %v1554_v8 = vld [vmem:[%s1803_s26 + $0x4] ss:$24 sps:$4 sm:$0x1f]   ;;  %v1556_v9 = vld [vmem:[%s1803_s26] ss:$24 sps:$4 sm:$0x1f]  }
  0x12   : > { %v367_v10 = vand.u32 %v1554_v8, %v362_v6  ;;  %v1558_v11 = vld [vmem:[%s1803_s26 + $0x8] ss:$24 sps:$4 sm:$0x1f]   ;;  %v1560_v12 = vld [vmem:[%s1803_s26 + $0xc] ss:$24 sps:$4 sm:$0x1f]   ;;  %v364_v13 = vand.u32 %v1556_v9, %v362_v6  ;;  %1193 = vmatpush1.bf16.msra.mxu1 %v1594_v25 }
  0x13   : > { %v373_v15 = vand.u32 %v1560_v12, %v362_v6  ;;  %v1564_v16 = vld [vmem:[%s1803_s26 + $0x14] ss:$24 sps:$4 sm:$0x1f]   ;;  %v370_v17 = vand.u32 %v1558_v11, %v362_v6  ;;  %v1562_v27 = vld [vmem:[%s1803_s26 + $0x10] ss:$24 sps:$4 sm:$0x1f]   ;;  %1194 = vmatprep.subr.bf16.mxu1 %v1595_v26 }
  0x14   : > { %381 = vmatprep.subr.bf16.mxu0 %v367_v10  ;;  %v379_v18 = vand.u32 %v1564_v16, %v362_v6  ;;  %v376_v30 = vand.u32 %v1562_v27, %v362_v6  ;;  %v1599_v48 = vld [vmem:[%s2276_s3 + $0x74] ss:$8 sps:$4 sm:$0xff]   ;;  %v1597_v49 = vld [vmem:[%s2276_s3 + $0x70] ss:$8 sps:$4 sm:$0xff]   ;;  %v1605_v50 = vld [vmem:[%s2276_s3 + $0x84] ss:$8 sps:$4 sm:$0xff]  }
  0x15   : > { %382 = vmatpush1.bf16.msra.mxu0 %v364_v13  ;;  %v1603_v51 = vld [vmem:[%s2276_s3 + $0x80] ss:$8 sps:$4 sm:$0xff]   ;;  %v1611_v52 = vld [vmem:[%s2276_s3 + $0x94] ss:$8 sps:$4 sm:$0xff]   ;;  %v1609_v53 = vld [vmem:[%s2276_s3 + $0x90] ss:$8 sps:$4 sm:$0xff]  }
  0x16   : > { %434 = vmatprep.subr.bf16.mxu0 %v373_v15  ;;  %1195 = vmatpush1.bf16.msra.mxu1 %v1600_v28  ;;  %v1613_v54 = vld [vmem:[%s2276_s3 + $0x164] ss:$8 sps:$4 sm:$0xff]   ;;  %v1618_v56 = vld [vmem:[%s2276_s3 + $0x160] ss:$8 sps:$4 sm:$0xff]   ;;  %v1619_v58 = vld [vmem:[%s2276_s3 + $0x174] ss:$8 sps:$4 sm:$0xff]  }
  0x17   : > { %1196 = vmatprep.subr.bf16.mxu1 %v1601_v29  ;;  %v1617_v55 = vld [vmem:[%s2276_s3 + $0xa4] ss:$8 sps:$4 sm:$0xff]   ;;  %v1615_v57 = vld [vmem:[%s2276_s3 + $0xa0] ss:$8 sps:$4 sm:$0xff]   ;;  %v1623_v59 = vld [vmem:[%s2276_s3 + $0xb4] ss:$8 sps:$4 sm:$0xff]  }
  0x18   : > { %1395 = vmatmul.mubr.msk.bf16.vlgmr.msra.gmra.mrb[0].mxu0 %vm352_vm2, %v1557_v14  ;;  %v1624_v60 = vld [vmem:[%s2276_s3 + $0x170] ss:$8 sps:$4 sm:$0xff]   ;;  %v1625_v62 = vld [vmem:[%s2276_s3 + $0x184] ss:$8 sps:$4 sm:$0xff]   ;;  %v1627_v1 = vld [vmem:[%s2276_s3 + $0xc0] ss:$8 sps:$4 sm:$0xff]  }
  0x19   : > { %435 = vmatpush1.bf16.msra.mxu0 %v370_v17  ;;  %423 = vmatprep.mubr.bf16.mxu0 %v1749_v0  ;;  %v1621_v61 = vld [vmem:[%s2276_s3 + $0xb0] ss:$8 sps:$4 sm:$0xff]   ;;  %v1629_v63 = vld [vmem:[%s2276_s3 + $0xc4] ss:$8 sps:$4 sm:$0xff]   ;;  %v1631_v2 = vld [vmem:[%s2276_s3 + $0x194] ss:$8 sps:$4 sm:$0xff]  }
  0x1a   : > { %487 = vmatprep.subr.bf16.mxu0 %v379_v18  ;;  %1197 = vmatpush1.bf16.msra.mxu1 %v1606_v32  ;;  %v1635_v3 = vld [vmem:[%s2276_s3 + $0xd4] ss:$8 sps:$4 sm:$0xff]   ;;  %v1636_v4 = vld [vmem:[%s2276_s3 + $0x190] ss:$8 sps:$4 sm:$0xff]   ;;  %v1637_v6 = vld [vmem:[%s2276_s3 + $0x1a4] ss:$8 sps:$4 sm:$0xff]  }
  0x1b   : > { %1198 = vmatprep.subr.bf16.mxu1 %v1607_v33  ;;  %v1633_v5 = vld [vmem:[%s2276_s3 + $0xd0] ss:$8 sps:$4 sm:$0xff]   ;;  %v1641_v7 = vld [vmem:[%s2276_s3 + $0xe4] ss:$8 sps:$4 sm:$0xff]   ;;  %v1642_v8 = vld [vmem:[%s2276_s3 + $0x1a0] ss:$8 sps:$4 sm:$0xff]  }
  0x1c   : > { %v1639_v9 = vld [vmem:[%s2276_s3 + $0xe0] ss:$8 sps:$4 sm:$0xff]   ;;  %v1643_v10 = vld [vmem:[%s2276_s3 + $0x1b4] ss:$8 sps:$4 sm:$0xff]   ;;  %v1648_v12 = vld [vmem:[%s2276_s3 + $0x1b0] ss:$8 sps:$4 sm:$0xff]  }
  0x1d   : > { %v1647_v11 = vld [vmem:[%s2276_s3 + $0xf4] ss:$8 sps:$4 sm:$0xff]   ;;  %v1645_v13 = vld [vmem:[%s2276_s3 + $0xf0] ss:$8 sps:$4 sm:$0xff]   ;;  %v1651_v15 = vld [vmem:[%s2276_s3 + $0x1c0] ss:$8 sps:$4 sm:$0xff]  }
  0x1e   : > { %1199 = vmatpush1.bf16.msra.mxu1 %v1612_v34  ;;  %v1652_v16 = vld [vmem:[%s2276_s3 + $0x1d4] ss:$8 sps:$4 sm:$0xff]   ;;  %v1654_v17 = vld [vmem:[%s2276_s3 + $0x1d0] ss:$8 sps:$4 sm:$0xff]   ;;  %v1655_v18 = vld [vmem:[%s2276_s3 + $0x1e4] ss:$8 sps:$4 sm:$0xff]  }
  0x1f   : > { %1200 = vmatprep.subr.bf16.mxu1 %v1613_v54  ;;  %v1657_v19 = vld [vmem:[%s2276_s3 + $0x1e0] ss:$8 sps:$4 sm:$0xff]   ;;  %v1658_v20 = vld [vmem:[%s2276_s3 + $0x1f4] ss:$8 sps:$4 sm:$0xff]   ;;  %v1660_v21 = vld [vmem:[%s2276_s3 + $0x1f0] ss:$8 sps:$4 sm:$0xff]  }
  0x20   : > { %1396 = vmatmul.mubr.msk.bf16.gmra.mrb[4].mxu0 %vm352_vm2, %v1561_v22 }
  0x21   : > { %466 = vmatprep.mubr.bf16.mxu0 %v1749_v0 }
  0x22   : > { %1201 = vmatpush1.bf16.msra.mxu1 %v1618_v56 }
  0x23   : > { %1202 = vmatprep.subr.bf16.mxu1 %v1619_v58 }
  0x26   : > { %1203 = vmatpush1.bf16.msra.mxu1 %v1624_v60 }
  0x27   : > { %1204 = vmatprep.subr.bf16.mxu1 %v1625_v62 }
  0x28   : > { %1397 = vmatmul.mubr.msk.bf16.vlgmr.msra.gmra.mrb[8].mxu0 %vm352_vm2, %v1557_v14 }
  0x29   : > { %476 = vmatprep.mubr.bf16.mxu0 %v1749_v0  ;;  %488 = vmatpush1.bf16.msra.mxu0 %v376_v30 }
  0x2a   : > { %1135 = vmatprep.subr.bf16.mxu0 %v1567_v31 }
  0x30   : > { %1398 = vmatmul.mubr.msk.bf16.gmra.mrb[12].mxu0 %vm352_vm2, %v1561_v22 }
  0x31   : > { %519 = vmatprep.mubr.bf16.mxu0 %v1749_v0 }
  0x38   : > { %1399 = vmatmul.mubr.msk.bf16.vlgmr.msra.gmra.mrb[16].mxu0 %vm352_vm2, %v1557_v14  ;;  %v1649_v14 = vld [vmem:[%s2276_s3 + $0x1c4] ss:$8 sps:$4 sm:$0xff]  }
  0x39   : > { %529 = vmatprep.mubr.bf16.mxu0 %v1749_v0  ;;  %1136 = vmatpush1.bf16.msra.mxu0 %v1565_v35  ;;  %v1630_v0 = vld [vmem:[%s2276_s3 + $0x180] ss:$8 sps:$4 sm:$0xff]  }
  0x3a   : > { %1137 = vmatprep.subr.bf16.mxu0 %v1570_v36  ;;  %1205 = vmatpush1.bf16.msra.mxu1 %v1630_v0 }
  0x3b   : > { %1206 = vmatprep.subr.bf16.mxu1 %v1631_v2 }
  0x3d   : > { %1138 = vmatpush1.bf16.msra.mxu0 %v1568_v37 }
  0x3e   : > { %1139 = vmatprep.subr.bf16.mxu0 %v1573_v38  ;;  %1207 = vmatpush1.bf16.msra.mxu1 %v1636_v4 }
  0x3f   : > { %1208 = vmatprep.subr.bf16.mxu1 %v1637_v6 }
  0x40   : > { %1400 = vmatmul.mubr.msk.bf16.gmra.mrb[20].mxu0 %vm352_vm2, %v1561_v22  ;;  %v1663_v22 = vld [vmem:[%s2276_s3 + $0x204] ss:$8 sps:$4 sm:$0xff]  }
  0x41   : > { %1140 = vmatpush1.bf16.msra.mxu0 %v1571_v39 }
  0x42   : > { %1141 = vmatprep.subr.bf16.mxu0 %v1576_v40  ;;  %1209 = vmatpush1.bf16.msra.mxu1 %v1642_v8 }
  0x43   : > { %1210 = vmatprep.subr.bf16.mxu1 %v1643_v10 }
  0x45   : > { %1142 = vmatpush1.bf16.msra.mxu0 %v1574_v41 }
  0x46   : > { %1143 = vmatprep.subr.bf16.mxu0 %v1581_v42  ;;  %1211 = vmatpush1.bf16.msra.mxu1 %v1648_v12 }
  0x47   : > { %1212 = vmatprep.subr.bf16.mxu1 %v1649_v14 }
  0x49   : > { %1144 = vmatpush1.bf16.msra.mxu0 %v1579_v43 }
  0x4a   : > { %1145 = vmatprep.subr.bf16.mxu0 %v1587_v44  ;;  %1213 = vmatpush1.bf16.msra.mxu1 %v1651_v15 }
  0x4b   : > { %1214 = vmatprep.subr.bf16.mxu1 %v1652_v16 }
  0x4d   : > { %1146 = vmatpush1.bf16.msra.mxu0 %v1585_v45 }
  0x4e   : > { %1147 = vmatprep.subr.bf16.mxu0 %v1593_v46  ;;  %1215 = vmatpush1.bf16.msra.mxu1 %v1654_v17 }
  0x4f   : > { %1216 = vmatprep.subr.bf16.mxu1 %v1655_v18 }
  0x51   : > { %1148 = vmatpush1.bf16.msra.mxu0 %v1591_v47 }
  0x52   : > { %1149 = vmatprep.subr.bf16.mxu0 %v1599_v48  ;;  %1217 = vmatpush1.bf16.msra.mxu1 %v1657_v19 }
  0x53   : > { %1218 = vmatprep.subr.bf16.mxu1 %v1658_v20 }
  0x55   : > { %1150 = vmatpush1.bf16.msra.mxu0 %v1597_v49 }
  0x56   : > { %1151 = vmatprep.subr.bf16.mxu0 %v1605_v50  ;;  %1219 = vmatpush1.bf16.msra.mxu1 %v1660_v21 }
  0x57   : > { %1241 = vmatprep.subr.bf16.mxu1 %v1663_v22 }
  0x59   : > { %1152 = vmatpush1.bf16.msra.mxu0 %v1603_v51 }
  0x5a   : > { %1153 = vmatprep.subr.bf16.mxu0 %v1611_v52 }
  0x5d   : > { %1154 = vmatpush1.bf16.msra.mxu0 %v1609_v53 }
  0x5e   : > { %1155 = vmatprep.subr.bf16.mxu0 %v1617_v55 }
  0x61   : > { %1156 = vmatpush1.bf16.msra.mxu0 %v1615_v57 }
  0x62   : > { %1157 = vmatprep.subr.bf16.mxu0 %v1623_v59 }
  0x65   : > { %1158 = vmatpush1.bf16.msra.mxu0 %v1621_v61 }
  0x66   : > { %1159 = vmatprep.subr.bf16.mxu0 %v1629_v63 }
  0x69   : > { %1160 = vmatpush1.bf16.msra.mxu0 %v1627_v1 }
  0x6a   : > { %1161 = vmatprep.subr.bf16.mxu0 %v1635_v3 }
  0x6d   : > { %1162 = vmatpush1.bf16.msra.mxu0 %v1633_v5 }
  0x6e   : > { %1163 = vmatprep.subr.bf16.mxu0 %v1641_v7 }
  0x71   : > { %1164 = vmatpush1.bf16.msra.mxu0 %v1639_v9 }
  0x72   : > { %1165 = vmatprep.subr.bf16.mxu0 %v1647_v11 }
  0x75   : > { %1166 = vmatpush1.bf16.msra.mxu0 %v1645_v13 }
  0x86   : > { %v2026_v23 = vpop.permute.xlu0 %300 }
  0x87   : > { %v2036_v30 = vpop.permute.xlu1 %310 }
  0x8a   : > { %v2028_v25 = vpop.permute.xlu0 %305 }
  0x8b   : > { %v2045_v43 = vpop.permute.xlu1 %315 }
  0xeb   : > { %v415_v24 = vpop.f32.mrb[0].mxu0 }
  0xec   : > { %v2031_v26 = vadd.f32 %v415_v24, %v2026_v23  ;;  %v417_v27 = vpop.f32.mrb[1].mxu0 }
  0xed   : > { %v2034_v28 = vadd.f32 %v417_v27, %v2026_v23  ;;  %v419_v29 = vpop.f32.mrb[2].mxu0 }
  0xee   : > { %v564_v31 = vmin.f32 %v2031_v26, 0.0  ;;  %v420_v32 = vadd.f32 %v419_v29, %v2028_v25  ;;  %v421_v33 = vpop.f32.mrb[3].mxu0  ;;  %vm540_vm3 = vcmp.gt.f32.partialorder %v2031_v26, 0.0 }
  0xef   : > { %v565_v34 = vmin.f32 %v2034_v28, 0.0  ;;  %v2042_v35 = vadd.f32 %v421_v33, %v2028_v25  ;;  %vm541_vm4 = vcmp.gt.f32.partialorder %v2034_v28, 0.0 }
  0xf0   : > { %v588_v36 = vmul.f32 1.442695, %v564_v31  ;;  %v570_v37 = vmin.f32 %v420_v32, 0.0  ;;  %vm546_vm5 = vcmp.gt.f32.partialorder %v420_v32, 0.0 }
  0xf1   : > { %v590_v38 = vmul.f32 1.442695, %v565_v34  ;;  %v571_v39 = vmin.f32 %v2042_v35, 0.0  ;;  %vm547_vm6 = vcmp.gt.f32.partialorder %v2042_v35, 0.0 }
  0xf2   : > { %1693 = vpow2.f32 %v588_v36  ;;  %v600_v40 = vmul.f32 1.442695, %v570_v37 }
  0xf3   : > { %1695 = vpow2.f32 %v590_v38  ;;  %v602_v41 = vmul.f32 1.442695, %v571_v39  ;;  %v425_v42 = vpop.f32.mrb[4].mxu0 }
  0xf4   : > { %1697 = vpow2.f32 %v600_v40  ;;  %v2048_v44 = vadd.f32 %v425_v42, %v2036_v30  ;;  %v427_v45 = vpop.f32.mrb[5].mxu0 }
  0xf5   : > { %1699 = vpow2.f32 %v602_v41  ;;  %v2051_v46 = vadd.f32 %v427_v45, %v2036_v30  ;;  %v429_v47 = vpop.f32.mrb[6].mxu0 }
  0xf6   : > { %v576_v48 = vmin.f32 %v2048_v44, 0.0  ;;  %v2055_v49 = vadd.f32 %v429_v47, %v2045_v43  ;;  %v431_v50 = vpop.f32.mrb[7].mxu0  ;;  %vm552_vm7 = vcmp.gt.f32.partialorder %v2048_v44, 0.0 }
  0xf7   : > { %v577_v51 = vmin.f32 %v2051_v46, 0.0  ;;  %v2059_v52 = vadd.f32 %v431_v50, %v2045_v43  ;;  %vm553_vm8 = vcmp.gt.f32.partialorder %v2051_v46, 0.0 }
  0xf8   : > { %v612_v53 = vmul.f32 1.442695, %v576_v48  ;;  %v582_v54 = vmin.f32 %v2055_v49, 0.0  ;;  %vm558_vm9 = vcmp.gt.f32.partialorder %v2055_v49, 0.0 }
  0xf9   : > { %v614_v55 = vmul.f32 1.442695, %v577_v51  ;;  %v583_v56 = vmin.f32 %v2059_v52, 0.0  ;;  %vm559_vm10 = vcmp.gt.f32.partialorder %v2059_v52, 0.0 }
  0xfa   : > { %1701 = vpow2.f32 %v612_v53  ;;  %v624_v57 = vmul.f32 1.442695, %v582_v54 }
  0xfb   : > { %1703 = vpow2.f32 %v614_v55  ;;  %v626_v58 = vmul.f32 1.442695, %v583_v56  ;;  %v468_v59 = vpop.f32.mrb[8].mxu0 }
  0xfc   : > { %v1694_v60 = vpop.eup %1693  ;;  %1705 = vpow2.f32 %v624_v57  ;;  %v2065_v61 = vadd.f32 %v468_v59, %v2026_v23  ;;  %v470_v62 = vpop.f32.mrb[9].mxu0 }
  0xfd   : > { %v1696_v63 = vpop.eup %1695  ;;  %v1401_v0 = vadd.f32 -1.0, %v1694_v60  ;;  %1707 = vpow2.f32 %v626_v58  ;;  %v2069_v1 = vadd.f32 %v470_v62, %v2026_v23  ;;  %v472_v2 = vpop.f32.mrb[10].mxu0 }
  0xfe   : > { %v1698_v3 = vpop.eup %1697  ;;  %v1402_v4 = vadd.f32 -1.0, %v1696_v63  ;;  %v566_v5 = vmin.f32 %v2065_v61, 0.0  ;;  %v2073_v6 = vadd.f32 %v472_v2, %v2028_v25  ;;  %v474_v7 = vpop.f32.mrb[11].mxu0  ;;  %vm542_vm11 = vcmp.gt.f32.partialorder %v2065_v61, 0.0 }
  0xff   : > { %v1700_v8 = vpop.eup %1699  ;;  %v1407_v9 = vadd.f32 -1.0, %v1698_v3  ;;  %v567_v10 = vmin.f32 %v2069_v1, 0.0  ;;  %v2078_v11 = vadd.f32 %v474_v7, %v2028_v25  ;;  %v660_v12 = vsel %vm540_vm3, %v2031_v26, %v1401_v0 }
 0x100   : > { %v1408_v13 = vadd.f32 -1.0, %v1700_v8  ;;  %v592_v14 = vmul.f32 1.442695, %v566_v5  ;;  %v572_v15 = vmin.f32 %v2073_v6, 0.0  ;;  %v661_v19 = vsel %vm541_vm4, %v2034_v28, %v1402_v4 }
 0x101   : > { %v666_v16 = vsel %vm546_vm5, %v420_v32, %v1407_v9  ;;  %v594_v17 = vmul.f32 1.442695, %v567_v10  ;;  %v573_v18 = vmin.f32 %v2078_v11, 0.0  ;;  %vm548_vm12 = vcmp.gt.f32.partialorder %v2073_v6, 0.0 }
 0x102   : > { %v684_v20 = vpack.c.bf16 %v666_v16, %v660_v12  ;;  %1709 = vpow2.f32 %v592_v14  ;;  %v604_v21 = vmul.f32 1.442695, %v572_v15  ;;  %v667_v22 = vsel %vm547_vm6, %v2042_v35, %v1408_v13 }
 0x103   : > { %1711 = vpow2.f32 %v594_v17  ;;  %v606_v24 = vmul.f32 1.442695, %v573_v18  ;;  %v685_v26 = vpack.c.bf16 %v667_v22, %v661_v19  ;;  %v478_v27 = vpop.f32.mrb[12].mxu0  ;;  %vm543_vm13 = vcmp.gt.f32.partialorder %v2069_v1, 0.0 }
 0x104   : > { %v1702_v29 = vpop.eup %1701  ;;  %1713 = vpow2.f32 %v604_v21  ;;  %v2090_v31 = vadd.f32 %v478_v27, %v2036_v30  ;;  %v480_v32 = vpop.f32.mrb[13].mxu0  ;;  %vm549_vm14 = vcmp.gt.f32.partialorder %v2078_v11, 0.0 }
 0x105   : > { %v1704_v33 = vpop.eup %1703  ;;  %1715 = vpow2.f32 %v606_v24  ;;  %1167 = vmatprep.mubr.bf16.mxu0 %v685_v26  ;;  %v2094_v28 = vadd.f32 %v480_v32, %v2036_v30  ;;  %v482_v34 = vpop.f32.mrb[14].mxu0  ;;  %v1413_v36 = vadd.f32 -1.0, %v1702_v29  ;;  %v1661_v29 = vld [vmem:[%s2276_s3 + $0x200] ss:$8 sps:$4 sm:$0xff]  }
 0x106   : > { %v1706_v35 = vpop.eup %1705  ;;  %v1414_v37 = vadd.f32 -1.0, %v1704_v33  ;;  %1168 = vmatmul.mubr.bf16.vlgmr.msra.gmra.mrb[24].mxu0 %v684_v20  ;;  %v578_v38 = vmin.f32 %v2090_v31, 0.0  ;;  %v2098_v39 = vadd.f32 %v482_v34, %v2045_v43  ;;  %v484_v40 = vpop.f32.mrb[15].mxu0  ;;  %vm554_vm15 = vcmp.gt.f32.partialorder %v2090_v31, 0.0 }
 0x107   : > { %v1708_v41 = vpop.eup %1707  ;;  %v1419_v42 = vadd.f32 -1.0, %v1706_v35  ;;  %v579_v45 = vmin.f32 %v2094_v28, 0.0  ;;  %v2103_v47 = vadd.f32 %v484_v40, %v2045_v43  ;;  %v672_v58 = vsel %vm552_vm7, %v2048_v44, %v1413_v36 }
 0x108   : > { %v1420_v48 = vadd.f32 -1.0, %v1708_v41  ;;  %v616_v50 = vmul.f32 1.442695, %v578_v38  ;;  %v584_v51 = vmin.f32 %v2098_v39, 0.0  ;;  %v673_v55 = vsel %vm553_vm8, %v2051_v46, %v1414_v37 }
 0x109   : > { %v618_v53 = vmul.f32 1.442695, %v579_v45  ;;  %v585_v54 = vmin.f32 %v2103_v47, 0.0  ;;  %v678_v63 = vsel %vm558_vm9, %v2055_v49, %v1419_v42  ;;  %vm555_vm1 = vcmp.gt.f32.partialorder %v2094_v28, 0.0 }
 0x10a   : > { %1717 = vpow2.f32 %v616_v50  ;;  %v628_v56 = vmul.f32 1.442695, %v584_v51  ;;  %v679_v57 = vsel %vm559_vm10, %v2059_v52, %v1420_v48  ;;  %v690_v3 = vpack.c.bf16 %v678_v63, %v672_v58  ;;  %v1664_v48 = vld [vmem:[%s2276_s3 + $0x210] ss:$8 sps:$4 sm:$0xff]  }
 0x10b   : > { %1719 = vpow2.f32 %v618_v53  ;;  %v630_v59 = vmul.f32 1.442695, %v585_v54  ;;  %v521_v60 = vpop.f32.mrb[16].mxu0  ;;  %v691_v62 = vpack.c.bf16 %v679_v57, %v673_v55  ;;  %vm561_vm2 = vcmp.gt.f32.partialorder %v2103_v47, 0.0  ;;  %v1669_v54 = vld [vmem:[%s2276_s3 + $0x224] ss:$8 sps:$4 sm:$0xff]  }
 0x10c   : > { %v1710_v0 = vpop.eup %1709  ;;  %1721 = vpow2.f32 %v628_v56  ;;  %v2118_v46 = vadd.f32 %v521_v60, %v2026_v23  ;;  %v523_v2 = vpop.f32.mrb[17].mxu0  ;;  %vm560_vm3 = vcmp.gt.f32.partialorder %v2098_v39, 0.0  ;;  %vm1121_vm8 = vcmask 293888  }
 0x10d   : > { %v1712_v52 = vpop.eup %1711  ;;  %1723 = vpow2.f32 %v630_v59  ;;  %v2122_v44 = vadd.f32 %v523_v2, %v2026_v23  ;;  %v525_v4 = vpop.f32.mrb[18].mxu0  ;;  %1177 = vmatprep.mubr.bf16.mxu0 %v691_v62  ;;  %v1403_v7 = vadd.f32 -1.0, %v1710_v0  ;;  %v1667_v2 = vld [vmem:[%s2276_s3 + $0x220] ss:$8 sps:$4 sm:$0xff]  }
 0x10e   : > { %v1714_v5 = vpop.eup %1713  ;;  %v568_v49 = vmin.f32 %v2118_v46, 0.0  ;;  %v2126_v8 = vadd.f32 %v525_v4, %v2028_v25  ;;  %v527_v9 = vpop.f32.mrb[19].mxu0  ;;  %1178 = vmatmul.mubr.bf16.gmra.mrb[28].mxu0 %v690_v3  ;;  %v1404_v10 = vadd.f32 -1.0, %v1712_v52  ;;  %vm544_vm4 = vcmp.gt.f32.partialorder %v2118_v46, 0.0 }
 0x10f   : > { %v1716_v12 = vpop.eup %1715  ;;  %v1409_v13 = vadd.f32 -1.0, %v1714_v5  ;;  %v569_v14 = vmin.f32 %v2122_v44, 0.0  ;;  %v2131_v23 = vadd.f32 %v527_v9, %v2028_v25  ;;  %v662_v25 = vsel %vm542_vm11, %v2065_v61, %v1403_v7  ;;  %v1666_v61 = vld [vmem:[%s2276_s3 + $0x214] ss:$8 sps:$4 sm:$0xff]  }
 0x110   : > { %v596_v15 = vmul.f32 1.442695, %v568_v49  ;;  %v574_v16 = vmin.f32 %v2126_v8, 0.0  ;;  %v1410_v17 = vadd.f32 -1.0, %v1716_v12  ;;  %v663_v20 = vsel %vm543_vm13, %v2069_v1, %v1404_v10 }
 0x111   : > { %v598_v18 = vmul.f32 1.442695, %v569_v14  ;;  %v575_v19 = vmin.f32 %v2131_v23, 0.0  ;;  %v668_v1 = vsel %vm548_vm12, %v2073_v6, %v1409_v13  ;;  %vm550_vm5 = vcmp.gt.f32.partialorder %v2126_v8, 0.0  ;;  %v1675_v13 = vld [vmem:[%s2276_s3 + $0x244] ss:$8 sps:$4 sm:$0xff]  }
 0x112   : > { %1725 = vpow2.f32 %v596_v15  ;;  %v608_v21 = vmul.f32 1.442695, %v574_v16  ;;  %v669_v22 = vsel %vm549_vm14, %v2078_v11, %v1410_v17  ;;  %v686_v34 = vpack.c.bf16 %v668_v1, %v662_v25 }
 0x113   : > { %1727 = vpow2.f32 %v598_v18  ;;  %v610_v24 = vmul.f32 1.442695, %v575_v19  ;;  %v531_v26 = vpop.f32.mrb[20].mxu0  ;;  %v687_v27 = vpack.c.bf16 %v669_v22, %v663_v20  ;;  %vm545_vm6 = vcmp.gt.f32.partialorder %v2122_v44, 0.0  ;;  %v1673_v20 = vld [vmem:[%s2276_s3 + $0x240] ss:$8 sps:$4 sm:$0xff]  }
 0x114   : > { %v1718_v32 = vpop.eup %1717  ;;  %1729 = vpow2.f32 %v608_v21  ;;  %v2149_v11 = vadd.f32 %v531_v26, %v2036_v30  ;;  %v533_v33 = vpop.f32.mrb[21].mxu0  ;;  %vm551_vm7 = vcmp.gt.f32.partialorder %v2131_v23, 0.0  ;;  %v1676_v26 = vld [vmem:[%s2276_s3 + $0x250] ss:$8 sps:$4 sm:$0xff]   ;;  %vm1128_vm13 = vcmask 1041408  }
 0x115   : > { %v1720_v35 = vpop.eup %1719  ;;  %1731 = vpow2.f32 %v610_v24  ;;  %v2157_v36 = vadd.f32 %v533_v33, %v2036_v30  ;;  %v535_v6 = vpop.f32.mrb[22].mxu0  ;;  %1220 = vmatprep.mubr.bf16.mxu1 %v687_v27  ;;  %v1415_v38 = vadd.f32 -1.0, %v1718_v32  ;;  %vm1318_vm14 = vcmask 334852  }
 0x116   : > { %v1722_v37 = vpop.eup %1721  ;;  %v1416_v40 = vadd.f32 -1.0, %v1720_v35  ;;  %v580_v41 = vmin.f32 %v2149_v11, 0.0  ;;  %v2161_v42 = vadd.f32 %v535_v6, %v2045_v43  ;;  %v537_v45 = vpop.f32.mrb[23].mxu0  ;;  %1221 = vmatmul.mubr.bf16.vlgmr.msra.gmra.mrb[0].mxu1 %v686_v34  ;;  %vm556_vm9 = vcmp.gt.f32.partialorder %v2149_v11, 0.0  ;;  %v1679_v6 = vld [vmem:[%s2276_s3 + $0x260] ss:$8 sps:$4 sm:$0xff]  }
 0x117   : > { %v1724_v50 = vpop.eup %1723  ;;  %v1421_v51 = vadd.f32 -1.0, %v1722_v37  ;;  %v581_v30 = vmin.f32 %v2157_v36, 0.0  ;;  %v2169_v53 = vadd.f32 %v537_v45, %v2045_v43  ;;  %1242 = vmatpush1.bf16.msra.mxu1 %v1661_v29  ;;  %v674_v63 = vsel %vm554_vm15, %v2090_v31, %v1415_v38  ;;  %v1681_v29 = vld [vmem:[%s2276_s3 + $0x264] ss:$8 sps:$4 sm:$0xff]   ;;  %v1684_v37 = vld [vmem:[%s2276_s3 + $0x274] ss:$8 sps:$4 sm:$0xff]   ;;  %vm2258_vm15 = vmor %vm1318_vm14, %vm359_vm0 }
 0x118   : > { %v1422_v55 = vadd.f32 -1.0, %v1724_v50  ;;  %v620_v56 = vmul.f32 1.442695, %v580_v41  ;;  %v586_v57 = vmin.f32 %v2161_v42, 0.0  ;;  %1243 = vmatprep.subr.bf16.mxu1 %v1666_v61  ;;  %v675_v43 = vsel %vm555_vm1, %v2094_v28, %v1416_v40  ;;  %v1685_v38 = vld [vmem:[%s2276_s3 + $0x280] ss:$8 sps:$4 sm:$0xff]  }
 0x119   : > { %v622_v58 = vmul.f32 1.442695, %v581_v30  ;;  %v587_v59 = vmin.f32 %v2169_v53, 0.0  ;;  %v680_v28 = vsel %vm560_vm3, %v2098_v39, %v1421_v51  ;;  %v1670_v39 = vld [vmem:[%s2276_s3 + $0x230] ss:$8 sps:$4 sm:$0xff]   ;;  %vm562_vm10 = vcmp.gt.f32.partialorder %v2161_v42, 0.0 }
 0x11a   : > { %1733 = vpow2.f32 %v620_v56  ;;  %v632_v60 = vmul.f32 1.442695, %v586_v57  ;;  %v681_v62 = vsel %vm561_vm2, %v2103_v47, %v1422_v55  ;;  %v1672_v47 = vld [vmem:[%s2276_s3 + $0x234] ss:$8 sps:$4 sm:$0xff]   ;;  %v692_v31 = vpack.c.bf16 %v680_v28, %v674_v63  ;;  %v291_v41 = vld [vmem:[%s2276_s3 + $0x2a0] sm:$0x33] }
 0x11b   : > { %1735 = vpow2.f32 %v622_v58  ;;  %v634_v0 = vmul.f32 1.442695, %v587_v59  ;;  %1244 = vmatpush1.bf16.msra.mxu1 %v1664_v48  ;;  %v693_v3 = vpack.c.bf16 %v681_v62, %v675_v43  ;;  %vm557_vm11 = vcmp.gt.f32.partialorder %v2157_v36, 0.0  ;;  %v1690_v40 = vld [vmem:[%s2276_s3 + $0x294] ss:$8 sps:$4 sm:$0xff]  }
 0x11c   : > { %v1726_v52 = vpop.eup %1725  ;;  %1737 = vpow2.f32 %v632_v60  ;;  %1245 = vmatprep.subr.bf16.mxu1 %v1669_v54  ;;  %vm563_vm12 = vcmp.gt.f32.partialorder %v2169_v53, 0.0  ;;  %v1510_v45 = vcombine.high %v291_v41, %v291_v41  ;;  %v1509_v48 = vcombine.low %v291_v41, %v291_v41 }
 0x11d   : > { %v1728_v4 = vpop.eup %1727  ;;  %v1405_v5 = vadd.f32 -1.0, %v1726_v52  ;;  %1739 = vpow2.f32 %v634_v0  ;;  %1230 = vmatprep.mubr.bf16.mxu1 %v693_v3 }
 0x11e   : > { %v1730_v7 = vpop.eup %1729  ;;  %v1406_v49 = vadd.f32 -1.0, %v1728_v4  ;;  %1231 = vmatmul.mubr.bf16.gmra.mrb[4].mxu1 %v692_v31  ;;  %v1130_v50 = vsel %vm1128_vm13, %v1509_v48, 0 }
 0x11f   : > { %v1732_v9 = vpop.eup %1731  ;;  %v1411_v10 = vadd.f32 -1.0, %v1730_v7  ;;  %1246 = vmatpush1.bf16.msra.mxu1 %v1667_v2  ;;  %v664_v14 = vsel %vm544_vm4, %v2118_v46, %v1405_v5  ;;  %v1678_v46 = vld [vmem:[%s2276_s3 + $0x254] ss:$8 sps:$4 sm:$0xff]  }
 0x120   : > { %v1412_v12 = vadd.f32 -1.0, %v1732_v9  ;;  %1247 = vmatprep.subr.bf16.mxu1 %v1672_v47  ;;  %v665_v16 = vsel %vm545_vm6, %v2122_v44, %v1406_v49 }
 0x121   : > { %v670_v15 = vsel %vm550_vm5, %v2126_v8, %v1411_v10 }
 0x122   : > { %v688_v17 = vpack.c.bf16 %v670_v15, %v664_v14  ;;  %v671_v18 = vsel %vm551_vm7, %v2131_v23, %v1412_v12 }
 0x123   : > { %v689_v19 = vpack.c.bf16 %v671_v18, %v665_v16  ;;  %1248 = vmatpush1.bf16.msra.mxu1 %v1670_v39 }
 0x124   : > { %v1734_v21 = vpop.eup %1733  ;;  %1249 = vmatprep.subr.bf16.mxu1 %v1675_v13 }
 0x125   : > { %v1736_v8 = vpop.eup %1735  ;;  %v1417_v22 = vadd.f32 -1.0, %v1734_v21  ;;  %1512 = vmatprep.mubr.msk.bf16.mxu1 %vm1121_vm8, %v689_v19 }
 0x126   : > { %v1738_v44 = vpop.eup %1737  ;;  %v1418_v25 = vadd.f32 -1.0, %v1736_v8 }
 0x127   : > { %v1740_v23 = vpop.eup %1739  ;;  %v1423_v24 = vadd.f32 -1.0, %v1738_v44  ;;  %1250 = vmatpush1.bf16.msra.mxu1 %v1673_v20  ;;  %v676_v1 = vsel %vm556_vm9, %v2149_v11, %v1417_v22  ;;  %v1682_v11 = vld [vmem:[%s2276_s3 + $0x270] ss:$8 sps:$4 sm:$0xff]  }
 0x128   : > { %v1424_v27 = vadd.f32 -1.0, %v1740_v23  ;;  %1251 = vmatprep.subr.bf16.mxu1 %v1678_v46  ;;  %v677_v33 = vsel %vm557_vm11, %v2157_v36, %v1418_v25  ;;  %v1687_v36 = vld [vmem:[%s2276_s3 + $0x284] ss:$8 sps:$4 sm:$0xff]  }
 0x129   : > { %v682_v32 = vsel %vm562_vm10, %v2161_v42, %v1423_v24  ;;  %v1688_v42 = vld [vmem:[%s2276_s3 + $0x290] ss:$8 sps:$4 sm:$0xff]  }
 0x12a   : > { %v683_v34 = vsel %vm563_vm12, %v2169_v53, %v1424_v27  ;;  %v694_v61 = vpack.c.bf16 %v682_v32, %v676_v1 }
 0x12b   : > { %v695_v35 = vpack.c.bf16 %v683_v34, %v677_v33  ;;  %1252 = vmatpush1.bf16.msra.mxu1 %v1676_v26 }
 0x12c   : > { %1253 = vmatprep.subr.bf16.mxu1 %v1681_v29 }
 0x12f   : > { %1254 = vmatpush1.bf16.msra.mxu1 %v1679_v6 }
 0x130   : > { %1255 = vmatprep.subr.bf16.mxu1 %v1684_v37 }
 0x133   : > { %1256 = vmatpush1.bf16.msra.mxu1 %v1682_v11 }
 0x134   : > { %1257 = vmatprep.subr.bf16.mxu1 %v1687_v36 }
 0x137   : > { %1258 = vmatpush1.bf16.msra.mxu1 %v1685_v38 }
 0x138   : > { %1259 = vmatprep.subr.bf16.mxu1 %v1690_v40 }
 0x13b   : > { %1260 = vmatpush1.bf16.msra.mxu1 %v1688_v42 }
 0x13c   : > { %1511 = vmatprep.subr.msk.bf16.mxu1 %vm1128_vm13, %v1510_v45 }
 0x13f   : > { %1262 = vmatpush1.bf16.msra.mxu1 %v1130_v50 }
 0x142   : > { %1274 = vmatmul.mubr.bf16.vlgmr.msra.gmra.mrb[0].mxu1 %v688_v17 }
 0x143   : > { %1513 = vmatprep.mubr.msk.bf16.mxu1 %vm1121_vm8, %v695_v35 }
 0x14a   : > { %1284 = vmatmul.mubr.bf16.gmra.mrb[4].mxu1 %v694_v61 }
 0x1d9   : > { %v1169_v51 = vpop.f32.mrb[24].mxu0 }
 0x1da   : > { %v1171_v30 = vpop.f32.mrb[25].mxu0 }
 0x1db   : > { %v1173_v53 = vpop.f32.mrb[26].mxu0 }
 0x1dc   : > { %v1175_v54 = vpop.f32.mrb[27].mxu0 }
 0x1e1   : > { %v1179_v55 = vpop.f32.mrb[28].mxu0 }
 0x1e2   : > { %v1181_v56 = vpop.f32.mrb[29].mxu0 }
 0x1e3   : > { %v1183_v57 = vpop.f32.mrb[30].mxu0 }
 0x1e4   : > { %v1185_v58 = vpop.f32.mrb[31].mxu0 }
 0x215   : > { %v1275_v59 = vpop.f32.mrb[0].mxu1 }
 0x216   : > { %v1525_v43 = vadd.f32 %v1275_v59, %v1169_v51  ;;  %v1277_v60 = vpop.f32.mrb[1].mxu1 }
 0x217   : > { %v1526_v62 = vadd.f32 %v1277_v60, %v1171_v30  ;;  %v1279_v63 = vpop.f32.mrb[2].mxu1 }
 0x218   : > { %v1527_v2 = vadd.f32 %v1279_v63, %v1173_v53  ;;  %v1281_v3 = vpop.f32.mrb[3].mxu1 }
 0x219   : > { %v1521_v28 = vpack.c.bf16 %v1526_v62, %v1525_v43  ;;  %v1528_v52 = vadd.f32 %v1281_v3, %v1175_v54 }
 0x21b   : > { %1320 = vst.msk [vmem:[%s197_s12] sm:$0xff] %vm2258_vm15, %v1521_v28  ;;  %v1522_v47 = vpack.c.bf16 %v1528_v52, %v1527_v2 }
 0x21d   : > { %1321 = vst.msk [vmem:[%s197_s12 + $0x8] sm:$0xff] %vm2258_vm15, %v1522_v47  ;;  %v1285_v31 = vpop.f32.mrb[4].mxu1 }
 0x21e   : > { %v1529_v4 = vadd.f32 %v1285_v31, %v1179_v55  ;;  %v1287_v5 = vpop.f32.mrb[5].mxu1 }
 0x21f   : > { %v1530_v7 = vadd.f32 %v1287_v5, %v1181_v56  ;;  %v1289_v49 = vpop.f32.mrb[6].mxu1 }
 0x220   : > { %v1531_v9 = vadd.f32 %v1289_v49, %v1183_v57  ;;  %v1291_v10 = vpop.f32.mrb[7].mxu1 }
 0x221   : > { %v1523_v39 = vpack.c.bf16 %v1530_v7, %v1529_v4  ;;  %v1532_v12 = vadd.f32 %v1291_v10, %v1185_v58 }
 0x223   : > { %1322 = vst.msk [vmem:[%s197_s12 + $0x10] sm:$0xff] %vm2258_vm15, %v1523_v39  ;;  %v1524_v13 = vpack.c.bf16 %v1532_v12, %v1531_v9 }
 0x225   : > { %1323 = vst.msk [vmem:[%s197_s12 + $0x18] sm:$0xff] %vm2258_vm15, %v1524_v13 }
 0x226 PF: > { %s14_s15 = sadd.s32 1, %s1747_s15  }
 0x227   : > { %p11_p4 = scmp.ge.s32.totalorder %s14_s15, 4  }
 0x229   :  { %13 = sbr.rel (!%p11_p4) target bundleno = 1 (0x1), region = 66 }

// kernel: vae_forward.7
= control target key start
LH: loop header
LB: loop body
LE: loop exit
PB: predicated region body
PF: predicated region fallthrough
CT: control target
= control target key end

     0   :  { %s1187_s15 = smov 0   ;;  %s1334_s0 = inlined_call_operand.vmem [shape: bf16[2,288,121], index: 0, kind: input, shape index: {}]   ;;  %s1335_s1 = inlined_call_operand.vmem [shape: bf16[64,288], index: 1, kind: input, shape index: {}]   ;;  %s1336_s2 = inlined_call_operand.vmem [shape: f32[64,1], index: 2, kind: input, shape index: {}]   ;;  %s1337_s3 = inlined_call_operand.vmem [shape: bf16[121,25], index: 3, kind: input, shape index: {}]   ;;  %s1338_s4 = inlined_call_operand.vmem [shape: bf16[2,64,25], index: 4, kind: output, shape index: {}]  }
   0x1 LB: > { %s906_s16 = sadd.s32 4294967295, %s1158_s15   ;;  %p910_p0 = scmp.ge.s32.totalorder %s1158_s15, 1  ;;  %s1158_s15 = sphi %s1187_s15, %s14_s15  }
   0x2   : > { %p162_p1 = scmp.lt.s32.totalorder %s1158_s15, 3 }
   0x4   : > { %p163_p2 = pnand %p910_p0, %p162_p1 }
   0x5   : > { %p188_p3 = scmp.lt.s32.totalorder (!%p163_p2), %s906_s16, 1  ;;  %vm483_vm0 = vcmask (!%p163_p2), 261120   ;;  %v1113_v0 = vld [vmem:[%s1335_s1 + $0x4] ss:$12 sps:$4 sm:$0xff] (!%p163_p2)   ;;  %v1115_v1 = vld [vmem:[%s1335_s1 + $0x8] ss:$12 sps:$4 sm:$0xff] (!%p163_p2)  }
   0x6   : > { %166 = sbr.rel (%p163_p2) target bundleno = 534 (0x216), region = 36  ;;  %528 = vmatprep.mubr.bf16.mxu0 (!%p163_p2), %v1113_v0  ;;  %1049 = vmatprep.mubr.msk.bf16.mxu1 (!%p163_p2), %vm483_vm0, %v1115_v1  ;;  %v1160_v2 = vmov (!%p163_p2), 0   ;;  %v215_v18 = vld [vmem:[%s1336_s2] sm:$0xff] (!%p163_p2)  ;;  %v217_v19 = vld [vmem:[%s1336_s2 + $0x10] sm:$0xff] (!%p163_p2)  ;;  %v216_v24 = vld [vmem:[%s1336_s2 + $0x8] sm:$0xff] (!%p163_p2)  ;;  %vm738_vm1 = vcmask (!%p163_p2), 1043456  }
   0x7   : > { %1092 = vset.pattern.permute.xlu0 (!%p163_p2), %v1160_v2  ;;  %1093 = vset.pattern.permute.xlu1 (!%p163_p2), %v1160_v2  ;;  %v1116_v21 = vld [vmem:[%s1335_s1 + $0x20] ss:$12 sps:$4 sm:$0xff] (!%p163_p2)   ;;  %v1123_v22 = vld [vmem:[%s1335_s1 + $0x38] ss:$12 sps:$4 sm:$0xff] (!%p163_p2)   ;;  %v1124_v29 = vld [vmem:[%s1335_s1 + $0x50] ss:$12 sps:$4 sm:$0xff] (!%p163_p2)  }
   0x8   : > { %277 = vperm.xlu0 (!%p163_p2), %1092, %v215_v18   ;;  %287 = vperm.xlu1 (!%p163_p2), %1093, %v217_v19   ;;  %v218_v25 = vld [vmem:[%s1336_s2 + $0x18] sm:$0xff] (!%p163_p2)  ;;  %v219_v26 = vld [vmem:[%s1336_s2 + $0x20] sm:$0xff] (!%p163_p2)  ;;  %v220_v28 = vld [vmem:[%s1336_s2 + $0x28] sm:$0xff] (!%p163_p2)  ;;  %vm739_vm2 = vcmask (!%p163_p2), 1044480   ;;  %v1161_v47 = vmov (!%p163_p2), 65535   ;;  %vm725_vm5 = vcmask (!%p163_p2), 990208  }
   0x9   : > { %v1111_v30 = vld [vmem:[%s1335_s1] ss:$12 sps:$4 sm:$0xff] (!%p163_p2)   ;;  %v221_v31 = vld [vmem:[%s1336_s2 + $0x30] sm:$0xff] (!%p163_p2)  ;;  %v1117_v32 = vld [vmem:[%s1335_s1 + $0x1c] ss:$12 sps:$4 sm:$0xff] (!%p163_p2)   ;;  %v740_v48 = vsel (!%p163_p2), %vm738_vm1, 4294967295, %v1161_v47 }
   0xa   : > { %v222_v33 = vld [vmem:[%s1336_s2 + $0x38] sm:$0xff] (!%p163_p2)  ;;  %v1120_v35 = vld [vmem:[%s1335_s1 + $0x34] ss:$12 sps:$4 sm:$0xff] (!%p163_p2)   ;;  %v1129_v40 = vld [vmem:[%s1337_s3 + $0x8] sm:$0xff] (!%p163_p2)   ;;  %v741_v49 = vsel (!%p163_p2), %vm739_vm2, %v740_v48, 0  ;;  %vm842_vm12 = vcmask (!%p163_p2), 199680  }
   0xb   : > { %v1119_v34 = vld [vmem:[%s1335_s1 + $0x18] ss:$12 sps:$4 sm:$0xff] (!%p163_p2)   ;;  %v1122_v36 = vld [vmem:[%s1335_s1 + $0x30] ss:$12 sps:$4 sm:$0xff] (!%p163_p2)   ;;  %v1127_v38 = vld [vmem:[%s1335_s1 + $0x48] ss:$12 sps:$4 sm:$0xff] (!%p163_p2)  }
   0xc   : > { %282 = vperm.xlu0 (!%p163_p2), %1092, %v216_v24   ;;  %292 = vperm.xlu1 (!%p163_p2), %1093, %v218_v25   ;;  %v1125_v37 = vld [vmem:[%s1335_s1 + $0x4c] ss:$12 sps:$4 sm:$0xff] (!%p163_p2)   ;;  %v1128_v39 = vld [vmem:[%s1337_s3] sm:$0xff] (!%p163_p2)   ;;  %v1130_v41 = vld [vmem:[%s1337_s3 + $0x10] sm:$0xff] (!%p163_p2)  }
   0xd   : > { %s1340_s16 = smov (!%p188_p3, %s906_s16), 1  ;;  %v1131_v42 = vld [vmem:[%s1337_s3 + $0x18] sm:$0xff]   ;;  %v1132_v43 = vld [vmem:[%s1337_s3 + $0x20] sm:$0xff]   ;;  %v1133_v44 = vld [vmem:[%s1337_s3 + $0x28] sm:$0xff]  }
   0xe   : > { %s1081_s21 = smul.u32 144, %s1340_s16  ;;  %v1134_v45 = vld [vmem:[%s1337_s3 + $0x30] sm:$0xff]   ;;  %v1135_v46 = vld [vmem:[%s1337_s3 + $0x38] sm:$0x1f]   ;;  %s978_s29 = sshll.u32 %s1340_s16, 5 }
   0xf   : > { %v743_v50 = vand.u32 %v1135_v46, %v741_v49  ;;  %s197_s6 = scalar_lea.vmem %s1338_s4, %s978_s29 }
  0x10   : > { %s1208_s24 = scalar_lea.vmem %s1334_s0, %s1081_s21  ;;  %297 = vperm.xlu0 %1092, %v219_v26   ;;  %302 = vperm.xlu1 %1093, %v220_v28  }
  0x11   : > { %v1094_v3 = vld [vmem:[%s1208_s24 + $0x40] sm:$0xff]   ;;  %v1096_v5 = vld [vmem:[%s1208_s24 + $0x48] sm:$0xff]   ;;  %v1098_v7 = vld [vmem:[%s1208_s24 + $0x50] sm:$0xff]  }
  0x12   : > { %v1095_v4 = vld [vmem:[%s1208_s24] sm:$0xff]   ;;  %987 = vmatprep.subr.bf16.mxu0 %v1094_v3  ;;  %v1097_v6 = vld [vmem:[%s1208_s24 + $0x8] sm:$0xff]   ;;  %v1099_v8 = vld [vmem:[%s1208_s24 + $0x10] sm:$0xff]  }
  0x13   : > { %988 = vmatpush3.bf16.msra.mxu0 %v1095_v4  ;;  %v1100_v9 = vld [vmem:[%s1208_s24 + $0x58] sm:$0xff]   ;;  %v1102_v11 = vld [vmem:[%s1208_s24 + $0x60] sm:$0xff]   ;;  %v1104_v14 = vld [vmem:[%s1208_s24 + $0x68] sm:$0xff]  }
  0x14   : > { %989 = vmatprep.subr.bf16.mxu0 %v1096_v5  ;;  %v1101_v10 = vld [vmem:[%s1208_s24 + $0x18] sm:$0xff]   ;;  %v1103_v12 = vld [vmem:[%s1208_s24 + $0x20] sm:$0xff]   ;;  %v1114_v15 = vld [vmem:[%s1208_s24 + $0x88] sm:$0xff]   ;;  %307 = vperm.xlu0 %1092, %v221_v31  }
  0x15   : > { %v1109_v13 = vld [vmem:[%s1208_s24 + $0x80] sm:$0xff]   ;;  %v1105_v16 = vld [vmem:[%s1208_s24 + $0x28] sm:$0xff]   ;;  %v1106_v17 = vld [vmem:[%s1208_s24 + $0x70] sm:$0xff]   ;;  %312 = vperm.xlu1 %1093, %v222_v33  }
  0x16   : > { %1045 = vmatprep.subr.bf16.mxu1 %v1109_v13  ;;  %v1107_v20 = vld [vmem:[%s1208_s24 + $0x30] sm:$0xff]   ;;  %v1108_v23 = vld [vmem:[%s1208_s24 + $0x78] sm:$0xff]  }
  0x17   : > { %990 = vmatpush3.bf16.msra.mxu0 %v1097_v6  ;;  %1046 = vmatpush3.bf16.msra.mxu1 %v1109_v13  ;;  %v1110_v27 = vld [vmem:[%s1208_s24 + $0x38] sm:$0xff]  }
  0x18   : > { %991 = vmatprep.subr.bf16.mxu0 %v1098_v7  ;;  %1047 = vmatprep.subr.bf16.mxu1 %v1114_v15 }
  0x1b   : > { %992 = vmatpush3.bf16.msra.mxu0 %v1099_v8  ;;  %1048 = vmatpush3.bf16.msra.mxu1 %v1114_v15 }
  0x1c   : > { %993 = vmatprep.subr.bf16.mxu0 %v1100_v9  ;;  %1057 = vmatprep.subr.bf16.mxu1 %v1128_v39 }
  0x1e   : > { %1050 = vmatmul.mubr.msk.bf16.vlgmr.msra.gmra.mrb[0].mxu1 %vm483_vm0, %v1116_v21 }
  0x1f   : > { %994 = vmatpush3.bf16.msra.mxu0 %v1101_v10  ;;  %1053 = vmatprep.mubr.msk.bf16.mxu1 %vm483_vm0, %v1123_v22 }
  0x20   : > { %995 = vmatprep.subr.bf16.mxu0 %v1102_v11  ;;  %1058 = vmatpush3.bf16.msra.mxu1 %v1128_v39 }
  0x21   : > { %1059 = vmatprep.subr.bf16.mxu1 %v1129_v40 }
  0x23   : > { %996 = vmatpush3.bf16.msra.mxu0 %v1103_v12 }
  0x24   : > { %997 = vmatprep.subr.bf16.mxu0 %v1104_v14  ;;  %1060 = vmatpush3.bf16.msra.mxu1 %v1129_v40 }
  0x25   : > { %1061 = vmatprep.subr.bf16.mxu1 %v1130_v41 }
  0x26   : > { %1054 = vmatmul.mubr.msk.bf16.gmra.mrb[4].mxu1 %vm483_vm0, %v1124_v29 }
  0x27   : > { %998 = vmatpush3.bf16.msra.mxu0 %v1105_v16 }
  0x28   : > { %999 = vmatprep.subr.bf16.mxu0 %v1106_v17  ;;  %1062 = vmatpush3.bf16.msra.mxu1 %v1130_v41 }
  0x29   : > { %1063 = vmatprep.subr.bf16.mxu1 %v1131_v42 }
  0x2b   : > { %1000 = vmatpush3.bf16.msra.mxu0 %v1107_v20 }
  0x2c   : > { %1001 = vmatprep.subr.bf16.mxu0 %v1108_v23  ;;  %1064 = vmatpush3.bf16.msra.mxu1 %v1131_v42 }
  0x2d   : > { %1065 = vmatprep.subr.bf16.mxu1 %v1132_v43 }
  0x2f   : > { %1002 = vmatpush3.bf16.msra.mxu0 %v1110_v27 }
  0x30   : > { %1066 = vmatpush3.bf16.msra.mxu1 %v1132_v43 }
  0x31   : > { %1067 = vmatprep.subr.bf16.mxu1 %v1133_v44 }
  0x32   : > { %529 = vmatmul.mubr.bf16.vlgmr.msra.gmra.mrb[0].mxu0 %v1111_v30 }
  0x33   : > { %536 = vmatprep.mubr.bf16.mxu0 %v1117_v32 }
  0x34   : > { %1068 = vmatpush3.bf16.msra.mxu1 %v1133_v44 }
  0x35   : > { %1069 = vmatprep.subr.bf16.mxu1 %v1134_v45 }
  0x38   : > { %1070 = vmatpush3.bf16.msra.mxu1 %v1134_v45 }
  0x39   : > { %1071 = vmatprep.subr.bf16.mxu1 %v743_v50 }
  0x3a   : > { %537 = vmatmul.mubr.bf16.gmra.mrb[4].mxu0 %v1119_v34 }
  0x3b   : > { %544 = vmatprep.mubr.bf16.mxu0 %v1120_v35 }
  0x3c   : > { %1072 = vmatpush3.bf16.msra.mxu1 %v743_v50 }
  0x42   : > { %545 = vmatmul.mubr.bf16.gmra.mrb[8].mxu0 %v1122_v36 }
  0x43   : > { %552 = vmatprep.mubr.bf16.mxu0 %v1125_v37 }
  0x4a   : > { %553 = vmatmul.mubr.bf16.gmra.mrb[12].mxu0 %v1127_v38 }
  0x87   : > { %v278_v55 = vpop.permute.xlu0 %277  ;;  %v288_v6 = vpop.permute.xlu1 %287 }
  0x8b   : > { %v283_v1 = vpop.permute.xlu0 %282  ;;  %v293_v19 = vpop.permute.xlu1 %292 }
  0x8f   : > { %v298_v30 = vpop.permute.xlu0 %297  ;;  %v303_v35 = vpop.permute.xlu1 %302 }
  0xf1   : > { %v1051_v51 = vpop.f32.mrb[0].mxu1 }
  0xf2   : > { %v595_v52 = vpop.f32.mrb[1].mxu1 }
  0xf3   : > { %v1052_v53 = vpop.f32.mrb[2].mxu1 }
  0xf4   : > { %v598_v54 = vpop.f32.mrb[3].mxu1 }
  0xf9   : > { %v1309_v56 = vpop.f32.mrb[4].mxu1 }
  0xfa   : > { %v611_v58 = vpop.f32.mrb[5].mxu1 }
  0xfb   : > { %v1311_v60 = vpop.f32.mrb[6].mxu1 }
  0xfc   : > { %v614_v63 = vpop.f32.mrb[7].mxu1 }
 0x105   : > { %v1003_v57 = vpop.f32.mrb[0].mxu0 }
 0x106   : > { %v1004_v59 = vpop.f32.mrb[1].mxu0 }
 0x107   : > { %v1005_v61 = vadd.f32 %v1004_v59, %v1003_v57  ;;  %v1006_v62 = vpop.f32.mrb[2].mxu0 }
 0x108   : > { %v1007_v0 = vpop.f32.mrb[3].mxu0 }
 0x109   : > { %v1008_v2 = vadd.f32 %v1007_v0, %v1006_v62  ;;  %v531_v3 = vadd.f32 %v1005_v61, %v278_v55  ;;  %v313_v61 = vpop.permute.xlu1 %312 }
 0x10b   : > { %v534_v4 = vadd.f32 %v1008_v2, %v283_v1  ;;  %v596_v5 = vadd.f32 %v595_v52, %v531_v3  ;;  %v308_v52 = vpop.permute.xlu0 %307 }
 0x10d   : > { %v634_v7 = vmin.f32 %v596_v5, 0.0  ;;  %v599_v8 = vadd.f32 %v598_v54, %v534_v4  ;;  %v1009_v9 = vpop.f32.mrb[4].mxu0  ;;  %vm626_vm3 = vcmp.gt.f32.partialorder %v596_v5, 0.0 }
 0x10e   : > { %v1010_v10 = vpop.f32.mrb[5].mxu0 }
 0x10f   : > { %v642_v11 = vmul.f32 1.442695, %v634_v7  ;;  %v635_v12 = vmin.f32 %v599_v8, 0.0  ;;  %v1011_v13 = vadd.f32 %v1010_v10, %v1009_v9  ;;  %v1012_v14 = vpop.f32.mrb[6].mxu0  ;;  %vm627_vm4 = vcmp.gt.f32.partialorder %v599_v8, 0.0 }
 0x110   : > { %v1013_v15 = vpop.f32.mrb[7].mxu0 }
 0x111   : > { %1136 = vpow2.f32 %v642_v11  ;;  %v644_v16 = vmul.f32 1.442695, %v635_v12  ;;  %v539_v17 = vadd.f32 %v1011_v13, %v288_v6  ;;  %v1014_v18 = vadd.f32 %v1013_v15, %v1012_v14 }
 0x113   : > { %1138 = vpow2.f32 %v644_v16  ;;  %v604_v20 = vadd.f32 %v1051_v51, %v539_v17  ;;  %v542_v21 = vadd.f32 %v1014_v18, %v293_v19 }
 0x115   : > { %v636_v22 = vmin.f32 %v604_v20, 0.0  ;;  %v607_v23 = vadd.f32 %v1052_v53, %v542_v21  ;;  %v1015_v24 = vpop.f32.mrb[8].mxu0  ;;  %vm628_vm6 = vcmp.gt.f32.partialorder %v604_v20, 0.0 }
 0x116   : > { %v1016_v25 = vpop.f32.mrb[9].mxu0 }
 0x117   : > { %v646_v26 = vmul.f32 1.442695, %v636_v22  ;;  %v637_v27 = vmin.f32 %v607_v23, 0.0  ;;  %v1017_v28 = vadd.f32 %v1016_v25, %v1015_v24  ;;  %v1018_v29 = vpop.f32.mrb[10].mxu0  ;;  %vm629_vm7 = vcmp.gt.f32.partialorder %v607_v23, 0.0 }
 0x118   : > { %v1019_v31 = vpop.f32.mrb[11].mxu0 }
 0x119   : > { %1140 = vpow2.f32 %v646_v26  ;;  %v648_v32 = vmul.f32 1.442695, %v637_v27  ;;  %v1020_v33 = vadd.f32 %v1019_v31, %v1018_v29  ;;  %v547_v34 = vadd.f32 %v1017_v28, %v298_v30 }
 0x11b   : > { %v1137_v36 = vpop.eup %1136  ;;  %1142 = vpow2.f32 %v648_v32  ;;  %v612_v37 = vadd.f32 %v611_v58, %v547_v34  ;;  %v550_v38 = vadd.f32 %v1020_v33, %v303_v35 }
 0x11c   : > { %v948_v39 = vadd.f32 -1.0, %v1137_v36 }
 0x11d   : > { %v1139_v40 = vpop.eup %1138  ;;  %v638_v41 = vmin.f32 %v612_v37, 0.0  ;;  %v615_v42 = vadd.f32 %v614_v63, %v550_v38  ;;  %v1021_v43 = vpop.f32.mrb[12].mxu0  ;;  %vm630_vm8 = vcmp.gt.f32.partialorder %v612_v37, 0.0 }
 0x11e   : > { %v949_v44 = vadd.f32 -1.0, %v1139_v40  ;;  %v1022_v45 = vpop.f32.mrb[13].mxu0  ;;  %v666_v50 = vsel %vm626_vm3, %v596_v5, %v948_v39 }
 0x11f   : > { %v650_v46 = vmul.f32 1.442695, %v638_v41  ;;  %v639_v47 = vmin.f32 %v615_v42, 0.0  ;;  %v1023_v48 = vadd.f32 %v1022_v45, %v1021_v43  ;;  %v1024_v49 = vpop.f32.mrb[14].mxu0  ;;  %vm631_vm9 = vcmp.gt.f32.partialorder %v615_v42, 0.0 }
 0x120   : > { %v667_v51 = vsel %vm627_vm4, %v599_v8, %v949_v44  ;;  %v1025_v53 = vpop.f32.mrb[15].mxu0 }
 0x121   : > { %v674_v54 = vpack.c.bf16 %v667_v51, %v666_v50  ;;  %1144 = vpow2.f32 %v650_v46  ;;  %v652_v55 = vmul.f32 1.442695, %v639_v47  ;;  %v555_v57 = vadd.f32 %v1023_v48, %v308_v52 }
 0x122   : > { %v1026_v58 = vadd.f32 %v1025_v53, %v1024_v49 }
 0x123   : > { %v1141_v59 = vpop.eup %1140  ;;  %1146 = vpow2.f32 %v652_v55  ;;  %v620_v62 = vadd.f32 %v1309_v56, %v555_v57  ;;  %1073 = vmatprep.mubr.msk.bf16.mxu1 %vm725_vm5, %v674_v54 }
 0x124   : > { %v950_v63 = vadd.f32 -1.0, %v1141_v59  ;;  %v558_v0 = vadd.f32 %v1026_v58, %v313_v61 }
 0x125   : > { %v1143_v1 = vpop.eup %1142  ;;  %v640_v2 = vmin.f32 %v620_v62, 0.0  ;;  %vm632_vm10 = vcmp.gt.f32.partialorder %v620_v62, 0.0 }
 0x126   : > { %v951_v3 = vadd.f32 -1.0, %v1143_v1  ;;  %v623_v4 = vadd.f32 %v1311_v60, %v558_v0  ;;  %v668_v6 = vsel %vm628_vm6, %v604_v20, %v950_v63 }
 0x127   : > { %v654_v5 = vmul.f32 1.442695, %v640_v2 }
 0x128   : > { %v669_v7 = vsel %vm629_vm7, %v607_v23, %v951_v3  ;;  %v641_v8 = vmin.f32 %v623_v4, 0.0  ;;  %vm633_vm11 = vcmp.gt.f32.partialorder %v623_v4, 0.0 }
 0x129   : > { %v675_v9 = vpack.c.bf16 %v669_v7, %v668_v6  ;;  %1148 = vpow2.f32 %v654_v5 }
 0x12a   : > { %v656_v10 = vmul.f32 1.442695, %v641_v8 }
 0x12b   : > { %v1145_v11 = vpop.eup %1144  ;;  %1074 = vmatmul.mubr.msk.bf16.vlgmr.msra.gmra.mrb[8].mxu1 %vm725_vm5, %v675_v9 }
 0x12c   : > { %v952_v56 = vadd.f32 -1.0, %v1145_v11  ;;  %1150 = vpow2.f32 %v656_v10 }
 0x12d   : > { %v1147_v12 = vpop.eup %1146 }
 0x12e   : > { %v953_v13 = vadd.f32 -1.0, %v1147_v12  ;;  %v670_v60 = vsel %vm630_vm8, %v612_v37, %v952_v56 }
 0x130   : > { %v671_v14 = vsel %vm631_vm9, %v615_v42, %v953_v13 }
 0x131   : > { %v676_v15 = vpack.c.bf16 %v671_v14, %v670_v60 }
 0x133   : > { %v1149_v16 = vpop.eup %1148  ;;  %1077 = vmatprep.mubr.msk.bf16.mxu1 %vm725_vm5, %v676_v15 }
 0x134   : > { %v954_v17 = vadd.f32 -1.0, %v1149_v16 }
 0x136   : > { %v1151_v18 = vpop.eup %1150  ;;  %v672_v20 = vsel %vm632_vm10, %v620_v62, %v954_v17 }
 0x137   : > { %v955_v19 = vadd.f32 -1.0, %v1151_v18 }
 0x139   : > { %v673_v21 = vsel %vm633_vm11, %v623_v4, %v955_v19 }
 0x13a   : > { %v677_v22 = vpack.c.bf16 %v673_v21, %v672_v20 }
 0x13c   : > { %1078 = vmatmul.mubr.msk.bf16.gmra.mrb[12].mxu1 %vm725_vm5, %v677_v22 }
 0x1fe   : > { %v1075_v23 = vpop.f32.mrb[8].mxu1 }
 0x1ff   : > { %v981_v24 = vpack.c.bf16 %v1075_v23, %v1075_v23  ;;  %v779_v25 = vpop.f32.mrb[9].mxu1 }
 0x200   : > { %v979_v26 = vpack.c.bf16 %v779_v25, %v779_v25  ;;  %v1076_v27 = vpop.f32.mrb[10].mxu1 }
 0x201   : > { %845 = vst.msk [vmem:[%s197_s6 + $0x8] sm:$0xf] %vm842_vm12, %v981_v24  ;;  %v982_v28 = vpack.c.bf16 %v1076_v27, %v1076_v27  ;;  %v782_v29 = vpop.f32.mrb[11].mxu1 }
 0x202   : > { %843 = vst.msk [vmem:[%s197_s6] sm:$0xf] %vm842_vm12, %v979_v26  ;;  %v980_v30 = vpack.c.bf16 %v782_v29, %v782_v29 }
 0x203   : > { %846 = vst.msk [vmem:[%s197_s6 + $0xc] sm:$0xf] %vm842_vm12, %v982_v28 }
 0x204   : > { %844 = vst.msk [vmem:[%s197_s6 + $0x4] sm:$0xf] %vm842_vm12, %v980_v30 }
 0x20f   : > { %v1079_v31 = vpop.f32.mrb[12].mxu1 }
 0x210   : > { %v985_v32 = vpack.c.bf16 %v1079_v31, %v1079_v31  ;;  %v795_v33 = vpop.f32.mrb[13].mxu1 }
 0x211   : > { %v983_v34 = vpack.c.bf16 %v795_v33, %v795_v33  ;;  %v1080_v35 = vpop.f32.mrb[14].mxu1 }
 0x212   : > { %849 = vst.msk [vmem:[%s197_s6 + $0x18] sm:$0xf] %vm842_vm12, %v985_v32  ;;  %v986_v36 = vpack.c.bf16 %v1080_v35, %v1080_v35  ;;  %v798_v37 = vpop.f32.mrb[15].mxu1 }
 0x213   : > { %847 = vst.msk [vmem:[%s197_s6 + $0x10] sm:$0xf] %vm842_vm12, %v983_v34  ;;  %v984_v38 = vpack.c.bf16 %v798_v37, %v798_v37 }
 0x214   : > { %850 = vst.msk [vmem:[%s197_s6 + $0x1c] sm:$0xf] %vm842_vm12, %v986_v36 }
 0x215   : > { %848 = vst.msk [vmem:[%s197_s6 + $0x14] sm:$0xf] %vm842_vm12, %v984_v38 }
 0x216 PF: > { %s14_s15 = sadd.s32 1, %s1158_s15  }
 0x217   : > { %p11_p4 = scmp.ge.s32.totalorder %s14_s15, 4  }
 0x219   :  { %13 = sbr.rel (!%p11_p4) target bundleno = 1 (0x1), region = 66 }

// kernel: vae_forward.8
= control target key start
LH: loop header
LB: loop body
LE: loop exit
PB: predicated region body
PF: predicated region fallthrough
CT: control target
= control target key end

     0   :  { %20 = vsyncpa [#allocation3], 0  ;;  %v251_v7 = vlaneseq  ;;  %v5222_v8 = vmov 1966171168   ;;  %s6835_s0 = inlined_call_operand.vmem [shape: bf16[2,1600], index: 0, kind: input, shape index: {}]   ;;  %s6836_s1 = inlined_call_operand.vmem [shape: f32[2,8], index: 1, kind: input, shape index: {}]   ;;  %s6837_s2 = inlined_call_operand.vmem [shape: bf16[1600,256], index: 2, kind: input, shape index: {}]   ;;  %s6838_s3 = inlined_call_operand.vmem [shape: f32[1,256], index: 3, kind: input, shape index: {}]   ;;  %s6839_s4 = inlined_call_operand.vmem [shape: bf16[256,8], index: 4, kind: input, shape index: {}]   ;;  %s6840_s5 = inlined_call_operand.vmem [shape: f32[1,8], index: 5, kind: input, shape index: {}]   ;;  %s6841_s6 = inlined_call_operand.vmem [shape: bf16[256,8], index: 6, kind: input, shape index: {}]   ;;  %s6842_s7 = inlined_call_operand.vmem [shape: f32[1,8], index: 7, kind: input, shape index: {}]   ;;  %s6843_s8 = inlined_call_operand.vmem [shape: bf16[8,256], index: 8, kind: input, shape index: {}]   ;;  %s6844_s9 = inlined_call_operand.vmem [shape: f32[1,256], index: 9, kind: input, shape index: {}]   ;;  %s6845_s10 = inlined_call_operand.vmem [shape: bf16[256,1600], index: 10, kind: input, shape index: {}]   ;;  %s6846_s11 = inlined_call_operand.vmem [shape: f32[1,1600], index: 11, kind: input, shape index: {}]   ;;  %s6847_s12 = inlined_call_operand.hbm [shape: f32[2,8], index: 12, kind: output, shape index: {0}]   ;;  %s6848_s13 = inlined_call_operand.hbm [shape: f32[2,8], index: 13, kind: output, shape index: {1}]   ;;  %s6849_s14 = inlined_call_operand.vmem [shape: f32[2,1600], index: 14, kind: output, shape index: {2}]  }
   0x1   :  { %v4498_v0 = vld [vmem:[%s6837_s2 + $0x4] ss:$8 sps:$4 sm:$0xff]   ;;  %v4500_v1 = vld [vmem:[%s6837_s2] ss:$8 sps:$4 sm:$0xff]   ;;  %v4501_v2 = vld [vmem:[%s6837_s2 + $0x14] ss:$8 sps:$4 sm:$0xff]   ;;  %v265_v9 = vunpack.c.l.s4 %v5222_v8 }
   0x2   :  { %1367 = vmatprep.subr.bf16.mxu0 %v4498_v0  ;;  %v4503_v3 = vld [vmem:[%s6837_s2 + $0x10] ss:$8 sps:$4 sm:$0xff]   ;;  %v4504_v4 = vld [vmem:[%s6837_s2 + $0x24] ss:$8 sps:$4 sm:$0xff]   ;;  %v4506_v5 = vld [vmem:[%s6837_s2 + $0x20] ss:$8 sps:$4 sm:$0xff]  }
   0x3   :  { %1368 = vmatpush1.bf16.msra.mxu0 %v4500_v1  ;;  %v4507_v6 = vld [vmem:[%s6837_s2 + $0x34] ss:$8 sps:$4 sm:$0xff]   ;;  %v4509_v10 = vld [vmem:[%s6837_s2 + $0x30] ss:$8 sps:$4 sm:$0xff]   ;;  %v4510_v11 = vld [vmem:[%s6837_s2 + $0x44] ss:$8 sps:$4 sm:$0xff]   ;;  %v266_v13 = vunpack.c.0.s8 %v265_v9 }
   0x4   :  { %1369 = vmatprep.subr.bf16.mxu0 %v4501_v2  ;;  %v5329_v12 = vshrl.u32 %v251_v7, 7  ;;  %v4512_v14 = vld [vmem:[%s6837_s2 + $0x40] ss:$8 sps:$4 sm:$0xff]   ;;  %v4513_v15 = vld [vmem:[%s6837_s2 + $0x54] ss:$8 sps:$4 sm:$0xff]  }
   0x5   :  { %v4515_v17 = vld [vmem:[%s6837_s2 + $0x50] ss:$8 sps:$4 sm:$0xff]   ;;  %v4516_v18 = vld [vmem:[%s6837_s2 + $0x64] ss:$8 sps:$4 sm:$0xff]   ;;  %v4518_v21 = vld [vmem:[%s6837_s2 + $0x60] ss:$8 sps:$4 sm:$0xff]  }
   0x6   :  { %v5338_v16 = vsub.s32 %v266_v13, %v5329_v12  ;;  %v5349_v19 = vld [vmem:[%s6835_s0] sm:$0xff]  ;;  %v4519_v22 = vld [vmem:[%s6837_s2 + $0x74] ss:$8 sps:$4 sm:$0xff]   ;;  %v4521_v25 = vld [vmem:[%s6837_s2 + $0x70] ss:$8 sps:$4 sm:$0xff]  }
   0x7   :  { %1370 = vmatpush1.bf16.msra.mxu0 %v4503_v3  ;;  %v4522_v26 = vld [vmem:[%s6837_s2 + $0x84] ss:$8 sps:$4 sm:$0xff]   ;;  %v4524_v27 = vld [vmem:[%s6837_s2 + $0x80] ss:$8 sps:$4 sm:$0xff]   ;;  %v4525_v28 = vld [vmem:[%s6837_s2 + $0x94] ss:$8 sps:$4 sm:$0xff]   ;;  %v263_v7 = vcombine.high %v5349_v19, %v5349_v19 }
   0x8   :  { %1371 = vmatprep.subr.bf16.mxu0 %v4504_v4  ;;  %v270_v20 = vrot.slane %v5349_v19, %v5338_v16  ;;  %v4527_v29 = vld [vmem:[%s6837_s2 + $0x90] ss:$8 sps:$4 sm:$0xff]   ;;  %v4528_v30 = vld [vmem:[%s6837_s2 + $0xa4] ss:$8 sps:$4 sm:$0xff]   ;;  %v4530_v31 = vld [vmem:[%s6837_s2 + $0xa0] ss:$8 sps:$4 sm:$0xff]  }
   0x9   :  { %v4531_v32 = vld [vmem:[%s6837_s2 + $0xb4] ss:$8 sps:$4 sm:$0xff]   ;;  %v4533_v33 = vld [vmem:[%s6837_s2 + $0xb0] ss:$8 sps:$4 sm:$0xff]   ;;  %v4534_v34 = vld [vmem:[%s6837_s2 + $0xc4] ss:$8 sps:$4 sm:$0xff]   ;;  %v5511_v13 = vrot.slane %v263_v7, %v5338_v16 }
   0xa   :  { %v278_v23 = vcombine.high %v270_v20, %v270_v20  ;;  %v4536_v35 = vld [vmem:[%s6837_s2 + $0xc0] ss:$8 sps:$4 sm:$0xff]   ;;  %v4537_v36 = vld [vmem:[%s6837_s2 + $0xd4] ss:$8 sps:$4 sm:$0xff]   ;;  %v4539_v37 = vld [vmem:[%s6837_s2 + $0xd0] ss:$8 sps:$4 sm:$0xff]   ;;  %v5415_v43 = vrot.slane %v270_v20, %v5338_v16 }
   0xb   :  { %1372 = vmatpush1.bf16.msra.mxu0 %v4506_v5  ;;  %v4540_v38 = vld [vmem:[%s6837_s2 + $0xe4] ss:$8 sps:$4 sm:$0xff]   ;;  %v4542_v39 = vld [vmem:[%s6837_s2 + $0xe0] ss:$8 sps:$4 sm:$0xff]   ;;  %v4543_v40 = vld [vmem:[%s6837_s2 + $0xf4] ss:$8 sps:$4 sm:$0xff]  }
   0xc   :  { %1373 = vmatprep.subr.bf16.mxu0 %v4507_v6  ;;  %v300_v24 = vrot.slane %v278_v23, %v5338_v16  ;;  %v4545_v41 = vld [vmem:[%s6837_s2 + $0xf0] ss:$8 sps:$4 sm:$0xff]   ;;  %v4549_v42 = vld [vmem:[%s6837_s2 + $0x104] ss:$8 sps:$4 sm:$0xff]   ;;  %v4547_v45 = vld [vmem:[%s6837_s2 + $0x100] ss:$8 sps:$4 sm:$0xff]  }
   0xd   :  { %v4552_v46 = vld [vmem:[%s6837_s2 + $0x114] ss:$8 sps:$4 sm:$0xff]   ;;  %v4550_v47 = vld [vmem:[%s6837_s2 + $0x110] ss:$8 sps:$4 sm:$0xff]   ;;  %v4555_v48 = vld [vmem:[%s6837_s2 + $0x124] ss:$8 sps:$4 sm:$0xff]  }
   0xe   :  { %1399 = vmatprep.mubr.bf16.mxu0 %v300_v24  ;;  %v310_v44 = vcombine.high %v300_v24, %v300_v24  ;;  %v4553_v49 = vld [vmem:[%s6837_s2 + $0x120] ss:$8 sps:$4 sm:$0xff]   ;;  %v4558_v50 = vld [vmem:[%s6837_s2 + $0x134] ss:$8 sps:$4 sm:$0xff]   ;;  %v4556_v51 = vld [vmem:[%s6837_s2 + $0x130] ss:$8 sps:$4 sm:$0xff]  }
   0xf   :  { %1374 = vmatpush1.bf16.msra.mxu0 %v4509_v10  ;;  %v4561_v52 = vld [vmem:[%s6837_s2 + $0x144] ss:$8 sps:$4 sm:$0xff]   ;;  %v4559_v53 = vld [vmem:[%s6837_s2 + $0x140] ss:$8 sps:$4 sm:$0xff]   ;;  %v4564_v54 = vld [vmem:[%s6837_s2 + $0x154] ss:$8 sps:$4 sm:$0xff]  }
  0x10   :  { %1375 = vmatprep.subr.bf16.mxu0 %v4510_v11  ;;  %v4562_v55 = vld [vmem:[%s6837_s2 + $0x150] ss:$8 sps:$4 sm:$0xff]   ;;  %v4567_v56 = vld [vmem:[%s6837_s2 + $0x164] ss:$8 sps:$4 sm:$0xff]   ;;  %v4565_v57 = vld [vmem:[%s6837_s2 + $0x160] ss:$8 sps:$4 sm:$0xff]  }
  0x11   :  { %v4570_v58 = vld [vmem:[%s6837_s2 + $0x174] ss:$8 sps:$4 sm:$0xff]   ;;  %v4568_v59 = vld [vmem:[%s6837_s2 + $0x170] ss:$8 sps:$4 sm:$0xff]   ;;  %v4573_v60 = vld [vmem:[%s6837_s2 + $0x184] ss:$8 sps:$4 sm:$0xff]  }
  0x12   :  { %v4571_v61 = vld [vmem:[%s6837_s2 + $0x180] ss:$8 sps:$4 sm:$0xff]   ;;  %v4576_v62 = vld [vmem:[%s6837_s2 + $0x194] ss:$8 sps:$4 sm:$0xff]   ;;  %v4574_v63 = vld [vmem:[%s6837_s2 + $0x190] ss:$8 sps:$4 sm:$0xff]  }
  0x13   :  { %1376 = vmatpush1.bf16.msra.mxu0 %v4512_v14  ;;  %v4579_v0 = vld [vmem:[%s6837_s2 + $0x1a4] ss:$8 sps:$4 sm:$0xff]   ;;  %v4577_v1 = vld [vmem:[%s6837_s2 + $0x1a0] ss:$8 sps:$4 sm:$0xff]   ;;  %v4582_v2 = vld [vmem:[%s6837_s2 + $0x1b4] ss:$8 sps:$4 sm:$0xff]  }
  0x14   :  { %1377 = vmatprep.subr.bf16.mxu0 %v4513_v15  ;;  %v4580_v3 = vld [vmem:[%s6837_s2 + $0x1b0] ss:$8 sps:$4 sm:$0xff]   ;;  %v4585_v4 = vld [vmem:[%s6837_s2 + $0x1c4] ss:$8 sps:$4 sm:$0xff]   ;;  %v4583_v5 = vld [vmem:[%s6837_s2 + $0x1c0] ss:$8 sps:$4 sm:$0xff]  }
  0x15   :  { %v4588_v6 = vld [vmem:[%s6837_s2 + $0x1d4] ss:$8 sps:$4 sm:$0xff]   ;;  %v4586_v8 = vld [vmem:[%s6837_s2 + $0x1d0] ss:$8 sps:$4 sm:$0xff]   ;;  %v4591_v9 = vld [vmem:[%s6837_s2 + $0x1e4] ss:$8 sps:$4 sm:$0xff]  }
  0x16   :  { %v4589_v10 = vld [vmem:[%s6837_s2 + $0x1e0] ss:$8 sps:$4 sm:$0xff]   ;;  %v4594_v11 = vld [vmem:[%s6837_s2 + $0x1f4] ss:$8 sps:$4 sm:$0xff]   ;;  %v4592_v14 = vld [vmem:[%s6837_s2 + $0x1f0] ss:$8 sps:$4 sm:$0xff]  }
  0x17   :  { %1378 = vmatpush1.bf16.msra.mxu0 %v4515_v17  ;;  %v4597_v15 = vld [vmem:[%s6837_s2 + $0x204] ss:$8 sps:$4 sm:$0xff]   ;;  %v279_v17 = vcombine.high %v5511_v13, %v5511_v13  ;;  %v4595_v19 = vld [vmem:[%s6837_s2 + $0x200] ss:$8 sps:$4 sm:$0xff]   ;;  %v4600_v20 = vld [vmem:[%s6837_s2 + $0x214] ss:$8 sps:$4 sm:$0xff]  }
  0x18   :  { %1379 = vmatprep.subr.bf16.mxu0 %v4516_v18  ;;  %v308_v18 = vcombine.high %v5415_v43, %v5415_v43  ;;  %v4603_v23 = vld [vmem:[%s6837_s2 + $0x224] ss:$8 sps:$4 sm:$0xff]   ;;  %v4601_v24 = vld [vmem:[%s6837_s2 + $0x220] ss:$8 sps:$4 sm:$0xff]  }
  0x1b   :  { %1380 = vmatpush1.bf16.msra.mxu0 %v4518_v21  ;;  %v5530_v21 = vrot.slane %v279_v17, %v5338_v16 }
  0x1c   :  { %1381 = vmatprep.subr.bf16.mxu0 %v4519_v22  ;;  %v4598_v22 = vld [vmem:[%s6837_s2 + $0x210] ss:$8 sps:$4 sm:$0xff]  }
  0x1f   :  { %1382 = vmatpush1.bf16.msra.mxu0 %v4521_v25  ;;  %v4606_v25 = vld [vmem:[%s6837_s2 + $0x234] ss:$8 sps:$4 sm:$0xff]  }
  0x20   :  { %1383 = vmatprep.subr.bf16.mxu0 %v4522_v26  ;;  %v4604_v26 = vld [vmem:[%s6837_s2 + $0x230] ss:$8 sps:$4 sm:$0xff]  }
  0x23   :  { %1384 = vmatpush1.bf16.msra.mxu0 %v4524_v27  ;;  %v4609_v27 = vld [vmem:[%s6837_s2 + $0x244] ss:$8 sps:$4 sm:$0xff]  }
  0x24   :  { %1385 = vmatprep.subr.bf16.mxu0 %v4525_v28  ;;  %v4607_v28 = vld [vmem:[%s6837_s2 + $0x240] ss:$8 sps:$4 sm:$0xff]  }
  0x27   :  { %1386 = vmatpush1.bf16.msra.mxu0 %v4527_v29  ;;  %v4612_v29 = vld [vmem:[%s6837_s2 + $0x254] ss:$8 sps:$4 sm:$0xff]  }
  0x28   :  { %1387 = vmatprep.subr.bf16.mxu0 %v4528_v30  ;;  %v4610_v30 = vld [vmem:[%s6837_s2 + $0x250] ss:$8 sps:$4 sm:$0xff]  }
  0x2b   :  { %1388 = vmatpush1.bf16.msra.mxu0 %v4530_v31  ;;  %v4615_v31 = vld [vmem:[%s6837_s2 + $0x264] ss:$8 sps:$4 sm:$0xff]  }
  0x2c   :  { %1389 = vmatprep.subr.bf16.mxu0 %v4531_v32  ;;  %v4613_v32 = vld [vmem:[%s6837_s2 + $0x260] ss:$8 sps:$4 sm:$0xff]  }
  0x2f   :  { %1390 = vmatpush1.bf16.msra.mxu0 %v4533_v33  ;;  %v4618_v33 = vld [vmem:[%s6837_s2 + $0x274] ss:$8 sps:$4 sm:$0xff]  }
  0x30   :  { %1391 = vmatprep.subr.bf16.mxu0 %v4534_v34  ;;  %v4616_v34 = vld [vmem:[%s6837_s2 + $0x270] ss:$8 sps:$4 sm:$0xff]  }
  0x33   :  { %1392 = vmatpush1.bf16.msra.mxu0 %v4536_v35  ;;  %v4621_v35 = vld [vmem:[%s6837_s2 + $0x284] ss:$8 sps:$4 sm:$0xff]  }
  0x34   :  { %1393 = vmatprep.subr.bf16.mxu0 %v4537_v36  ;;  %v4619_v36 = vld [vmem:[%s6837_s2 + $0x280] ss:$8 sps:$4 sm:$0xff]  }
  0x37   :  { %1394 = vmatpush1.bf16.msra.mxu0 %v4539_v37  ;;  %v4624_v37 = vld [vmem:[%s6837_s2 + $0x294] ss:$8 sps:$4 sm:$0xff]  }
  0x38   :  { %1395 = vmatprep.subr.bf16.mxu0 %v4540_v38  ;;  %v4622_v38 = vld [vmem:[%s6837_s2 + $0x290] ss:$8 sps:$4 sm:$0xff]  }
  0x3b   :  { %1396 = vmatpush1.bf16.msra.mxu0 %v4542_v39  ;;  %v4627_v39 = vld [vmem:[%s6837_s2 + $0x2a4] ss:$8 sps:$4 sm:$0xff]  }
  0x3c   :  { %1397 = vmatprep.subr.bf16.mxu0 %v4543_v40  ;;  %v4625_v40 = vld [vmem:[%s6837_s2 + $0x2a0] ss:$8 sps:$4 sm:$0xff]  }
  0x3f   :  { %1398 = vmatpush1.bf16.msra.mxu0 %v4545_v41  ;;  %v4630_v41 = vld [vmem:[%s6837_s2 + $0x2b4] ss:$8 sps:$4 sm:$0xff]  }
  0x40   :  { %1408 = vmatprep.subr.bf16.mxu0 %v4549_v42  ;;  %v4628_v42 = vld [vmem:[%s6837_s2 + $0x2b0] ss:$8 sps:$4 sm:$0xff]  }
  0x42   :  { %1400 = vmatmul.mubr.bf16.vlgmr.msra.gmra.mrb[0].mxu0 %v5415_v43  ;;  %v4633_v43 = vld [vmem:[%s6837_s2 + $0x2c4] ss:$8 sps:$4 sm:$0xff]  }
  0x43   :  { %1409 = vmatpush1.bf16.msra.mxu0 %v4547_v45  ;;  %1440 = vmatprep.mubr.bf16.mxu0 %v310_v44  ;;  %v4631_v44 = vld [vmem:[%s6837_s2 + $0x2c0] ss:$8 sps:$4 sm:$0xff]   ;;  %v4636_v45 = vld [vmem:[%s6837_s2 + $0x2d4] ss:$8 sps:$4 sm:$0xff]  }
  0x44   :  { %1410 = vmatprep.subr.bf16.mxu0 %v4552_v46  ;;  %v4634_v46 = vld [vmem:[%s6837_s2 + $0x2d0] ss:$8 sps:$4 sm:$0xff]  }
  0x47   :  { %1411 = vmatpush1.bf16.msra.mxu0 %v4550_v47  ;;  %v4639_v47 = vld [vmem:[%s6837_s2 + $0x2e4] ss:$8 sps:$4 sm:$0xff]  }
  0x48   :  { %1412 = vmatprep.subr.bf16.mxu0 %v4555_v48  ;;  %v4637_v48 = vld [vmem:[%s6837_s2 + $0x2e0] ss:$8 sps:$4 sm:$0xff]  }
  0x4b   :  { %1413 = vmatpush1.bf16.msra.mxu0 %v4553_v49  ;;  %v4642_v49 = vld [vmem:[%s6837_s2 + $0x2f4] ss:$8 sps:$4 sm:$0xff]  }
  0x4c   :  { %1414 = vmatprep.subr.bf16.mxu0 %v4558_v50  ;;  %v4640_v50 = vld [vmem:[%s6837_s2 + $0x2f0] ss:$8 sps:$4 sm:$0xff]  }
  0x4f   :  { %1415 = vmatpush1.bf16.msra.mxu0 %v4556_v51  ;;  %v4645_v51 = vld [vmem:[%s6837_s2 + $0x304] ss:$8 sps:$4 sm:$0xff]  }
  0x50   :  { %1416 = vmatprep.subr.bf16.mxu0 %v4561_v52  ;;  %v5625_v52 = vrot.slane %v5511_v13, %v5338_v16 }
  0x53   :  { %1417 = vmatpush1.bf16.msra.mxu0 %v4559_v53  ;;  %v4643_v53 = vld [vmem:[%s6837_s2 + $0x300] ss:$8 sps:$4 sm:$0xff]  }
  0x54   :  { %1418 = vmatprep.subr.bf16.mxu0 %v4564_v54  ;;  %v4648_v54 = vld [vmem:[%s6837_s2 + $0x314] ss:$8 sps:$4 sm:$0xff]  }
  0x57   :  { %1419 = vmatpush1.bf16.msra.mxu0 %v4562_v55  ;;  %v311_v55 = vcombine.high %v5530_v21, %v5530_v21 }
  0x58   :  { %1420 = vmatprep.subr.bf16.mxu0 %v4567_v56  ;;  %v4646_v56 = vld [vmem:[%s6837_s2 + $0x310] ss:$8 sps:$4 sm:$0xff]  }
  0x5b   :  { %1421 = vmatpush1.bf16.msra.mxu0 %v4565_v57  ;;  %v4651_v57 = vld [vmem:[%s6837_s2 + $0x324] ss:$8 sps:$4 sm:$0xff]  }
  0x5c   :  { %1422 = vmatprep.subr.bf16.mxu0 %v4570_v58  ;;  %v4649_v58 = vld [vmem:[%s6837_s2 + $0x320] ss:$8 sps:$4 sm:$0xff]  }
  0x5f   :  { %1423 = vmatpush1.bf16.msra.mxu0 %v4568_v59  ;;  %v4654_v59 = vld [vmem:[%s6837_s2 + $0x334] ss:$8 sps:$4 sm:$0xff]  }
  0x60   :  { %1424 = vmatprep.subr.bf16.mxu0 %v4573_v60  ;;  %v4652_v60 = vld [vmem:[%s6837_s2 + $0x330] ss:$8 sps:$4 sm:$0xff]  }
  0x63   :  { %1425 = vmatpush1.bf16.msra.mxu0 %v4571_v61  ;;  %v4657_v61 = vld [vmem:[%s6837_s2 + $0x344] ss:$8 sps:$4 sm:$0xff]  }
  0x64   :  { %1426 = vmatprep.subr.bf16.mxu0 %v4576_v62  ;;  %v4655_v62 = vld [vmem:[%s6837_s2 + $0x340] ss:$8 sps:$4 sm:$0xff]  }
  0x67   :  { %1427 = vmatpush1.bf16.msra.mxu0 %v4574_v63  ;;  %v4660_v63 = vld [vmem:[%s6837_s2 + $0x354] ss:$8 sps:$4 sm:$0xff]  }
  0x68   :  { %1428 = vmatprep.subr.bf16.mxu0 %v4579_v0  ;;  %v4658_v0 = vld [vmem:[%s6837_s2 + $0x350] ss:$8 sps:$4 sm:$0xff]  }
  0x6b   :  { %1429 = vmatpush1.bf16.msra.mxu0 %v4577_v1  ;;  %v4663_v1 = vld [vmem:[%s6837_s2 + $0x364] ss:$8 sps:$4 sm:$0xff]  }
  0x6c   :  { %1430 = vmatprep.subr.bf16.mxu0 %v4582_v2  ;;  %v4661_v2 = vld [vmem:[%s6837_s2 + $0x360] ss:$8 sps:$4 sm:$0xff]  }
  0x6f   :  { %1431 = vmatpush1.bf16.msra.mxu0 %v4580_v3  ;;  %v4666_v3 = vld [vmem:[%s6837_s2 + $0x374] ss:$8 sps:$4 sm:$0xff]  }
  0x70   :  { %1432 = vmatprep.subr.bf16.mxu0 %v4585_v4  ;;  %v4664_v4 = vld [vmem:[%s6837_s2 + $0x370] ss:$8 sps:$4 sm:$0xff]  }
  0x73   :  { %1433 = vmatpush1.bf16.msra.mxu0 %v4583_v5  ;;  %v4669_v5 = vld [vmem:[%s6837_s2 + $0x384] ss:$8 sps:$4 sm:$0xff]  }
  0x74   :  { %1434 = vmatprep.subr.bf16.mxu0 %v4588_v6 }
  0x77   :  { %1435 = vmatpush1.bf16.msra.mxu0 %v4586_v8 }
  0x78   :  { %1436 = vmatprep.subr.bf16.mxu0 %v4591_v9 }
  0x7b   :  { %1437 = vmatpush1.bf16.msra.mxu0 %v4589_v10 }
  0x7c   :  { %1438 = vmatprep.subr.bf16.mxu0 %v4594_v11 }
  0x7f   :  { %1439 = vmatpush1.bf16.msra.mxu0 %v4592_v14 }
  0x80   :  { %1449 = vmatprep.subr.bf16.mxu0 %v4597_v15 }
  0x82   :  { %1441 = vmatmul.mubr.bf16.vlgmr.msra.gmra.mrb[0].mxu0 %v308_v18 }
  0x83   :  { %1450 = vmatpush1.bf16.msra.mxu0 %v4595_v19  ;;  %1481 = vmatprep.mubr.bf16.mxu0 %v5530_v21 }
  0x84   :  { %1451 = vmatprep.subr.bf16.mxu0 %v4600_v20 }
  0x87   :  { %1452 = vmatpush1.bf16.msra.mxu0 %v4598_v22 }
  0x88   :  { %1453 = vmatprep.subr.bf16.mxu0 %v4603_v23 }
  0x8b   :  { %1454 = vmatpush1.bf16.msra.mxu0 %v4601_v24 }
  0x8c   :  { %1455 = vmatprep.subr.bf16.mxu0 %v4606_v25 }
  0x8f   :  { %1456 = vmatpush1.bf16.msra.mxu0 %v4604_v26 }
  0x90   :  { %1457 = vmatprep.subr.bf16.mxu0 %v4609_v27 }
  0x93   :  { %1458 = vmatpush1.bf16.msra.mxu0 %v4607_v28 }
  0x94   :  { %1459 = vmatprep.subr.bf16.mxu0 %v4612_v29 }
  0x97   :  { %1460 = vmatpush1.bf16.msra.mxu0 %v4610_v30 }
  0x98   :  { %1461 = vmatprep.subr.bf16.mxu0 %v4615_v31 }
  0x9b   :  { %1462 = vmatpush1.bf16.msra.mxu0 %v4613_v32 }
  0x9c   :  { %1463 = vmatprep.subr.bf16.mxu0 %v4618_v33 }
  0x9f   :  { %1464 = vmatpush1.bf16.msra.mxu0 %v4616_v34 }
  0xa0   :  { %1465 = vmatprep.subr.bf16.mxu0 %v4621_v35 }
  0xa3   :  { %1466 = vmatpush1.bf16.msra.mxu0 %v4619_v36 }
  0xa4   :  { %1467 = vmatprep.subr.bf16.mxu0 %v4624_v37 }
  0xa7   :  { %1468 = vmatpush1.bf16.msra.mxu0 %v4622_v38 }
  0xa8   :  { %1469 = vmatprep.subr.bf16.mxu0 %v4627_v39 }
  0xab   :  { %1470 = vmatpush1.bf16.msra.mxu0 %v4625_v40 }
  0xac   :  { %1471 = vmatprep.subr.bf16.mxu0 %v4630_v41 }
  0xaf   :  { %1472 = vmatpush1.bf16.msra.mxu0 %v4628_v42 }
  0xb0   :  { %1473 = vmatprep.subr.bf16.mxu0 %v4633_v43 }
  0xb3   :  { %1474 = vmatpush1.bf16.msra.mxu0 %v4631_v44 }
  0xb4   :  { %1475 = vmatprep.subr.bf16.mxu0 %v4636_v45 }
  0xb7   :  { %1476 = vmatpush1.bf16.msra.mxu0 %v4634_v46 }
  0xb8   :  { %1477 = vmatprep.subr.bf16.mxu0 %v4639_v47 }
  0xbb   :  { %1478 = vmatpush1.bf16.msra.mxu0 %v4637_v48 }
  0xbc   :  { %1479 = vmatprep.subr.bf16.mxu0 %v4642_v49 }
  0xbf   :  { %1480 = vmatpush1.bf16.msra.mxu0 %v4640_v50 }
  0xc0   :  { %1490 = vmatprep.subr.bf16.mxu0 %v4645_v51 }
  0xc2   :  { %1482 = vmatmul.mubr.bf16.vlgmr.msra.gmra.mrb[0].mxu0 %v5625_v52 }
  0xc3   :  { %1491 = vmatpush1.bf16.msra.mxu0 %v4643_v53  ;;  %1522 = vmatprep.mubr.bf16.mxu0 %v311_v55 }
  0xc4   :  { %1492 = vmatprep.subr.bf16.mxu0 %v4648_v54 }
  0xc7   :  { %1493 = vmatpush1.bf16.msra.mxu0 %v4646_v56 }
  0xc8   :  { %1494 = vmatprep.subr.bf16.mxu0 %v4651_v57 }
  0xcb   :  { %1495 = vmatpush1.bf16.msra.mxu0 %v4649_v58 }
  0xcc   :  { %1496 = vmatprep.subr.bf16.mxu0 %v4654_v59 }
  0xcf   :  { %1497 = vmatpush1.bf16.msra.mxu0 %v4652_v60 }
  0xd0   :  { %1498 = vmatprep.subr.bf16.mxu0 %v4657_v61 }
  0xd3   :  { %1499 = vmatpush1.bf16.msra.mxu0 %v4655_v62 }
  0xd4   :  { %1500 = vmatprep.subr.bf16.mxu0 %v4660_v63 }
  0xd7   :  { %1501 = vmatpush1.bf16.msra.mxu0 %v4658_v0 }
  0xd8   :  { %1502 = vmatprep.subr.bf16.mxu0 %v4663_v1 }
  0xdb   :  { %1503 = vmatpush1.bf16.msra.mxu0 %v4661_v2 }
  0xdc   :  { %1504 = vmatprep.subr.bf16.mxu0 %v4666_v3 }
  0xdd   :  { %21 = vsyncpa [#allocation5], 0  ;;  %v4667_v6 = vld [vmem:[%s6837_s2 + $0x380] ss:$8 sps:$4 sm:$0xff]   ;;  %v4672_v7 = vld [vmem:[%s6837_s2 + $0x394] ss:$8 sps:$4 sm:$0xff]   ;;  %v309_v27 = vcombine.high %v5625_v52, %v5625_v52 }
  0xde   :  { %v4670_v8 = vld [vmem:[%s6837_s2 + $0x390] ss:$8 sps:$4 sm:$0xff]   ;;  %v4675_v9 = vld [vmem:[%s6837_s2 + $0x3a4] ss:$8 sps:$4 sm:$0xff]   ;;  %v4673_v10 = vld [vmem:[%s6837_s2 + $0x3a0] ss:$8 sps:$4 sm:$0xff]  }
  0xdf   :  { %1505 = vmatpush1.bf16.msra.mxu0 %v4664_v4  ;;  %v4678_v11 = vld [vmem:[%s6837_s2 + $0x3b4] ss:$8 sps:$4 sm:$0xff]   ;;  %v4676_v13 = vld [vmem:[%s6837_s2 + $0x3b0] ss:$8 sps:$4 sm:$0xff]   ;;  %v4681_v14 = vld [vmem:[%s6837_s2 + $0x3c4] ss:$8 sps:$4 sm:$0xff]  }
  0xe0   :  { %1506 = vmatprep.subr.bf16.mxu0 %v4669_v5  ;;  %v4679_v15 = vld [vmem:[%s6837_s2 + $0x3c0] ss:$8 sps:$4 sm:$0xff]   ;;  %v4684_v17 = vld [vmem:[%s6837_s2 + $0x3d4] ss:$8 sps:$4 sm:$0xff]   ;;  %v4682_v18 = vld [vmem:[%s6837_s2 + $0x3d0] ss:$8 sps:$4 sm:$0xff]  }
  0xe1   :  { %v4687_v19 = vld [vmem:[%s6837_s2 + $0x3e4] ss:$8 sps:$4 sm:$0xff]   ;;  %v4685_v21 = vld [vmem:[%s6837_s2 + $0x3e0] ss:$8 sps:$4 sm:$0xff]   ;;  %v4690_v23 = vld [vmem:[%s6837_s2 + $0x3f4] ss:$8 sps:$4 sm:$0xff]  }
  0xe2   :  { %v5717_v20 = vld [vmem:[%s6835_s0 + $0x8] sm:$0x1f]  ;;  %v4688_v24 = vld [vmem:[%s6837_s2 + $0x3f0] ss:$8 sps:$4 sm:$0xff]   ;;  %v4696_v30 = vld [vmem:[%s6837_s2 + $0x414] ss:$8 sps:$4 sm:$0xff]  }
  0xe3   :  { %1507 = vmatpush1.bf16.msra.mxu0 %v4667_v6  ;;  %v5724_v22 = vrot.slane %v5717_v20, %v5338_v16  ;;  %v4693_v26 = vld [vmem:[%s6837_s2 + $0x404] ss:$8 sps:$4 sm:$0xff]   ;;  %v4691_v28 = vld [vmem:[%s6837_s2 + $0x400] ss:$8 sps:$4 sm:$0xff]   ;;  %v4694_v31 = vld [vmem:[%s6837_s2 + $0x410] ss:$8 sps:$4 sm:$0xff]  }
  0xe4   :  { %1508 = vmatprep.subr.bf16.mxu0 %v4672_v7  ;;  %v4699_v32 = vld [vmem:[%s6837_s2 + $0x424] ss:$8 sps:$4 sm:$0xff]   ;;  %v4697_v33 = vld [vmem:[%s6837_s2 + $0x420] ss:$8 sps:$4 sm:$0xff]   ;;  %v4702_v34 = vld [vmem:[%s6837_s2 + $0x434] ss:$8 sps:$4 sm:$0xff]  }
  0xe5   :  { %v327_v25 = vcombine.high %v5724_v22, %v5724_v22  ;;  %v4700_v35 = vld [vmem:[%s6837_s2 + $0x430] ss:$8 sps:$4 sm:$0xff]   ;;  %v4705_v36 = vld [vmem:[%s6837_s2 + $0x444] ss:$8 sps:$4 sm:$0xff]   ;;  %v4703_v37 = vld [vmem:[%s6837_s2 + $0x440] ss:$8 sps:$4 sm:$0xff]   ;;  %v5853_v1 = vrot.slane %v5724_v22, %v5338_v16 }
  0xe6   :  { %v4708_v38 = vld [vmem:[%s6837_s2 + $0x454] ss:$8 sps:$4 sm:$0xff]   ;;  %v4800_v39 = vld [vmem:[%s6839_s4 + $0x40] sm:$0xff]   ;;  %v4802_v41 = vld [vmem:[%s6839_s4 + $0x48] sm:$0xff]   ;;  %vm1363_vm0 = vcmask 523264   ;;  %vm2047_vm3 = vcmask 1043456  }
  0xe7   :  { %1509 = vmatpush1.bf16.msra.mxu0 %v4670_v8  ;;  %v5743_v29 = vrot.slane %v327_v25, %v5338_v16  ;;  %v4801_v40 = vld [vmem:[%s6839_s4] sm:$0xff]   ;;  %v4706_v42 = vld [vmem:[%s6837_s2 + $0x450] ss:$8 sps:$4 sm:$0xff]   ;;  %4401 = vmatprep.subr.bf16.mxu1 %v4800_v39  ;;  %v4803_v44 = vld [vmem:[%s6839_s4 + $0x8] sm:$0xff]   ;;  %vm3822_vm4 = vcmask 58368   ;;  %vm2043_vm5 = vcmask 64512  }
  0xe8   :  { %1510 = vmatprep.subr.bf16.mxu0 %v4675_v9  ;;  %v4711_v43 = vld [vmem:[%s6837_s2 + $0x464] ss:$8 sps:$4 sm:$0xff]   ;;  %4402 = vmatpush3.bf16.msra.mxu1 %v4801_v40  ;;  %v4709_v45 = vld [vmem:[%s6837_s2 + $0x460] ss:$8 sps:$4 sm:$0xff]   ;;  %v4714_v46 = vld [vmem:[%s6837_s2 + $0x474] ss:$8 sps:$4 sm:$0xff]  }
  0xe9   :  { %4403 = vmatprep.subr.bf16.mxu1 %v4802_v41  ;;  %v4712_v47 = vld [vmem:[%s6837_s2 + $0x470] ss:$8 sps:$4 sm:$0xff]   ;;  %v4717_v48 = vld [vmem:[%s6837_s2 + $0x484] ss:$8 sps:$4 sm:$0xff]   ;;  %v4715_v49 = vld [vmem:[%s6837_s2 + $0x480] ss:$8 sps:$4 sm:$0xff]   ;;  %v350_v3 = vcombine.high %v5743_v29, %v5743_v29 }
  0xea   :  { %v4720_v50 = vld [vmem:[%s6837_s2 + $0x494] ss:$8 sps:$4 sm:$0xff]   ;;  %v4718_v51 = vld [vmem:[%s6837_s2 + $0x490] ss:$8 sps:$4 sm:$0xff]   ;;  %v4723_v52 = vld [vmem:[%s6837_s2 + $0x4a4] ss:$8 sps:$4 sm:$0xff]  }
  0xeb   :  { %1511 = vmatpush1.bf16.msra.mxu0 %v4673_v10  ;;  %v4721_v53 = vld [vmem:[%s6837_s2 + $0x4a0] ss:$8 sps:$4 sm:$0xff]   ;;  %v4726_v54 = vld [vmem:[%s6837_s2 + $0x4b4] ss:$8 sps:$4 sm:$0xff]   ;;  %v4724_v55 = vld [vmem:[%s6837_s2 + $0x4b0] ss:$8 sps:$4 sm:$0xff]  }
  0xec   :  { %1512 = vmatprep.subr.bf16.mxu0 %v4678_v11  ;;  %4404 = vmatpush3.bf16.msra.mxu1 %v4803_v44  ;;  %v4729_v56 = vld [vmem:[%s6837_s2 + $0x4c4] ss:$8 sps:$4 sm:$0xff]   ;;  %v4727_v57 = vld [vmem:[%s6837_s2 + $0x4c0] ss:$8 sps:$4 sm:$0xff]   ;;  %v4732_v58 = vld [vmem:[%s6837_s2 + $0x4d4] ss:$8 sps:$4 sm:$0xff]   ;;  %v312_v44 = vcombine.high %v5717_v20, %v5717_v20 }
  0xed   :  { %v4730_v59 = vld [vmem:[%s6837_s2 + $0x4d0] ss:$8 sps:$4 sm:$0xff]   ;;  %v4735_v60 = vld [vmem:[%s6837_s2 + $0x4e4] ss:$8 sps:$4 sm:$0xff]   ;;  %v4733_v61 = vld [vmem:[%s6837_s2 + $0x4e0] ss:$8 sps:$4 sm:$0xff]  }
  0xee   :  { %v4738_v62 = vld [vmem:[%s6837_s2 + $0x4f4] ss:$8 sps:$4 sm:$0xff]   ;;  %v4736_v63 = vld [vmem:[%s6837_s2 + $0x4f0] ss:$8 sps:$4 sm:$0xff]   ;;  %v4742_v0 = vld [vmem:[%s6837_s2 + $0x504] ss:$8 sps:$4 sm:$0xff]  }
  0xef   :  { %1513 = vmatpush1.bf16.msra.mxu0 %v4676_v13  ;;  %v4740_v2 = vld [vmem:[%s6837_s2 + $0x500] ss:$8 sps:$4 sm:$0xff]   ;;  %v4745_v4 = vld [vmem:[%s6837_s2 + $0x514] ss:$8 sps:$4 sm:$0xff]   ;;  %v4743_v5 = vld [vmem:[%s6837_s2 + $0x510] ss:$8 sps:$4 sm:$0xff]  }
  0xf0   :  { %1514 = vmatprep.subr.bf16.mxu0 %v4681_v14  ;;  %v4748_v6 = vld [vmem:[%s6837_s2 + $0x524] ss:$8 sps:$4 sm:$0xff]   ;;  %v4746_v7 = vld [vmem:[%s6837_s2 + $0x520] ss:$8 sps:$4 sm:$0xff]   ;;  %v4751_v8 = vld [vmem:[%s6837_s2 + $0x534] ss:$8 sps:$4 sm:$0xff]  }
  0xf1   :  { %v4749_v9 = vld [vmem:[%s6837_s2 + $0x530] ss:$8 sps:$4 sm:$0xff]   ;;  %v4754_v10 = vld [vmem:[%s6837_s2 + $0x544] ss:$8 sps:$4 sm:$0xff]   ;;  %v4752_v11 = vld [vmem:[%s6837_s2 + $0x540] ss:$8 sps:$4 sm:$0xff]  }
  0xf2   :  { %v4757_v13 = vld [vmem:[%s6837_s2 + $0x554] ss:$8 sps:$4 sm:$0xff]   ;;  %v4755_v14 = vld [vmem:[%s6837_s2 + $0x550] ss:$8 sps:$4 sm:$0xff]   ;;  %v4764_v22 = vld [vmem:[%s6837_s2 + $0x580] ss:$8 sps:$4 sm:$0xff]  }
  0xf3   :  { %1515 = vmatpush1.bf16.msra.mxu0 %v4679_v15  ;;  %v4760_v15 = vld [vmem:[%s6837_s2 + $0x564] ss:$8 sps:$4 sm:$0xff]   ;;  %v4788_v39 = vld [vmem:[%s6837_s2 + $0x600] ss:$8 sps:$4 sm:$0xff]   ;;  %v4793_v40 = vld [vmem:[%s6837_s2 + $0x614] ss:$8 sps:$4 sm:$0xff]  }
  0xf4   :  { %1516 = vmatprep.subr.bf16.mxu0 %v4684_v17  ;;  %v4758_v17 = vld [vmem:[%s6837_s2 + $0x560] ss:$8 sps:$4 sm:$0xff]   ;;  %v4772_v25 = vld [vmem:[%s6837_s2 + $0x5a4] ss:$8 sps:$4 sm:$0xff]   ;;  %v4791_v41 = vld [vmem:[%s6837_s2 + $0x610] ss:$8 sps:$4 sm:$0xff]  }
  0xf5   :  { %vm3903_vm11 = vcmask 517120   ;;  %s5226_s15 = smov [#allocation4]  }
  0xf7   :  { %1517 = vmatpush1.bf16.msra.mxu0 %v4682_v18  ;;  %v4763_v18 = vld [vmem:[%s6837_s2 + $0x574] ss:$8 sps:$4 sm:$0xff]  }
  0xf8   :  { %1518 = vmatprep.subr.bf16.mxu0 %v4687_v19  ;;  %v4761_v19 = vld [vmem:[%s6837_s2 + $0x570] ss:$8 sps:$4 sm:$0xff]  }
  0xfb   :  { %1519 = vmatpush1.bf16.msra.mxu0 %v4685_v21  ;;  %v4766_v21 = vld [vmem:[%s6837_s2 + $0x584] ss:$8 sps:$4 sm:$0xff]  }
  0xfc   :  { %1520 = vmatprep.subr.bf16.mxu0 %v4690_v23  ;;  %v4769_v23 = vld [vmem:[%s6837_s2 + $0x594] ss:$8 sps:$4 sm:$0xff]  }
  0xff   :  { %1521 = vmatpush1.bf16.msra.mxu0 %v4688_v24  ;;  %v4767_v24 = vld [vmem:[%s6837_s2 + $0x590] ss:$8 sps:$4 sm:$0xff]  }
 0x100   :  { %1531 = vmatprep.subr.bf16.mxu0 %v4693_v26  ;;  %v4770_v26 = vld [vmem:[%s6837_s2 + $0x5a0] ss:$8 sps:$4 sm:$0xff]  }
 0x102   :  { %1523 = vmatmul.mubr.bf16.vlgmr.msra.gmra.mrb[0].mxu0 %v309_v27  ;;  %v4775_v27 = vld [vmem:[%s6837_s2 + $0x5b4] ss:$8 sps:$4 sm:$0xff]  }
 0x103   :  { %1532 = vmatpush1.bf16.msra.mxu0 %v4691_v28  ;;  %1563 = vmatprep.mubr.bf16.mxu0 %v5743_v29  ;;  %v4773_v28 = vld [vmem:[%s6837_s2 + $0x5b0] ss:$8 sps:$4 sm:$0xff]   ;;  %v4778_v29 = vld [vmem:[%s6837_s2 + $0x5c4] ss:$8 sps:$4 sm:$0xff]  }
 0x104   :  { %1533 = vmatprep.subr.bf16.mxu0 %v4696_v30  ;;  %v4776_v30 = vld [vmem:[%s6837_s2 + $0x5c0] ss:$8 sps:$4 sm:$0xff]  }
 0x107   :  { %1534 = vmatpush1.bf16.msra.mxu0 %v4694_v31  ;;  %v4781_v31 = vld [vmem:[%s6837_s2 + $0x5d4] ss:$8 sps:$4 sm:$0xff]  }
 0x108   :  { %1535 = vmatprep.subr.bf16.mxu0 %v4699_v32  ;;  %v4779_v32 = vld [vmem:[%s6837_s2 + $0x5d0] ss:$8 sps:$4 sm:$0xff]  }
 0x10b   :  { %1536 = vmatpush1.bf16.msra.mxu0 %v4697_v33  ;;  %v4784_v33 = vld [vmem:[%s6837_s2 + $0x5e4] ss:$8 sps:$4 sm:$0xff]  }
 0x10c   :  { %1537 = vmatprep.subr.bf16.mxu0 %v4702_v34  ;;  %v4782_v34 = vld [vmem:[%s6837_s2 + $0x5e0] ss:$8 sps:$4 sm:$0xff]  }
 0x10f   :  { %1538 = vmatpush1.bf16.msra.mxu0 %v4700_v35  ;;  %v4787_v35 = vld [vmem:[%s6837_s2 + $0x5f4] ss:$8 sps:$4 sm:$0xff]  }
 0x110   :  { %1539 = vmatprep.subr.bf16.mxu0 %v4705_v36  ;;  %v4785_v36 = vld [vmem:[%s6837_s2 + $0x5f0] ss:$8 sps:$4 sm:$0xff]  }
 0x113   :  { %1540 = vmatpush1.bf16.msra.mxu0 %v4703_v37  ;;  %v4790_v37 = vld [vmem:[%s6837_s2 + $0x604] ss:$8 sps:$4 sm:$0xff]  }
 0x114   :  { %1541 = vmatprep.subr.bf16.mxu0 %v4708_v38  ;;  %v349_v38 = vcombine.high %v5853_v1, %v5853_v1 }
 0x117   :  { %1542 = vmatpush1.bf16.msra.mxu0 %v4706_v42  ;;  %v5223_v42 = vmov 0  }
 0x118   :  { %1543 = vmatprep.subr.bf16.mxu0 %v4711_v43  ;;  %v4796_v43 = vld [vmem:[%s6837_s2 + $0x624] ss:$8 sps:$4 sm:$0xff]  }
 0x11b   :  { %1544 = vmatpush1.bf16.msra.mxu0 %v4709_v45  ;;  %v4794_v45 = vld [vmem:[%s6837_s2 + $0x620] ss:$8 sps:$4 sm:$0xff]  }
 0x11c   :  { %1545 = vmatprep.subr.bf16.mxu0 %v4714_v46  ;;  %v4799_v46 = vld [vmem:[%s6837_s2 + $0x634] ss:$8 sps:$4 sm:$0xff]  }
 0x11f   :  { %1546 = vmatpush1.bf16.msra.mxu0 %v4712_v47  ;;  %v326_v47 = vrot.slane %v312_v44, %v5338_v16  ;;  %v4839_v44 = vld [vmem:[%s6845_s10 + $0x6c] ss:$52 sps:$4 sm:$0xff]  }
 0x120   :  { %1547 = vmatprep.subr.bf16.mxu0 %v4717_v48  ;;  %v4797_v48 = vld [vmem:[%s6837_s2 + $0x630] ss:$8 sps:$4 sm:$0xff]  }
 0x121   :  { %v341_v20 = vrot.slane %v326_v47, %v5338_v16  ;;  %v4807_v16 = vld [vmem:[%s6839_s4 + $0x18] sm:$0xff]   ;;  %v4861_v47 = vld [vmem:[%s6845_s10 + $0x370] ss:$52 sps:$4 sm:$0xff]  }
 0x123   :  { %1548 = vmatpush1.bf16.msra.mxu0 %v4715_v49  ;;  %v4804_v49 = vld [vmem:[%s6839_s4 + $0x50] sm:$0xff]  }
 0x124   :  { %1549 = vmatprep.subr.bf16.mxu0 %v4720_v50  ;;  %v4805_v50 = vld [vmem:[%s6839_s4 + $0x10] sm:$0xff]   ;;  %4405 = vmatprep.subr.bf16.mxu1 %v4804_v49  ;;  %v4843_v49 = vld [vmem:[%s6845_s10 + $0x138] ss:$52 sps:$4 sm:$0xff]  }
 0x125   :  { %4406 = vmatpush3.bf16.msra.mxu1 %v4805_v50  ;;  %v4848_v50 = vld [vmem:[%s6845_s10 + $0x1a4] ss:$52 sps:$4 sm:$0xff]  }
 0x127   :  { %1550 = vmatpush1.bf16.msra.mxu0 %v4718_v51  ;;  %v4806_v51 = vld [vmem:[%s6839_s4 + $0x58] sm:$0xff]  }
 0x128   :  { %1551 = vmatprep.subr.bf16.mxu0 %v4723_v52  ;;  %4407 = vmatprep.subr.bf16.mxu1 %v4806_v51  ;;  %v4808_v52 = vld [vmem:[%s6839_s4 + $0x60] sm:$0xff]  }
 0x129   :  { %4408 = vmatpush3.bf16.msra.mxu1 %v4807_v16  ;;  %v4846_v51 = vld [vmem:[%s6845_s10 + $0x1a0] ss:$52 sps:$4 sm:$0xff]  }
 0x12a   :  { %4409 = vmatprep.subr.bf16.mxu1 %v4808_v52  ;;  %v4851_v16 = vld [vmem:[%s6845_s10 + $0x20c] ss:$52 sps:$4 sm:$0xff]   ;;  %v4849_v52 = vld [vmem:[%s6845_s10 + $0x208] ss:$52 sps:$4 sm:$0xff]  }
 0x12b   :  { %1552 = vmatpush1.bf16.msra.mxu0 %v4721_v53  ;;  %v4809_v53 = vld [vmem:[%s6839_s4 + $0x20] sm:$0xff]  }
 0x12c   :  { %1553 = vmatprep.subr.bf16.mxu0 %v4726_v54  ;;  %v4810_v54 = vld [vmem:[%s6839_s4 + $0x68] sm:$0xff]  }
 0x12d   :  { %4410 = vmatpush3.bf16.msra.mxu1 %v4809_v53  ;;  %v4854_v53 = vld [vmem:[%s6845_s10 + $0x274] ss:$52 sps:$4 sm:$0xff]  }
 0x12e   :  { %4411 = vmatprep.subr.bf16.mxu1 %v4810_v54  ;;  %v4852_v54 = vld [vmem:[%s6845_s10 + $0x270] ss:$52 sps:$4 sm:$0xff]  }
 0x12f   :  { %1554 = vmatpush1.bf16.msra.mxu0 %v4724_v55  ;;  %v4811_v55 = vld [vmem:[%s6839_s4 + $0x28] sm:$0xff]  }
 0x130   :  { %1555 = vmatprep.subr.bf16.mxu0 %v4729_v56  ;;  %v4812_v56 = vld [vmem:[%s6839_s4 + $0x70] sm:$0xff]  }
 0x131   :  { %4412 = vmatpush3.bf16.msra.mxu1 %v4811_v55  ;;  %v4857_v55 = vld [vmem:[%s6845_s10 + $0x2dc] ss:$52 sps:$4 sm:$0xff]  }
 0x132   :  { %4413 = vmatprep.subr.bf16.mxu1 %v4812_v56  ;;  %v4855_v56 = vld [vmem:[%s6845_s10 + $0x2d8] ss:$52 sps:$4 sm:$0xff]  }
 0x133   :  { %1556 = vmatpush1.bf16.msra.mxu0 %v4727_v57  ;;  %v4813_v57 = vld [vmem:[%s6839_s4 + $0x30] sm:$0xff]  }
 0x134   :  { %1557 = vmatprep.subr.bf16.mxu0 %v4732_v58  ;;  %v4814_v58 = vld [vmem:[%s6839_s4 + $0x78] sm:$0xff]  }
 0x135   :  { %4414 = vmatpush3.bf16.msra.mxu1 %v4813_v57  ;;  %v4860_v57 = vld [vmem:[%s6845_s10 + $0x344] ss:$52 sps:$4 sm:$0xff]  }
 0x136   :  { %4415 = vmatprep.subr.bf16.mxu1 %v4814_v58  ;;  %v4858_v58 = vld [vmem:[%s6845_s10 + $0x340] ss:$52 sps:$4 sm:$0xff]  }
 0x137   :  { %1558 = vmatpush1.bf16.msra.mxu0 %v4730_v59  ;;  %v4815_v59 = vld [vmem:[%s6839_s4 + $0x38] sm:$0xff]  }
 0x138   :  { %1559 = vmatprep.subr.bf16.mxu0 %v4735_v60  ;;  %v4816_v60 = vld [vmem:[%s6841_s6 + $0x40] sm:$0xff]  }
 0x139   :  { %4416 = vmatpush3.bf16.msra.mxu1 %v4815_v59  ;;  %v4865_v59 = vld [vmem:[%s6845_s10 + $0x3ac] ss:$52 sps:$4 sm:$0xff]  }
 0x13a   :  { %4423 = vmatprep.subr.bf16.mxu1 %v4816_v60  ;;  %v4863_v60 = vld [vmem:[%s6845_s10 + $0x3a8] ss:$52 sps:$4 sm:$0xff]  }
 0x13b   :  { %1560 = vmatpush1.bf16.msra.mxu0 %v4733_v61  ;;  %v6021_v61 = vsub.s32 0, %v5329_v12 }
 0x13c   :  { %1561 = vmatprep.subr.bf16.mxu0 %v4738_v62  ;;  %v249_v62 = vld [vmem:[%s6838_s3] sm:$0x3] }
 0x13f   :  { %1562 = vmatpush1.bf16.msra.mxu0 %v4736_v63  ;;  %v6027_v63 = vsub.s32 1, %v5329_v12 }
 0x140   :  { %1572 = vmatprep.subr.bf16.mxu0 %v4742_v0  ;;  %v254_v0 = vrot.slane %v249_v62, %v6021_v61 }
 0x142   :  { %1564 = vmatmul.mubr.bf16.vlgmr.msra.gmra.mrb[0].mxu0 %v5853_v1  ;;  %v258_v1 = vrot.slane %v249_v62, %v6027_v63 }
 0x143   :  { %1573 = vmatpush1.bf16.msra.mxu0 %v4740_v2  ;;  %1604 = vmatprep.mubr.bf16.mxu0 %v350_v3 }
 0x144   :  { %1574 = vmatprep.subr.bf16.mxu0 %v4745_v4 }
 0x147   :  { %1575 = vmatpush1.bf16.msra.mxu0 %v4743_v5 }
 0x148   :  { %1576 = vmatprep.subr.bf16.mxu0 %v4748_v6 }
 0x14b   :  { %1577 = vmatpush1.bf16.msra.mxu0 %v4746_v7 }
 0x14c   :  { %1578 = vmatprep.subr.bf16.mxu0 %v4751_v8 }
 0x14f   :  { %1579 = vmatpush1.bf16.msra.mxu0 %v4749_v9 }
 0x150   :  { %1580 = vmatprep.subr.bf16.mxu0 %v4754_v10 }
 0x153   :  { %1581 = vmatpush1.bf16.msra.mxu0 %v4752_v11 }
 0x154   :  { %1582 = vmatprep.subr.bf16.mxu0 %v4757_v13 }
 0x157   :  { %1583 = vmatpush1.bf16.msra.mxu0 %v4755_v14 }
 0x158   :  { %1584 = vmatprep.subr.bf16.mxu0 %v4760_v15 }
 0x15b   :  { %1585 = vmatpush1.bf16.msra.mxu0 %v4758_v17 }
 0x15c   :  { %1586 = vmatprep.subr.bf16.mxu0 %v4763_v18 }
 0x15f   :  { %1587 = vmatpush1.bf16.msra.mxu0 %v4761_v19 }
 0x160   :  { %1588 = vmatprep.subr.bf16.mxu0 %v4766_v21 }
 0x163   :  { %1589 = vmatpush1.bf16.msra.mxu0 %v4764_v22  ;;  %v4817_v22 = vld [vmem:[%s6841_s6] sm:$0xff]  }
 0x164   :  { %1590 = vmatprep.subr.bf16.mxu0 %v4769_v23 }
 0x167   :  { %1591 = vmatpush1.bf16.msra.mxu0 %v4767_v24  ;;  %v4818_v24 = vld [vmem:[%s6841_s6 + $0x48] sm:$0xff]  }
 0x168   :  { %1592 = vmatprep.subr.bf16.mxu0 %v4772_v25  ;;  %v4819_v25 = vld [vmem:[%s6841_s6 + $0x8] sm:$0xff]  }
 0x16b   :  { %1593 = vmatpush1.bf16.msra.mxu0 %v4770_v26  ;;  %v4820_v26 = vld [vmem:[%s6841_s6 + $0x50] sm:$0xff]  }
 0x16c   :  { %1594 = vmatprep.subr.bf16.mxu0 %v4775_v27  ;;  %v4821_v27 = vld [vmem:[%s6841_s6 + $0x10] sm:$0xff]  }
 0x16f   :  { %1595 = vmatpush1.bf16.msra.mxu0 %v4773_v28  ;;  %v4822_v28 = vld [vmem:[%s6841_s6 + $0x58] sm:$0xff]  }
 0x170   :  { %1596 = vmatprep.subr.bf16.mxu0 %v4778_v29  ;;  %v4823_v29 = vld [vmem:[%s6841_s6 + $0x18] sm:$0xff]  }
 0x173   :  { %1597 = vmatpush1.bf16.msra.mxu0 %v4776_v30  ;;  %v4824_v30 = vld [vmem:[%s6841_s6 + $0x60] sm:$0xff]  }
 0x174   :  { %1598 = vmatprep.subr.bf16.mxu0 %v4781_v31  ;;  %v4825_v31 = vld [vmem:[%s6841_s6 + $0x20] sm:$0xff]  }
 0x177   :  { %1599 = vmatpush1.bf16.msra.mxu0 %v4779_v32  ;;  %v4826_v32 = vld [vmem:[%s6841_s6 + $0x68] sm:$0xff]  }
 0x178   :  { %1600 = vmatprep.subr.bf16.mxu0 %v4784_v33  ;;  %v4827_v33 = vld [vmem:[%s6841_s6 + $0x28] sm:$0xff]  }
 0x17b   :  { %1601 = vmatpush1.bf16.msra.mxu0 %v4782_v34  ;;  %v4828_v34 = vld [vmem:[%s6841_s6 + $0x70] sm:$0xff]  }
 0x17c   :  { %1602 = vmatprep.subr.bf16.mxu0 %v4787_v35  ;;  %v4829_v35 = vld [vmem:[%s6841_s6 + $0x30] sm:$0xff]  }
 0x17f   :  { %1603 = vmatpush1.bf16.msra.mxu0 %v4785_v36  ;;  %v4830_v36 = vld [vmem:[%s6841_s6 + $0x78] sm:$0xff]  }
 0x180   :  { %1613 = vmatprep.subr.bf16.mxu0 %v4790_v37  ;;  %v4831_v37 = vld [vmem:[%s6841_s6 + $0x38] sm:$0xff]  }
 0x182   :  { %1605 = vmatmul.mubr.bf16.vlgmr.msra.gmra.mrb[0].mxu0 %v349_v38  ;;  %v2025_v38 = vld [vmem:[%s6843_s8] sm:$0xff] }
 0x183   :  { %1614 = vmatpush1.bf16.msra.mxu0 %v4788_v39  ;;  %1645 = vmatprep.mubr.bf16.mxu0 %v5223_v42  ;;  %v4175_v39 = vcombine.high %v2025_v38, %v2025_v38 }
 0x184   :  { %1615 = vmatprep.subr.bf16.mxu0 %v4793_v40  ;;  %v4174_v40 = vcombine.low %v2025_v38, %v2025_v38  ;;  %v4885_v38 = vld [vmem:[%s6845_s10 + $0x54c] ss:$52 sps:$4 sm:$0xff]  }
 0x187   :  { %1616 = vmatpush1.bf16.msra.mxu0 %v4791_v41  ;;  %v2049_v41 = vsel %vm2047_vm3, %v4174_v40, 0  ;;  %v4886_v40 = vld [vmem:[%s6845_s10 + $0x578] ss:$52 sps:$4 sm:$0xff]  }
 0x188   :  { %1617 = vmatprep.subr.bf16.mxu0 %v4796_v43  ;;  %v4836_v43 = vld [vmem:[%s6845_s10 + $0x4] ss:$52 sps:$4 sm:$0xff]  }
 0x18b   :  { %1618 = vmatpush1.bf16.msra.mxu0 %v4794_v45  ;;  %v4837_v45 = vld [vmem:[%s6845_s10 + $0x68] ss:$52 sps:$4 sm:$0xff]  }
 0x18c   :  { %1619 = vmatprep.subr.bf16.mxu0 %v4799_v46  ;;  %v4842_v46 = vld [vmem:[%s6845_s10 + $0xd4] ss:$52 sps:$4 sm:$0xff]  }
 0x18f   :  { %1620 = vmatpush1.bf16.msra.mxu0 %v4797_v48  ;;  %v4840_v48 = vld [vmem:[%s6845_s10 + $0xd0] ss:$52 sps:$4 sm:$0xff]  }
 0x190   :  { %4176 = vmatprep.subr.msk.bf16.mxu0 %vm2047_vm3, %v4175_v39  ;;  %v4883_v39 = vld [vmem:[%s6845_s10 + $0x548] ss:$52 sps:$4 sm:$0xff]  }
 0x192   :  { %4137 = vmatmul.mubr.msk.bf16.vlgmr.msra.gmra.mrb[0].mxu0 %vm1363_vm0, %v341_v20  ;;  %v4845_v20 = vld [vmem:[%s6845_s10 + $0x13c] ss:$52 sps:$4 sm:$0xff]  }
 0x193   :  { %2086 = vmatprep.mubr.bf16.mxu0 %v5223_v42  ;;  %2055 = vmatpush1.bf16.msra.mxu0 %v2049_v41  ;;  %v4834_v42 = vld [vmem:[%s6845_s10] ss:$52 sps:$4 sm:$0xff]   ;;  %v4887_v41 = vld [vmem:[%s6845_s10 + $0x238] ss:$52 sps:$4 sm:$0xff]  }
 0x194   :  { %4445 = vmatprep.subr.bf16.mxu0 %v4861_v47  ;;  %v4893_v47 = vld [vmem:[%s6845_s10 + $0x618] ss:$52 sps:$4 sm:$0xff]  }
 0x265   :  { %v1647_v2 = vpop.f32.mrb[0].mxu0 }
 0x266   :  { %v4467_v3 = vadd.f32 %v1647_v2, %v254_v0  ;;  %v1649_v4 = vpop.f32.mrb[1].mxu0  ;;  %v4140_v0 = vld [vmem:[%s6840_s5] ss:$0 sm:$0xff] }
 0x267   :  { %v4468_v5 = vadd.f32 %v1649_v4, %v258_v1  ;;  %v1651_v6 = vpop.f32.mrb[2].mxu0 }
 0x268   :  { %v1656_v7 = vmin.f32 %v4467_v3, 0.0  ;;  %v1652_v8 = vpop.f32.mrb[3].mxu0  ;;  %vm1654_vm1 = vcmp.gt.f32.partialorder %v4467_v3, 0.0 }
 0x269   :  { %v1657_v9 = vmin.f32 %v4468_v5, 0.0  ;;  %vm1655_vm2 = vcmp.gt.f32.partialorder %v4468_v5, 0.0 }
 0x26a   :  { %v1658_v10 = vmul.f32 1.442695, %v1656_v7  ;;  %v4157_v7 = vld [vmem:[%s6842_s7] ss:$0 sm:$0xff] }
 0x26b   :  { %v1660_v11 = vmul.f32 1.442695, %v1657_v9 }
 0x26c   :  { %5138 = vpow2.f32 %v1658_v10 }
 0x26d   :  { %5140 = vpow2.f32 %v1660_v11 }
 0x276   :  { %v5139_v13 = vpop.eup %5138 }
 0x277   :  { %v5141_v14 = vpop.eup %5140  ;;  %v4138_v15 = vadd.f32 -1.0, %v5139_v13 }
 0x278   :  { %v4139_v17 = vadd.f32 -1.0, %v5141_v14 }
 0x279   :  { %v1664_v18 = vsel %vm1654_vm1, %v4467_v3, %v4138_v15 }
 0x27a   :  { %v1665_v19 = vsel %vm1655_vm2, %v4468_v5, %v4139_v17  ;;  %v1666_v23 = vpack.c.bf16 %v1664_v18, %v1664_v18  ;;  %v2021_v17 = vld [vmem:[%s6836_s1] sm:$0x3] }
 0x27b   :  { %v1667_v21 = vpack.c.bf16 %v1665_v19, %v1665_v19 }
 0x27d   :  { %1835 = vmatprep.mubr.bf16.mxu1 %v1667_v21 }
 0x27e   :  { %1836 = vmatmul.mubr.bf16.vlgmr.msra.gmra.mrb[0].mxu1 %v1666_v23 }
 0x27f   :  { %4424 = vmatpush3.bf16.msra.mxu1 %v4817_v22  ;;  %2010 = vmatprep.mubr.bf16.mxu1 %v1667_v21  ;;  %v4862_v22 = vld [vmem:[%s6845_s10 + $0x30] ss:$52 sps:$4 sm:$0xff]  }
 0x280   :  { %4425 = vmatprep.subr.bf16.mxu1 %v4818_v24  ;;  %v4866_v24 = vld [vmem:[%s6845_s10 + $0x3d8] ss:$52 sps:$4 sm:$0xff]  }
 0x283   :  { %4426 = vmatpush3.bf16.msra.mxu1 %v4819_v25  ;;  %v4867_v25 = vld [vmem:[%s6845_s10 + $0x98] ss:$52 sps:$4 sm:$0xff]  }
 0x284   :  { %4427 = vmatprep.subr.bf16.mxu1 %v4820_v26  ;;  %v4870_v26 = vld [vmem:[%s6845_s10 + $0x414] ss:$52 sps:$4 sm:$0xff]  }
 0x287   :  { %4428 = vmatpush3.bf16.msra.mxu1 %v4821_v27  ;;  %v4868_v27 = vld [vmem:[%s6845_s10 + $0x410] ss:$52 sps:$4 sm:$0xff]  }
 0x288   :  { %4429 = vmatprep.subr.bf16.mxu1 %v4822_v28  ;;  %v4871_v28 = vld [vmem:[%s6845_s10 + $0x440] ss:$52 sps:$4 sm:$0xff]  }
 0x28b   :  { %4430 = vmatpush3.bf16.msra.mxu1 %v4823_v29  ;;  %v4872_v29 = vld [vmem:[%s6845_s10 + $0x100] ss:$52 sps:$4 sm:$0xff]  }
 0x28c   :  { %4431 = vmatprep.subr.bf16.mxu1 %v4824_v30  ;;  %v4875_v30 = vld [vmem:[%s6845_s10 + $0x47c] ss:$52 sps:$4 sm:$0xff]  }
 0x28f   :  { %4432 = vmatpush3.bf16.msra.mxu1 %v4825_v31  ;;  %v4873_v31 = vld [vmem:[%s6845_s10 + $0x478] ss:$52 sps:$4 sm:$0xff]  }
 0x290   :  { %4433 = vmatprep.subr.bf16.mxu1 %v4826_v32  ;;  %v4876_v32 = vld [vmem:[%s6845_s10 + $0x4a8] ss:$52 sps:$4 sm:$0xff]  }
 0x293   :  { %4434 = vmatpush3.bf16.msra.mxu1 %v4827_v33  ;;  %v4877_v33 = vld [vmem:[%s6845_s10 + $0x168] ss:$52 sps:$4 sm:$0xff]  }
 0x294   :  { %4435 = vmatprep.subr.bf16.mxu1 %v4828_v34  ;;  %v4880_v34 = vld [vmem:[%s6845_s10 + $0x4e4] ss:$52 sps:$4 sm:$0xff]  }
 0x297   :  { %4436 = vmatpush3.bf16.msra.mxu1 %v4829_v35  ;;  %v4878_v35 = vld [vmem:[%s6845_s10 + $0x4e0] ss:$52 sps:$4 sm:$0xff]  }
 0x298   :  { %4437 = vmatprep.subr.bf16.mxu1 %v4830_v36  ;;  %v4881_v36 = vld [vmem:[%s6845_s10 + $0x510] ss:$52 sps:$4 sm:$0xff]  }
 0x29b   :  { %4438 = vmatpush3.bf16.msra.mxu1 %v4831_v37  ;;  %v4882_v37 = vld [vmem:[%s6845_s10 + $0x1d0] ss:$52 sps:$4 sm:$0xff]  }
 0x29c   :  { %3458 = vmatprep.subr.bf16.mxu1 %v4836_v43  ;;  %v4888_v43 = vld [vmem:[%s6845_s10 + $0x5b0] ss:$52 sps:$4 sm:$0xff]  }
 0x29e   :  { %2011 = vmatmul.mubr.bf16.vlgmr.msra.gmra.mrb[4].mxu1 %v1666_v23 }
 0x29f   :  { %3459 = vmatpush1.bf16.msra.mxu1 %v4834_v42  ;;  %v4890_v42 = vld [vmem:[%s6845_s10 + $0x5b4] ss:$52 sps:$4 sm:$0xff]  }
 0x2a0   :  { %3460 = vmatprep.subr.bf16.mxu1 %v4839_v44  ;;  %v4891_v44 = vld [vmem:[%s6845_s10 + $0x5e0] ss:$52 sps:$4 sm:$0xff]  }
 0x2a3   :  { %3461 = vmatpush1.bf16.msra.mxu1 %v4837_v45  ;;  %v4892_v45 = vld [vmem:[%s6845_s10 + $0x2a0] ss:$52 sps:$4 sm:$0xff]  }
 0x2a4   :  { %3462 = vmatprep.subr.bf16.mxu1 %v4842_v46  ;;  %v4895_v46 = vld [vmem:[%s6845_s10 + $0x61c] ss:$52 sps:$4 sm:$0xff]  }
 0x2a7   :  { %3463 = vmatpush1.bf16.msra.mxu1 %v4840_v48  ;;  %v4896_v48 = vld [vmem:[%s6845_s10 + $0x648] ss:$52 sps:$4 sm:$0xff]  }
 0x2a8   :  { %3464 = vmatprep.subr.bf16.mxu1 %v4845_v20  ;;  %v4897_v20 = vld [vmem:[%s6845_s10 + $0x308] ss:$52 sps:$4 sm:$0xff]  }
 0x2ab   :  { %3465 = vmatpush1.bf16.msra.mxu1 %v4843_v49  ;;  %v4900_v49 = vld [vmem:[%s6845_s10 + $0xc] ss:$52 sps:$4 sm:$0xff]  }
 0x2ac   :  { %3466 = vmatprep.subr.bf16.mxu1 %v4848_v50  ;;  %v2026_v50 = vld [vmem:[%s6844_s9] sm:$0x3] }
 0x2af   :  { %3467 = vmatpush1.bf16.msra.mxu1 %v4846_v51  ;;  %v2031_v51 = vrot.slane %v2026_v50, %v6021_v61 }
 0x2b0   :  { %3468 = vmatprep.subr.bf16.mxu1 %v4851_v16  ;;  %v2035_v16 = vrot.slane %v2026_v50, %v6027_v63  ;;  %v4958_v50 = vld [vmem:[%s6845_s10 + $0x1b0] ss:$52 sps:$4 sm:$0xff]  }
 0x2b3   :  { %3469 = vmatpush1.bf16.msra.mxu1 %v4849_v52 }
 0x2b4   :  { %3470 = vmatprep.subr.bf16.mxu1 %v4854_v53 }
 0x2b7   :  { %3471 = vmatpush1.bf16.msra.mxu1 %v4852_v54 }
 0x2b8   :  { %3472 = vmatprep.subr.bf16.mxu1 %v4857_v55 }
 0x2bb   :  { %3473 = vmatpush1.bf16.msra.mxu1 %v4855_v56 }
 0x2bc   :  { %3474 = vmatprep.subr.bf16.mxu1 %v4860_v57 }
 0x2bf   :  { %3475 = vmatpush1.bf16.msra.mxu1 %v4858_v58 }
 0x2c0   :  { %3476 = vmatprep.subr.bf16.mxu1 %v4865_v59 }
 0x2c3   :  { %3477 = vmatpush1.bf16.msra.mxu1 %v4863_v60 }
 0x2c4   :  { %3478 = vmatprep.subr.bf16.mxu1 %v4870_v26  ;;  %v4924_v26 = vld [vmem:[%s6845_s10 + $0x34c] ss:$52 sps:$4 sm:$0xff]  }
 0x2c7   :  { %3479 = vmatpush1.bf16.msra.mxu1 %v4868_v27  ;;  %v4922_v27 = vld [vmem:[%s6845_s10 + $0x348] ss:$52 sps:$4 sm:$0xff]  }
 0x2c8   :  { %3480 = vmatprep.subr.bf16.mxu1 %v4875_v30  ;;  %v4930_v30 = vld [vmem:[%s6845_s10 + $0x41c] ss:$52 sps:$4 sm:$0xff]  }
 0x2cb   :  { %3481 = vmatpush1.bf16.msra.mxu1 %v4873_v31  ;;  %v4928_v31 = vld [vmem:[%s6845_s10 + $0x418] ss:$52 sps:$4 sm:$0xff]  }
 0x2cc   :  { %3482 = vmatprep.subr.bf16.mxu1 %v4880_v34  ;;  %v4936_v34 = vld [vmem:[%s6845_s10 + $0x4ec] ss:$52 sps:$4 sm:$0xff]  }
 0x2cf   :  { %3483 = vmatpush1.bf16.msra.mxu1 %v4878_v35  ;;  %v4934_v35 = vld [vmem:[%s6845_s10 + $0x4e8] ss:$52 sps:$4 sm:$0xff]  }
 0x2d0   :  { %3484 = vmatprep.subr.bf16.mxu1 %v4885_v38  ;;  %v4942_v38 = vld [vmem:[%s6845_s10 + $0x5bc] ss:$52 sps:$4 sm:$0xff]  }
 0x2d3   :  { %3485 = vmatpush1.bf16.msra.mxu1 %v4883_v39  ;;  %v4940_v39 = vld [vmem:[%s6845_s10 + $0x5b8] ss:$52 sps:$4 sm:$0xff]  }
 0x2d4   :  { %3486 = vmatprep.subr.bf16.mxu1 %v4890_v42  ;;  %v4948_v42 = vld [vmem:[%s6845_s10 + $0x14] ss:$52 sps:$4 sm:$0xff]  }
 0x2d7   :  { %3487 = vmatpush1.bf16.msra.mxu1 %v4888_v43  ;;  %v4946_v43 = vld [vmem:[%s6845_s10 + $0x10] ss:$52 sps:$4 sm:$0xff]  }
 0x2d8   :  { %3488 = vmatprep.subr.bf16.mxu1 %v4895_v46  ;;  %v4954_v46 = vld [vmem:[%s6845_s10 + $0xe4] ss:$52 sps:$4 sm:$0xff]  }
 0x2db   :  { %3489 = vmatpush1.bf16.msra.mxu1 %v4893_v47  ;;  %v4952_v47 = vld [vmem:[%s6845_s10 + $0xe0] ss:$52 sps:$4 sm:$0xff]  }
 0x2dc   :  { %3499 = vmatprep.subr.bf16.mxu1 %v4900_v49  ;;  %v4960_v49 = vld [vmem:[%s6845_s10 + $0x1b4] ss:$52 sps:$4 sm:$0xff]  }
 0x351   :  { %v4417_v62 = vpop.f32.mrb[0].mxu1 }
 0x352   :  { %v4418_v1 = vpop.f32.mrb[1].mxu1 }
 0x353   :  { %v4419_v2 = vadd.f32 %v4418_v1, %v4417_v62  ;;  %v4420_v3 = vpop.f32.mrb[2].mxu1 }
 0x354   :  { %v4421_v4 = vpop.f32.mrb[3].mxu1 }
 0x355   :  { %v1838_v5 = vadd.f32 %v4419_v2, %v4140_v0 }
 0x357   :  { %3823 = vst.msk [vmem:[#allocation2] sm:$0x3] %vm3822_vm4, %v1838_v5 }
 0x371   :  { %v4439_v6 = vpop.f32.mrb[4].mxu1 }
 0x372   :  { %v4440_v8 = vpop.f32.mrb[5].mxu1 }
 0x373   :  { %v4441_v9 = vadd.f32 %v4440_v8, %v4439_v6  ;;  %v4442_v10 = vpop.f32.mrb[6].mxu1 }
 0x374   :  { %v4443_v11 = vpop.f32.mrb[7].mxu1  ;;  %v4901_v10 = vld [vmem:[%s6845_s10 + $0x70] ss:$52 sps:$4 sm:$0xff]  }
 0x375   :  { %v2013_v13 = vadd.f32 %v4441_v9, %v4157_v7  ;;  %v4898_v7 = vld [vmem:[%s6845_s10 + $0x8] ss:$52 sps:$4 sm:$0xff]  }
 0x376   :  { %v4903_v9 = vld [vmem:[%s6845_s10 + $0x74] ss:$52 sps:$4 sm:$0xff]   ;;  %v4906_v11 = vld [vmem:[%s6845_s10 + $0xdc] ss:$52 sps:$4 sm:$0xff]  }
 0x377   :  { %v2018_v14 = vmul.f32 1.442695, %v2013_v13  ;;  %3824 = vst.msk [vmem:[#allocation4] sm:$0x3] %vm3822_vm4, %v2013_v13  ;;  %v4904_v13 = vld [vmem:[%s6845_s10 + $0xd8] ss:$52 sps:$4 sm:$0xff]  }
 0x379   :  { %5142 = vpow2.f32 %v2018_v14  ;;  %v4909_v14 = vld [vmem:[%s6845_s10 + $0x144] ss:$52 sps:$4 sm:$0xff]  }
 0x383   :  { %v5143_v15 = vpop.eup %5142 }
 0x384   :  { %v2020_v18 = vadd.f32 1e-07, %v5143_v15  ;;  %v4907_v15 = vld [vmem:[%s6845_s10 + $0x140] ss:$52 sps:$4 sm:$0xff]  }
 0x386   :  { %v2022_v19 = vmul.f32 %v2021_v17, %v2020_v18  ;;  %v4912_v17 = vld [vmem:[%s6845_s10 + $0x1ac] ss:$52 sps:$4 sm:$0xff]   ;;  %v4910_v18 = vld [vmem:[%s6845_s10 + $0x1a8] ss:$52 sps:$4 sm:$0xff]  }
 0x388   :  { %v2023_v21 = vadd.f32 %v2022_v19, %v1838_v5  ;;  %v4915_v19 = vld [vmem:[%s6845_s10 + $0x214] ss:$52 sps:$4 sm:$0xff]  }
 0x38a   :  { %v2024_v23 = vpack.c.bf16 %v2023_v21, %v2023_v21  ;;  %v4913_v21 = vld [vmem:[%s6845_s10 + $0x210] ss:$52 sps:$4 sm:$0xff]  }
 0x38c   :  { %4177 = vmatmul.mubr.msk.bf16.vlgmr.msra.gmra.mrb[4].mxu0 %vm2043_vm5, %v2024_v23  ;;  %v4916_v23 = vld [vmem:[%s6845_s10 + $0x278] ss:$52 sps:$4 sm:$0xff]  }
 0x38d   :  { %4446 = vmatpush3.bf16.msra.mxu0 %v4862_v22  ;;  %v4918_v22 = vld [vmem:[%s6845_s10 + $0x27c] ss:$52 sps:$4 sm:$0xff]  }
 0x38e   :  { %4447 = vmatprep.subr.bf16.mxu0 %v4866_v24  ;;  %v4921_v24 = vld [vmem:[%s6845_s10 + $0x2e4] ss:$52 sps:$4 sm:$0xff]  }
 0x391   :  { %4448 = vmatpush3.bf16.msra.mxu0 %v4867_v25  ;;  %v4919_v25 = vld [vmem:[%s6845_s10 + $0x2e0] ss:$52 sps:$4 sm:$0xff]  }
 0x392   :  { %4449 = vmatprep.subr.bf16.mxu0 %v4871_v28  ;;  %v4927_v28 = vld [vmem:[%s6845_s10 + $0x3b4] ss:$52 sps:$4 sm:$0xff]  }
 0x395   :  { %4450 = vmatpush3.bf16.msra.mxu0 %v4872_v29  ;;  %v4925_v29 = vld [vmem:[%s6845_s10 + $0x3b0] ss:$52 sps:$4 sm:$0xff]  }
 0x396   :  { %4451 = vmatprep.subr.bf16.mxu0 %v4876_v32  ;;  %v4933_v32 = vld [vmem:[%s6845_s10 + $0x484] ss:$52 sps:$4 sm:$0xff]  }
 0x399   :  { %4452 = vmatpush3.bf16.msra.mxu0 %v4877_v33  ;;  %v4931_v33 = vld [vmem:[%s6845_s10 + $0x480] ss:$52 sps:$4 sm:$0xff]  }
 0x39a   :  { %4453 = vmatprep.subr.bf16.mxu0 %v4881_v36  ;;  %v4939_v36 = vld [vmem:[%s6845_s10 + $0x554] ss:$52 sps:$4 sm:$0xff]  }
 0x39d   :  { %4454 = vmatpush3.bf16.msra.mxu0 %v4882_v37  ;;  %v4937_v37 = vld [vmem:[%s6845_s10 + $0x550] ss:$52 sps:$4 sm:$0xff]  }
 0x39e   :  { %4455 = vmatprep.subr.bf16.mxu0 %v4886_v40  ;;  %v4945_v40 = vld [vmem:[%s6845_s10 + $0x624] ss:$52 sps:$4 sm:$0xff]  }
 0x3a1   :  { %4456 = vmatpush3.bf16.msra.mxu0 %v4887_v41  ;;  %v4943_v41 = vld [vmem:[%s6845_s10 + $0x620] ss:$52 sps:$4 sm:$0xff]  }
 0x3a2   :  { %4457 = vmatprep.subr.bf16.mxu0 %v4891_v44  ;;  %v4951_v44 = vld [vmem:[%s6845_s10 + $0x7c] ss:$52 sps:$4 sm:$0xff]  }
 0x3a5   :  { %4458 = vmatpush3.bf16.msra.mxu0 %v4892_v45  ;;  %v4949_v45 = vld [vmem:[%s6845_s10 + $0x78] ss:$52 sps:$4 sm:$0xff]  }
 0x3a6   :  { %4459 = vmatprep.subr.bf16.mxu0 %v4896_v48  ;;  %v4957_v48 = vld [vmem:[%s6845_s10 + $0x14c] ss:$52 sps:$4 sm:$0xff]  }
 0x3a9   :  { %4460 = vmatpush3.bf16.msra.mxu0 %v4897_v20  ;;  %v4955_v20 = vld [vmem:[%s6845_s10 + $0x148] ss:$52 sps:$4 sm:$0xff]  }
 0x45f   :  { %v2088_v52 = vpop.f32.mrb[4].mxu0 }
 0x460   :  { %v2089_v53 = vadd.f32 %v2088_v52, %v2031_v51  ;;  %v2090_v54 = vpop.f32.mrb[5].mxu0  ;;  %v4963_v51 = vld [vmem:[%s6845_s10 + $0x21c] ss:$52 sps:$4 sm:$0xff]   ;;  %v4966_v52 = vld [vmem:[%s6845_s10 + $0x284] ss:$52 sps:$4 sm:$0xff]  }
 0x461   :  { %v2091_v55 = vadd.f32 %v2090_v54, %v2035_v16  ;;  %v2092_v56 = vpop.f32.mrb[6].mxu0  ;;  %v4961_v16 = vld [vmem:[%s6845_s10 + $0x218] ss:$52 sps:$4 sm:$0xff]  }
 0x462   :  { %v2097_v57 = vmin.f32 %v2089_v53, 0.0  ;;  %v2093_v58 = vpop.f32.mrb[7].mxu0  ;;  %vm2095_vm6 = vcmp.gt.f32.partialorder %v2089_v53, 0.0  ;;  %v4969_v54 = vld [vmem:[%s6845_s10 + $0x2ec] ss:$52 sps:$4 sm:$0xff]  }
 0x463   :  { %v2098_v59 = vmin.f32 %v2091_v55, 0.0  ;;  %vm2096_vm7 = vcmp.gt.f32.partialorder %v2091_v55, 0.0  ;;  %v4972_v56 = vld [vmem:[%s6845_s10 + $0x354] ss:$52 sps:$4 sm:$0xff]   ;;  %v4975_v58 = vld [vmem:[%s6845_s10 + $0x3bc] ss:$52 sps:$4 sm:$0xff]  }
 0x464   :  { %v2099_v60 = vmul.f32 1.442695, %v2097_v57  ;;  %v4970_v57 = vld [vmem:[%s6845_s10 + $0x350] ss:$52 sps:$4 sm:$0xff]  }
 0x465   :  { %v2101_v62 = vmul.f32 1.442695, %v2098_v59  ;;  %v4973_v59 = vld [vmem:[%s6845_s10 + $0x3b8] ss:$52 sps:$4 sm:$0xff]  }
 0x466   :  { %5144 = vpow2.f32 %v2099_v60  ;;  %v4978_v60 = vld [vmem:[%s6845_s10 + $0x424] ss:$52 sps:$4 sm:$0xff]  }
 0x467   :  { %5146 = vpow2.f32 %v2101_v62  ;;  %v4976_v62 = vld [vmem:[%s6845_s10 + $0x420] ss:$52 sps:$4 sm:$0xff]  }
 0x470   :  { %v5145_v0 = vpop.eup %5144 }
 0x471   :  { %v5147_v1 = vpop.eup %5146  ;;  %v4178_v2 = vadd.f32 -1.0, %v5145_v0  ;;  %v4981_v0 = vld [vmem:[%s6845_s10 + $0x48c] ss:$52 sps:$4 sm:$0xff]  }
 0x472   :  { %v4179_v3 = vadd.f32 -1.0, %v5147_v1  ;;  %v4979_v1 = vld [vmem:[%s6845_s10 + $0x488] ss:$52 sps:$4 sm:$0xff]  }
 0x473   :  { %v2105_v4 = vsel %vm2095_vm6, %v2089_v53, %v4178_v2  ;;  %v4964_v53 = vld [vmem:[%s6845_s10 + $0x280] ss:$52 sps:$4 sm:$0xff]  }
 0x474   :  { %v2106_v5 = vsel %vm2096_vm7, %v2091_v55, %v4179_v3  ;;  %v6245_v8 = vpack.c.bf16 %v2105_v4, %v2105_v4  ;;  %v4967_v55 = vld [vmem:[%s6845_s10 + $0x2e8] ss:$52 sps:$4 sm:$0xff]   ;;  %v4982_v3 = vld [vmem:[%s6845_s10 + $0x4f0] ss:$52 sps:$4 sm:$0xff]  }
 0x475   :  { %v6240_v6 = vpack.c.bf16 %v2106_v5, %v2106_v5  ;;  %v4984_v2 = vld [vmem:[%s6845_s10 + $0x4f4] ss:$52 sps:$4 sm:$0xff]   ;;  %v4987_v4 = vld [vmem:[%s6845_s10 + $0x55c] ss:$52 sps:$4 sm:$0xff]   ;;  %v4985_v5 = vld [vmem:[%s6845_s10 + $0x558] ss:$52 sps:$4 sm:$0xff]  }
 0x477   :  { %3490 = vmatprep.mubr.bf16.mxu1 %v6240_v6  ;;  %3736 = vmatprep.mubr.bf16.mxu0 %v6240_v6 }
 0x478   :  { %3491 = vmatmul.mubr.bf16.vlgmr.msra.gmra.mrb[8].mxu1 %v6245_v8  ;;  %3737 = vmatmul.mubr.bf16.vlgmr.msra.gmra.mrb[8].mxu0 %v6245_v8 }
 0x479   :  { %3500 = vmatpush1.bf16.msra.mxu1 %v4898_v7  ;;  %3531 = vmatprep.mubr.bf16.mxu1 %v6240_v6  ;;  %v4990_v7 = vld [vmem:[%s6845_s10 + $0x5c4] ss:$52 sps:$4 sm:$0xff]  }
 0x47a   :  { %3501 = vmatprep.subr.bf16.mxu1 %v4903_v9  ;;  %v4988_v9 = vld [vmem:[%s6845_s10 + $0x5c0] ss:$52 sps:$4 sm:$0xff]  }
 0x47d   :  { %3502 = vmatpush1.bf16.msra.mxu1 %v4901_v10  ;;  %v4993_v10 = vld [vmem:[%s6845_s10 + $0x62c] ss:$52 sps:$4 sm:$0xff]  }
 0x47e   :  { %3503 = vmatprep.subr.bf16.mxu1 %v4906_v11  ;;  %v4991_v11 = vld [vmem:[%s6845_s10 + $0x628] ss:$52 sps:$4 sm:$0xff]  }
 0x481   :  { %3504 = vmatpush1.bf16.msra.mxu1 %v4904_v13  ;;  %v4996_v13 = vld [vmem:[%s6845_s10 + $0x1c] ss:$52 sps:$4 sm:$0xff]  }
 0x482   :  { %3505 = vmatprep.subr.bf16.mxu1 %v4909_v14  ;;  %v4994_v14 = vld [vmem:[%s6845_s10 + $0x18] ss:$52 sps:$4 sm:$0xff]  }
 0x485   :  { %3506 = vmatpush1.bf16.msra.mxu1 %v4907_v15  ;;  %v4999_v15 = vld [vmem:[%s6845_s10 + $0x84] ss:$52 sps:$4 sm:$0xff]  }
 0x486   :  { %3507 = vmatprep.subr.bf16.mxu1 %v4912_v17  ;;  %v4997_v17 = vld [vmem:[%s6845_s10 + $0x80] ss:$52 sps:$4 sm:$0xff]  }
 0x489   :  { %3508 = vmatpush1.bf16.msra.mxu1 %v4910_v18  ;;  %v5002_v18 = vld [vmem:[%s6845_s10 + $0xec] ss:$52 sps:$4 sm:$0xff]  }
 0x48a   :  { %3509 = vmatprep.subr.bf16.mxu1 %v4915_v19  ;;  %v5000_v19 = vld [vmem:[%s6845_s10 + $0xe8] ss:$52 sps:$4 sm:$0xff]  }
 0x48d   :  { %3510 = vmatpush1.bf16.msra.mxu1 %v4913_v21  ;;  %v5005_v21 = vld [vmem:[%s6845_s10 + $0x154] ss:$52 sps:$4 sm:$0xff]  }
 0x48e   :  { %3511 = vmatprep.subr.bf16.mxu1 %v4918_v22  ;;  %v5003_v22 = vld [vmem:[%s6845_s10 + $0x150] ss:$52 sps:$4 sm:$0xff]  }
 0x491   :  { %3512 = vmatpush1.bf16.msra.mxu1 %v4916_v23  ;;  %v5008_v23 = vld [vmem:[%s6845_s10 + $0x1bc] ss:$52 sps:$4 sm:$0xff]  }
 0x492   :  { %3513 = vmatprep.subr.bf16.mxu1 %v4921_v24  ;;  %v5006_v24 = vld [vmem:[%s6845_s10 + $0x1b8] ss:$52 sps:$4 sm:$0xff]  }
 0x495   :  { %3514 = vmatpush1.bf16.msra.mxu1 %v4919_v25  ;;  %v5011_v25 = vld [vmem:[%s6845_s10 + $0x224] ss:$52 sps:$4 sm:$0xff]  }
 0x496   :  { %3515 = vmatprep.subr.bf16.mxu1 %v4924_v26  ;;  %v5009_v26 = vld [vmem:[%s6845_s10 + $0x220] ss:$52 sps:$4 sm:$0xff]  }
 0x499   :  { %3516 = vmatpush1.bf16.msra.mxu1 %v4922_v27  ;;  %v5014_v27 = vld [vmem:[%s6845_s10 + $0x28c] ss:$52 sps:$4 sm:$0xff]  }
 0x49a   :  { %3517 = vmatprep.subr.bf16.mxu1 %v4927_v28  ;;  %v5012_v28 = vld [vmem:[%s6845_s10 + $0x288] ss:$52 sps:$4 sm:$0xff]  }
 0x49d   :  { %3518 = vmatpush1.bf16.msra.mxu1 %v4925_v29  ;;  %v5017_v29 = vld [vmem:[%s6845_s10 + $0x2f4] ss:$52 sps:$4 sm:$0xff]  }
 0x49e   :  { %3519 = vmatprep.subr.bf16.mxu1 %v4930_v30  ;;  %v5015_v30 = vld [vmem:[%s6845_s10 + $0x2f0] ss:$52 sps:$4 sm:$0xff]  }
 0x4a1   :  { %3520 = vmatpush1.bf16.msra.mxu1 %v4928_v31  ;;  %v5020_v31 = vld [vmem:[%s6845_s10 + $0x35c] ss:$52 sps:$4 sm:$0xff]  }
 0x4a2   :  { %3521 = vmatprep.subr.bf16.mxu1 %v4933_v32  ;;  %v5018_v32 = vld [vmem:[%s6845_s10 + $0x358] ss:$52 sps:$4 sm:$0xff]  }
 0x4a5   :  { %3522 = vmatpush1.bf16.msra.mxu1 %v4931_v33  ;;  %v5023_v33 = vld [vmem:[%s6845_s10 + $0x3c4] ss:$52 sps:$4 sm:$0xff]  }
 0x4a6   :  { %3523 = vmatprep.subr.bf16.mxu1 %v4936_v34  ;;  %v5021_v34 = vld [vmem:[%s6845_s10 + $0x3c0] ss:$52 sps:$4 sm:$0xff]  }
 0x4a9   :  { %3524 = vmatpush1.bf16.msra.mxu1 %v4934_v35  ;;  %v5026_v35 = vld [vmem:[%s6845_s10 + $0x42c] ss:$52 sps:$4 sm:$0xff]  }
 0x4aa   :  { %3525 = vmatprep.subr.bf16.mxu1 %v4939_v36  ;;  %v5024_v36 = vld [vmem:[%s6845_s10 + $0x428] ss:$52 sps:$4 sm:$0xff]  }
 0x4ad   :  { %3526 = vmatpush1.bf16.msra.mxu1 %v4937_v37  ;;  %v5029_v37 = vld [vmem:[%s6845_s10 + $0x494] ss:$52 sps:$4 sm:$0xff]  }
 0x4ae   :  { %3527 = vmatprep.subr.bf16.mxu1 %v4942_v38  ;;  %v5027_v38 = vld [vmem:[%s6845_s10 + $0x490] ss:$52 sps:$4 sm:$0xff]  }
 0x4b1   :  { %3528 = vmatpush1.bf16.msra.mxu1 %v4940_v39  ;;  %v5032_v39 = vld [vmem:[%s6845_s10 + $0x4fc] ss:$52 sps:$4 sm:$0xff]  }
 0x4b2   :  { %3529 = vmatprep.subr.bf16.mxu1 %v4945_v40  ;;  %v5030_v40 = vld [vmem:[%s6845_s10 + $0x4f8] ss:$52 sps:$4 sm:$0xff]  }
 0x4b5   :  { %3530 = vmatpush1.bf16.msra.mxu1 %v4943_v41  ;;  %v5035_v41 = vld [vmem:[%s6845_s10 + $0x564] ss:$52 sps:$4 sm:$0xff]  }
 0x4b6   :  { %3540 = vmatprep.subr.bf16.mxu1 %v4948_v42  ;;  %v5033_v42 = vld [vmem:[%s6845_s10 + $0x560] ss:$52 sps:$4 sm:$0xff]  }
 0x4b8   :  { %3532 = vmatmul.mubr.bf16.vlgmr.msra.gmra.mrb[12].mxu1 %v6245_v8 }
 0x4b9   :  { %3541 = vmatpush1.bf16.msra.mxu1 %v4946_v43  ;;  %3572 = vmatprep.mubr.bf16.mxu1 %v6240_v6  ;;  %v5038_v43 = vld [vmem:[%s6845_s10 + $0x5cc] ss:$52 sps:$4 sm:$0xff]  }
 0x4ba   :  { %3542 = vmatprep.subr.bf16.mxu1 %v4951_v44  ;;  %v5036_v44 = vld [vmem:[%s6845_s10 + $0x5c8] ss:$52 sps:$4 sm:$0xff]  }
 0x4bd   :  { %3543 = vmatpush1.bf16.msra.mxu1 %v4949_v45  ;;  %v5041_v45 = vld [vmem:[%s6845_s10 + $0x634] ss:$52 sps:$4 sm:$0xff]  }
 0x4be   :  { %3544 = vmatprep.subr.bf16.mxu1 %v4954_v46  ;;  %v5039_v46 = vld [vmem:[%s6845_s10 + $0x630] ss:$52 sps:$4 sm:$0xff]  }
 0x4c1   :  { %3545 = vmatpush1.bf16.msra.mxu1 %v4952_v47  ;;  %v5044_v47 = vld [vmem:[%s6845_s10 + $0x24] ss:$52 sps:$4 sm:$0xff]  }
 0x4c2   :  { %3546 = vmatprep.subr.bf16.mxu1 %v4957_v48  ;;  %v5042_v48 = vld [vmem:[%s6845_s10 + $0x20] ss:$52 sps:$4 sm:$0xff]  }
 0x4c5   :  { %3547 = vmatpush1.bf16.msra.mxu1 %v4955_v20  ;;  %v5047_v20 = vld [vmem:[%s6845_s10 + $0x8c] ss:$52 sps:$4 sm:$0xff]  }
 0x4c6   :  { %3548 = vmatprep.subr.bf16.mxu1 %v4960_v49  ;;  %v5045_v49 = vld [vmem:[%s6845_s10 + $0x88] ss:$52 sps:$4 sm:$0xff]  }
 0x4c9   :  { %3549 = vmatpush1.bf16.msra.mxu1 %v4958_v50  ;;  %v5050_v50 = vld [vmem:[%s6845_s10 + $0xf4] ss:$52 sps:$4 sm:$0xff]  }
 0x4ca   :  { %3550 = vmatprep.subr.bf16.mxu1 %v4963_v51  ;;  %v5048_v51 = vld [vmem:[%s6845_s10 + $0xf0] ss:$52 sps:$4 sm:$0xff]  }
 0x4cd   :  { %3551 = vmatpush1.bf16.msra.mxu1 %v4961_v16  ;;  %v5053_v16 = vld [vmem:[%s6845_s10 + $0x15c] ss:$52 sps:$4 sm:$0xff]  }
 0x4ce   :  { %3552 = vmatprep.subr.bf16.mxu1 %v4966_v52  ;;  %v5051_v52 = vld [vmem:[%s6845_s10 + $0x158] ss:$52 sps:$4 sm:$0xff]  }
 0x4d1   :  { %3553 = vmatpush1.bf16.msra.mxu1 %v4964_v53  ;;  %v5056_v53 = vld [vmem:[%s6845_s10 + $0x1c4] ss:$52 sps:$4 sm:$0xff]  }
 0x4d2   :  { %3554 = vmatprep.subr.bf16.mxu1 %v4969_v54  ;;  %v5054_v54 = vld [vmem:[%s6845_s10 + $0x1c0] ss:$52 sps:$4 sm:$0xff]  }
 0x4d5   :  { %3555 = vmatpush1.bf16.msra.mxu1 %v4967_v55  ;;  %v6573_v55 = vld [vmem:[%s6846_s11] sm:$0xff] }
 0x4d6   :  { %3556 = vmatprep.subr.bf16.mxu1 %v4972_v56  ;;  %v5059_v56 = vld [vmem:[%s6845_s10 + $0x22c] ss:$52 sps:$4 sm:$0xff]  }
 0x4d9   :  { %3557 = vmatpush1.bf16.msra.mxu1 %v4970_v57  ;;  %v2355_v57 = vsub.s32 4, %v5329_v12 }
 0x4da   :  { %3558 = vmatprep.subr.bf16.mxu1 %v4975_v58  ;;  %v2340_v58 = vrot.slane %v6573_v55, %v6021_v61 }
 0x4dd   :  { %3559 = vmatpush1.bf16.msra.mxu1 %v4973_v59  ;;  %v6584_v59 = vld [vmem:[%s6846_s11 + $0x8] sm:$0x1f]  ;;  %s3921_s11 = sshll.u32 %s5226_s15, 4  ;;  %s3922_s11 = int_to_ptr.vmem [resolvable:$true] %s3921_s11 }
 0x4de   :  { %3560 = vmatprep.subr.bf16.mxu1 %v4978_v60  ;;  %v5057_v60 = vld [vmem:[%s6845_s10 + $0x228] ss:$52 sps:$4 sm:$0xff]  }
 0x4e1   :  { %3561 = vmatpush1.bf16.msra.mxu1 %v4976_v62  ;;  %v2344_v62 = vrot.slane %v6573_v55, %v6027_v63 }
 0x4e2   :  { %3562 = vmatprep.subr.bf16.mxu1 %v4981_v0  ;;  %v5062_v0 = vld [vmem:[%s6845_s10 + $0x294] ss:$52 sps:$4 sm:$0xff]  }
 0x4e5   :  { %3563 = vmatpush1.bf16.msra.mxu1 %v4979_v1 }
 0x4e6   :  { %3564 = vmatprep.subr.bf16.mxu1 %v4984_v2 }
 0x4e9   :  { %3565 = vmatpush1.bf16.msra.mxu1 %v4982_v3  ;;  %v2388_v3 = vrot.slane %v6584_v59, %v2355_v57 }
 0x4ea   :  { %3566 = vmatprep.subr.bf16.mxu1 %v4987_v4 }
 0x4ed   :  { %3567 = vmatpush1.bf16.msra.mxu1 %v4985_v5 }
 0x4ee   :  { %3568 = vmatprep.subr.bf16.mxu1 %v4990_v7 }
 0x4f1   :  { %3569 = vmatpush1.bf16.msra.mxu1 %v4988_v9 }
 0x4f2   :  { %3570 = vmatprep.subr.bf16.mxu1 %v4993_v10 }
 0x4f5   :  { %3571 = vmatpush1.bf16.msra.mxu1 %v4991_v11 }
 0x4f6   :  { %3581 = vmatprep.subr.bf16.mxu1 %v4996_v13 }
 0x4f8   :  { %3573 = vmatmul.mubr.bf16.vlgmr.msra.gmra.mrb[16].mxu1 %v6245_v8 }
 0x4f9   :  { %3582 = vmatpush1.bf16.msra.mxu1 %v4994_v14  ;;  %3613 = vmatprep.mubr.bf16.mxu1 %v6240_v6  ;;  %v5060_v14 = vld [vmem:[%s6845_s10 + $0x290] ss:$52 sps:$4 sm:$0xff]  }
 0x4fa   :  { %3583 = vmatprep.subr.bf16.mxu1 %v4999_v15 }
 0x4fd   :  { %3584 = vmatpush1.bf16.msra.mxu1 %v4997_v17 }
 0x4fe   :  { %3585 = vmatprep.subr.bf16.mxu1 %v5002_v18 }
 0x501   :  { %3586 = vmatpush1.bf16.msra.mxu1 %v5000_v19  ;;  %v5065_v19 = vld [vmem:[%s6845_s10 + $0x2fc] ss:$52 sps:$4 sm:$0xff]  }
 0x502   :  { %3587 = vmatprep.subr.bf16.mxu1 %v5005_v21 }
 0x505   :  { %3588 = vmatpush1.bf16.msra.mxu1 %v5003_v22 }
 0x506   :  { %3589 = vmatprep.subr.bf16.mxu1 %v5008_v23 }
 0x509   :  { %3590 = vmatpush1.bf16.msra.mxu1 %v5006_v24 }
 0x50a   :  { %3591 = vmatprep.subr.bf16.mxu1 %v5011_v25 }
 0x50d   :  { %3592 = vmatpush1.bf16.msra.mxu1 %v5009_v26  ;;  %v5063_v26 = vld [vmem:[%s6845_s10 + $0x2f8] ss:$52 sps:$4 sm:$0xff]  }
 0x50e   :  { %3593 = vmatprep.subr.bf16.mxu1 %v5014_v27  ;;  %v5068_v27 = vld [vmem:[%s6845_s10 + $0x364] ss:$52 sps:$4 sm:$0xff]  }
 0x511   :  { %3594 = vmatpush1.bf16.msra.mxu1 %v5012_v28 }
 0x512   :  { %3595 = vmatprep.subr.bf16.mxu1 %v5017_v29  ;;  %v5066_v29 = vld [vmem:[%s6845_s10 + $0x360] ss:$52 sps:$4 sm:$0xff]  }
 0x515   :  { %3596 = vmatpush1.bf16.msra.mxu1 %v5015_v30  ;;  %v5071_v30 = vld [vmem:[%s6845_s10 + $0x3cc] ss:$52 sps:$4 sm:$0xff]  }
 0x516   :  { %3597 = vmatprep.subr.bf16.mxu1 %v5020_v31  ;;  %v5224_v31 = vmov 1983009808  }
 0x519   :  { %3598 = vmatpush1.bf16.msra.mxu1 %v5018_v32  ;;  %v3841_v32 = vunpack.c.l.s4 %v5224_v31  ;;  %v5111_v31 = vld [vmem:[%s6845_s10 + $0x300] ss:$52 sps:$4 sm:$0xff]  }
 0x51a   :  { %3599 = vmatprep.subr.bf16.mxu1 %v5023_v33  ;;  %v5069_v33 = vld [vmem:[%s6845_s10 + $0x3c8] ss:$52 sps:$4 sm:$0xff]  }
 0x51d   :  { %3600 = vmatpush1.bf16.msra.mxu1 %v5021_v34  ;;  %v5074_v34 = vld [vmem:[%s6845_s10 + $0x434] ss:$52 sps:$4 sm:$0xff]  }
 0x51e   :  { %3601 = vmatprep.subr.bf16.mxu1 %v5026_v35  ;;  %v3842_v35 = vunpack.c.0.s8 %v3841_v32  ;;  %v5116_v32 = vld [vmem:[%s6845_s10 + $0x36c] ss:$52 sps:$4 sm:$0xff]  }
 0x521   :  { %3602 = vmatpush1.bf16.msra.mxu1 %v5024_v36 }
 0x522   :  { %3603 = vmatprep.subr.bf16.mxu1 %v5029_v37 }
 0x525   :  { %3604 = vmatpush1.bf16.msra.mxu1 %v5027_v38 }
 0x526   :  { %3605 = vmatprep.subr.bf16.mxu1 %v5032_v39  ;;  %v5072_v39 = vld [vmem:[%s6845_s10 + $0x430] ss:$52 sps:$4 sm:$0xff]  }
 0x529   :  { %3606 = vmatpush1.bf16.msra.mxu1 %v5030_v40 }
 0x52a   :  { %3607 = vmatprep.subr.bf16.mxu1 %v5035_v41  ;;  %v5077_v41 = vld [vmem:[%s6845_s10 + $0x49c] ss:$52 sps:$4 sm:$0xff]  }
 0x52d   :  { %3608 = vmatpush1.bf16.msra.mxu1 %v5033_v42 }
 0x52e   :  { %3609 = vmatprep.subr.bf16.mxu1 %v5038_v43 }
 0x531   :  { %3610 = vmatpush1.bf16.msra.mxu1 %v5036_v44  ;;  %v6630_v44 = vsub.s32 %v3842_v35, %v5329_v12  ;;  %v5117_v35 = vld [vmem:[%s6845_s10 + $0x3d0] ss:$52 sps:$4 sm:$0xff]  }
 0x532   :  { %3611 = vmatprep.subr.bf16.mxu1 %v5041_v45 }
 0x535   :  { %3612 = vmatpush1.bf16.msra.mxu1 %v5039_v46 }
 0x536   :  { %3622 = vmatprep.subr.bf16.mxu1 %v5044_v47 }
 0x538   :  { %3614 = vmatmul.mubr.bf16.vlgmr.msra.gmra.mrb[20].mxu1 %v6245_v8 }
 0x539   :  { %3623 = vmatpush1.bf16.msra.mxu1 %v5042_v48  ;;  %3654 = vmatprep.mubr.bf16.mxu1 %v6240_v6  ;;  %v5075_v48 = vld [vmem:[%s6845_s10 + $0x498] ss:$52 sps:$4 sm:$0xff]  }
 0x53a   :  { %3624 = vmatprep.subr.bf16.mxu1 %v5047_v20 }
 0x53d   :  { %3625 = vmatpush1.bf16.msra.mxu1 %v5045_v49  ;;  %v5080_v49 = vld [vmem:[%s6845_s10 + $0x504] ss:$52 sps:$4 sm:$0xff]  }
 0x53e   :  { %3626 = vmatprep.subr.bf16.mxu1 %v5050_v50 }
 0x541   :  { %3627 = vmatpush1.bf16.msra.mxu1 %v5048_v51  ;;  %v5078_v51 = vld [vmem:[%s6845_s10 + $0x500] ss:$52 sps:$4 sm:$0xff]  }
 0x542   :  { %3628 = vmatprep.subr.bf16.mxu1 %v5053_v16  ;;  %v5083_v16 = vld [vmem:[%s6845_s10 + $0x56c] ss:$52 sps:$4 sm:$0xff]  }
 0x545   :  { %3629 = vmatpush1.bf16.msra.mxu1 %v5051_v52  ;;  %v5081_v52 = vld [vmem:[%s6845_s10 + $0x568] ss:$52 sps:$4 sm:$0xff]  }
 0x546   :  { %3630 = vmatprep.subr.bf16.mxu1 %v5056_v53  ;;  %v5086_v53 = vld [vmem:[%s6845_s10 + $0x5d4] ss:$52 sps:$4 sm:$0xff]  }
 0x549   :  { %3631 = vmatpush1.bf16.msra.mxu1 %v5054_v54  ;;  %v5084_v54 = vld [vmem:[%s6845_s10 + $0x5d0] ss:$52 sps:$4 sm:$0xff]  }
 0x54a   :  { %3632 = vmatprep.subr.bf16.mxu1 %v5059_v56  ;;  %v5089_v56 = vld [vmem:[%s6845_s10 + $0x63c] ss:$52 sps:$4 sm:$0xff]  }
 0x54b   :  { %v3492_v1 = vpop.f32.mrb[8].mxu1  ;;  %v4461_v2 = vpop.f32.mrb[8].mxu0 }
 0x54c   :  { %v3493_v4 = vadd.f32 %v3492_v1, %v2340_v58  ;;  %v3494_v5 = vpop.f32.mrb[9].mxu1  ;;  %v4462_v7 = vpop.f32.mrb[9].mxu0  ;;  %v5087_v58 = vld [vmem:[%s6845_s10 + $0x638] ss:$52 sps:$4 sm:$0xff]   ;;  %v5093_v1 = vld [vmem:[%s6845_s10 + $0x90] ss:$52 sps:$4 sm:$0xff]  }
 0x54d   :  { %v3495_v9 = vadd.f32 %v3494_v5, %v2344_v62  ;;  %3633 = vmatpush1.bf16.msra.mxu1 %v5057_v60  ;;  %v4463_v10 = vadd.f32 %v4462_v7, %v4461_v2  ;;  %v3496_v11 = vpop.f32.mrb[10].mxu1  ;;  %v4464_v13 = vpop.f32.mrb[10].mxu0  ;;  %v5092_v60 = vld [vmem:[%s6845_s10 + $0x2c] ss:$52 sps:$4 sm:$0xff]   ;;  %v5090_v62 = vld [vmem:[%s6845_s10 + $0x28] ss:$52 sps:$4 sm:$0xff]  }
 0x54e   :  { %v3757_v15 = vmin.f32 %v3493_v4, 0.0  ;;  %v3497_v17 = vpop.f32.mrb[11].mxu1  ;;  %v4465_v18 = vpop.f32.mrb[11].mxu0  ;;  %3634 = vmatprep.subr.bf16.mxu1 %v5062_v0  ;;  %vm3744_vm8 = vcmp.gt.f32.partialorder %v3493_v4, 0.0  ;;  %v5095_v0 = vld [vmem:[%s6845_s10 + $0x94] ss:$52 sps:$4 sm:$0xff]  }
 0x54f   :  { %v3758_v21 = vmin.f32 %v3495_v9, 0.0  ;;  %v3739_v22 = vadd.f32 %v4463_v10, %v2388_v3  ;;  %vm3745_vm9 = vcmp.gt.f32.partialorder %v3495_v9, 0.0  ;;  %v5098_v2 = vld [vmem:[%s6845_s10 + $0xfc] ss:$52 sps:$4 sm:$0xff]   ;;  %v5096_v3 = vld [vmem:[%s6845_s10 + $0xf8] ss:$52 sps:$4 sm:$0xff]  }
 0x550   :  { %v3770_v23 = vmul.f32 1.442695, %v3757_v15  ;;  %v5104_v5 = vld [vmem:[%s6845_s10 + $0x1cc] ss:$52 sps:$4 sm:$0xff]   ;;  %v2347_v7 = vsub.s32 2, %v5329_v12  ;;  %v2351_v10 = vsub.s32 3, %v5329_v12 }
 0x551   :  { %v3772_v24 = vmul.f32 1.442695, %v3758_v21  ;;  %v3769_v25 = vmin.f32 %v3739_v22, 0.0  ;;  %3635 = vmatpush1.bf16.msra.mxu1 %v5060_v14  ;;  %vm3756_vm10 = vcmp.gt.f32.partialorder %v3739_v22, 0.0  ;;  %v5107_v11 = vld [vmem:[%s6845_s10 + $0x234] ss:$52 sps:$4 sm:$0xff]  }
 0x552   :  { %5148 = vpow2.f32 %v3770_v23  ;;  %3636 = vmatprep.subr.bf16.mxu1 %v5065_v19  ;;  %v2348_v13 = vrot.slane %v6573_v55, %v2347_v7  ;;  %v2352_v14 = vrot.slane %v6573_v55, %v2351_v10  ;;  %v5105_v15 = vld [vmem:[%s6845_s10 + $0x230] ss:$52 sps:$4 sm:$0xff]  }
 0x553   :  { %5150 = vpow2.f32 %v3772_v24  ;;  %v3794_v28 = vmul.f32 1.442695, %v3769_v25  ;;  %v5110_v17 = vld [vmem:[%s6845_s10 + $0x29c] ss:$52 sps:$4 sm:$0xff]   ;;  %v5108_v24 = vld [vmem:[%s6845_s10 + $0x298] ss:$52 sps:$4 sm:$0xff]  }
 0x555   :  { %5152 = vpow2.f32 %v3794_v28  ;;  %3637 = vmatpush1.bf16.msra.mxu1 %v5063_v26 }
 0x556   :  { %3638 = vmatprep.subr.bf16.mxu1 %v5068_v27  ;;  %v5113_v27 = vld [vmem:[%s6845_s10 + $0x304] ss:$52 sps:$4 sm:$0xff]  }
 0x559   :  { %3639 = vmatpush1.bf16.msra.mxu1 %v5066_v29 }
 0x55a   :  { %3640 = vmatprep.subr.bf16.mxu1 %v5071_v30 }
 0x55c   :  { %v5149_v36 = vpop.eup %5148 }
 0x55d   :  { %v5151_v37 = vpop.eup %5150  ;;  %v4388_v38 = vadd.f32 -1.0, %v5149_v36  ;;  %3641 = vmatpush1.bf16.msra.mxu1 %v5069_v33  ;;  %v5114_v33 = vld [vmem:[%s6845_s10 + $0x368] ss:$52 sps:$4 sm:$0xff]  }
 0x55e   :  { %v4389_v40 = vadd.f32 -1.0, %v5151_v37  ;;  %3642 = vmatprep.subr.bf16.mxu1 %v5074_v34  ;;  %v5119_v34 = vld [vmem:[%s6845_s10 + $0x3d4] ss:$52 sps:$4 sm:$0xff]   ;;  %v5122_v36 = vld [vmem:[%s6845_s10 + $0x43c] ss:$52 sps:$4 sm:$0xff]  }
 0x55f   :  { %v5153_v42 = vpop.eup %5152  ;;  %v6627_v43 = vsel %vm3744_vm8, %v3493_v4, %v4388_v38  ;;  %v5101_v4 = vld [vmem:[%s6845_s10 + $0x164] ss:$52 sps:$4 sm:$0xff]  }
 0x560   :  { %v6632_v45 = vsel %vm3745_vm9, %v3495_v9, %v4389_v40  ;;  %v4400_v46 = vadd.f32 -1.0, %v5153_v42  ;;  %v5102_v9 = vld [vmem:[%s6845_s10 + $0x1c8] ss:$52 sps:$4 sm:$0xff]   ;;  %v5120_v40 = vld [vmem:[%s6845_s10 + $0x438] ss:$52 sps:$4 sm:$0xff]  }
 0x561   :  { %v3838_v47 = vcombine.low %v6627_v43, %v6632_v45  ;;  %3643 = vmatpush1.bf16.msra.mxu1 %v5072_v39  ;;  %v5125_v42 = vld [vmem:[%s6845_s10 + $0x4a4] ss:$52 sps:$4 sm:$0xff]   ;;  %v5134_v45 = vld [vmem:[%s6845_s10 + $0x5dc] ss:$52 sps:$4 sm:$0xff]  }
 0x562   :  { %v3821_v20 = vsel %vm3756_vm10, %v3739_v22, %v4400_v46  ;;  %3644 = vmatprep.subr.bf16.mxu1 %v5077_v41  ;;  %v5129_v43 = vld [vmem:[%s6845_s10 + $0x570] ss:$52 sps:$4 sm:$0xff]  }
 0x563   :  { %v3895_v50 = vrot.slane %v3821_v20, %v6630_v44 }
 0x565   :  { %3904 = vst.msk [vmem:[%s6849_s14 + $0x18] sm:$0x3] %vm3903_vm11, %v3895_v50  ;;  %3645 = vmatpush1.bf16.msra.mxu1 %v5075_v48  ;;  %v5128_v50 = vld [vmem:[%s6845_s10 + $0x50c] ss:$52 sps:$4 sm:$0xff]  }
 0x566   :  { %3646 = vmatprep.subr.bf16.mxu1 %v5080_v49  ;;  %v5123_v49 = vld [vmem:[%s6845_s10 + $0x4a0] ss:$52 sps:$4 sm:$0xff]  }
 0x569   :  { %3647 = vmatpush1.bf16.msra.mxu1 %v5078_v51  ;;  %v3846_v51 = vrot.slane %v3838_v47, %v6630_v44  ;;  %v5132_v47 = vld [vmem:[%s6845_s10 + $0x5d8] ss:$52 sps:$4 sm:$0xff]  }
 0x56a   :  { %3648 = vmatprep.subr.bf16.mxu1 %v5083_v16 }
 0x56d   :  { %3649 = vmatpush1.bf16.msra.mxu1 %v5081_v52 }
 0x56e   :  { %3650 = vmatprep.subr.bf16.mxu1 %v5086_v53  ;;  %v5126_v53 = vld [vmem:[%s6845_s10 + $0x508] ss:$52 sps:$4 sm:$0xff]  }
 0x571   :  { %3651 = vmatpush1.bf16.msra.mxu1 %v5084_v54  ;;  %v5131_v54 = vld [vmem:[%s6845_s10 + $0x574] ss:$52 sps:$4 sm:$0xff]  }
 0x572   :  { %3652 = vmatprep.subr.bf16.mxu1 %v5089_v56  ;;  %v5137_v56 = vld [vmem:[%s6845_s10 + $0x644] ss:$52 sps:$4 sm:$0xff]  }
 0x575   :  { %3653 = vmatpush1.bf16.msra.mxu1 %v5087_v58  ;;  %v5135_v58 = vld [vmem:[%s6845_s10 + $0x640] ss:$52 sps:$4 sm:$0xff]  }
 0x576   :  { %3663 = vmatprep.subr.bf16.mxu1 %v5092_v60  ;;  %v2359_v60 = vsub.s32 5, %v5329_v12 }
 0x578   :  { %3655 = vmatmul.mubr.bf16.vlgmr.msra.gmra.mrb[24].mxu1 %v6245_v8 }
 0x579   :  { %3664 = vmatpush1.bf16.msra.mxu1 %v5090_v62  ;;  %3695 = vmatprep.mubr.bf16.mxu1 %v6240_v6  ;;  %v5099_v6 = vld [vmem:[%s6845_s10 + $0x160] ss:$52 sps:$4 sm:$0xff]   ;;  %v2356_v62 = vrot.slane %v6573_v55, %v2355_v57  ;;  %s5225_s10 = smov [#allocation2]  }
 0x57a   :  { %3665 = vmatprep.subr.bf16.mxu1 %v5095_v0  ;;  %v2360_v0 = vrot.slane %v6573_v55, %v2359_v60  ;;  %s3911_s30 = sshll.u32 %s5225_s10, 4  ;;  %s3912_s30 = int_to_ptr.vmem [resolvable:$true] %s3911_s30 }
 0x57b   :  { %s5174_s17 = scalar_lea.vmem %s3912_s30, 32  ;;  %p5179_p1 = scmp.lt.s32.totalorder %s3912_s30, %s3912_s30 }
 0x57c   :  { %p5175_p0 = scmp.ne.s32.totalorder %s3912_s30, %s5174_s17  ;;  %p5180_p2 = scmp.lt.s32.totalorder %s5174_s17, %s5174_s17 }
 0x57d   :  { %3666 = vmatpush1.bf16.msra.mxu1 %v5093_v1 }
 0x57e   :  { %3667 = vmatprep.subr.bf16.mxu1 %v5098_v2  ;;  %p5181_p3 = por %p5180_p2, %p5179_p1 }
 0x580   :  { %p5182_p4 = pnand %p5181_p3, %p5175_p0 }
 0x581   :  { %3668 = vmatpush1.bf16.msra.mxu1 %v5096_v3 }
 0x582   :  { %3669 = vmatprep.subr.bf16.mxu1 %v5101_v4 }
 0x585   :  { %3670 = vmatpush1.bf16.msra.mxu1 %v5099_v6 }
 0x586   :  { %3671 = vmatprep.subr.bf16.mxu1 %v5104_v5 }
 0x589   :  { %3672 = vmatpush1.bf16.msra.mxu1 %v5102_v9 }
 0x58a   :  { %3673 = vmatprep.subr.bf16.mxu1 %v5107_v11 }
 0x58b   :  { %v3533_v18 = vpop.f32.mrb[12].mxu1 }
 0x58c   :  { %v3534_v19 = vadd.f32 %v3533_v18, %v2348_v13  ;;  %v3535_v21 = vpop.f32.mrb[13].mxu1 }
 0x58d   :  { %v3536_v22 = vadd.f32 %v3535_v21, %v2352_v14  ;;  %v3537_v23 = vpop.f32.mrb[14].mxu1  ;;  %3674 = vmatpush1.bf16.msra.mxu1 %v5105_v15 }
 0x58e   :  { %v3759_v25 = vmin.f32 %v3534_v19, 0.0  ;;  %v3538_v26 = vpop.f32.mrb[15].mxu1  ;;  %3675 = vmatprep.subr.bf16.mxu1 %v5110_v17  ;;  %vm3746_vm12 = vcmp.gt.f32.partialorder %v3534_v19, 0.0  ;;  %v2367_v23 = vsub.s32 7, %v5329_v12 }
 0x58f   :  { %v3760_v28 = vmin.f32 %v3536_v22, 0.0  ;;  %vm3747_vm13 = vcmp.gt.f32.partialorder %v3536_v22, 0.0 }
 0x590   :  { %v3774_v29 = vmul.f32 1.442695, %v3759_v25  ;;  %v2368_v25 = vrot.slane %v6573_v55, %v2367_v23 }
 0x591   :  { %v3776_v30 = vmul.f32 1.442695, %v3760_v28  ;;  %3676 = vmatpush1.bf16.msra.mxu1 %v5108_v24 }
 0x592   :  { %5154 = vpow2.f32 %v3774_v29  ;;  %3677 = vmatprep.subr.bf16.mxu1 %v5113_v27 }
 0x593   :  { %5156 = vpow2.f32 %v3776_v30 }
 0x595   :  { %3678 = vmatpush1.bf16.msra.mxu1 %v5111_v31 }
 0x596   :  { %3679 = vmatprep.subr.bf16.mxu1 %v5116_v32 }
 0x599   :  { %3680 = vmatpush1.bf16.msra.mxu1 %v5114_v33 }
 0x59a   :  { %3681 = vmatprep.subr.bf16.mxu1 %v5119_v34 }
 0x59c   :  { %v5155_v37 = vpop.eup %5154 }
 0x59d   :  { %v5157_v38 = vpop.eup %5156  ;;  %v4390_v39 = vadd.f32 -1.0, %v5155_v37  ;;  %3682 = vmatpush1.bf16.msra.mxu1 %v5117_v35 }
 0x59e   :  { %v4391_v41 = vadd.f32 -1.0, %v5157_v38  ;;  %3683 = vmatprep.subr.bf16.mxu1 %v5122_v36 }
 0x59f   :  { %v3811_v46 = vsel %vm3746_vm12, %v3534_v19, %v4390_v39 }
 0x5a0   :  { %v3812_v48 = vsel %vm3747_vm13, %v3536_v22, %v4391_v41  ;;  %v2363_v22 = vsub.s32 6, %v5329_v12 }
 0x5a1   :  { %v3839_v20 = vcombine.low %v3811_v46, %v3812_v48  ;;  %3684 = vmatpush1.bf16.msra.mxu1 %v5120_v40 }
 0x5a2   :  { %3685 = vmatprep.subr.bf16.mxu1 %v5125_v42  ;;  %v2364_v24 = vrot.slane %v6573_v55, %v2363_v22 }
 0x5a3   :  { %v3853_v16 = vrot.slane %v3839_v20, %v6630_v44 }
 0x5a5   :  { %v3854_v52 = vcombine.low %v3846_v51, %v3853_v16  ;;  %3686 = vmatpush1.bf16.msra.mxu1 %v5123_v49 }
 0x5a6   :  { %3687 = vmatprep.subr.bf16.mxu1 %v5128_v50 }
 0x5a7   :  { %3900 = vst [vmem:[%s6849_s14] sm:$0xff] %v3854_v52 }
 0x5a9   :  { %3688 = vmatpush1.bf16.msra.mxu1 %v5126_v53 }
 0x5aa   :  { %3689 = vmatprep.subr.bf16.mxu1 %v5131_v54 }
 0x5ad   :  { %3690 = vmatpush1.bf16.msra.mxu1 %v5129_v43 }
 0x5ae   :  { %3691 = vmatprep.subr.bf16.mxu1 %v5134_v45 }
 0x5b1   :  { %3692 = vmatpush1.bf16.msra.mxu1 %v5132_v47 }
 0x5b2   :  { %3693 = vmatprep.subr.bf16.mxu1 %v5137_v56 }
 0x5b5   :  { %3694 = vmatpush1.bf16.msra.mxu1 %v5135_v58 }
 0x5b8   :  { %3696 = vmatmul.mubr.bf16.vlgmr.msra.gmra.mrb[28].mxu1 %v6245_v8 }
 0x5cb   :  { %v3574_v1 = vpop.f32.mrb[16].mxu1 }
 0x5cc   :  { %v3575_v2 = vadd.f32 %v3574_v1, %v2356_v62  ;;  %v3576_v3 = vpop.f32.mrb[17].mxu1 }
 0x5cd   :  { %v3577_v4 = vadd.f32 %v3576_v3, %v2360_v0  ;;  %v3578_v6 = vpop.f32.mrb[18].mxu1 }
 0x5ce   :  { %v3761_v5 = vmin.f32 %v3575_v2, 0.0  ;;  %v3579_v9 = vpop.f32.mrb[19].mxu1  ;;  %vm3748_vm14 = vcmp.gt.f32.partialorder %v3575_v2, 0.0 }
 0x5cf   :  { %v3762_v11 = vmin.f32 %v3577_v4, 0.0  ;;  %vm3749_vm15 = vcmp.gt.f32.partialorder %v3577_v4, 0.0 }
 0x5d0   :  { %v3778_v13 = vmul.f32 1.442695, %v3761_v5 }
 0x5d1   :  { %v3780_v14 = vmul.f32 1.442695, %v3762_v11 }
 0x5d2   :  { %5158 = vpow2.f32 %v3778_v13 }
 0x5d3   :  { %5160 = vpow2.f32 %v3780_v14 }
 0x5dc   :  { %v5159_v8 = vpop.eup %5158 }
 0x5dd   :  { %v5161_v15 = vpop.eup %5160  ;;  %v4392_v17 = vadd.f32 -1.0, %v5159_v8 }
 0x5de   :  { %v4393_v18 = vadd.f32 -1.0, %v5161_v15 }
 0x5df   :  { %v3813_v57 = vsel %vm3748_vm14, %v3575_v2, %v4392_v17 }
 0x5e0   :  { %v3814_v19 = vsel %vm3749_vm15, %v3577_v4, %v4393_v18 }
 0x5e1   :  { %v3855_v21 = vcombine.low %v3813_v57, %v3814_v19 }
 0x5e3   :  { %v3863_v42 = vrot.slane %v3855_v21, %v6630_v44 }
 0x60b   :  { %v3615_v26 = vpop.f32.mrb[20].mxu1 }
 0x60c   :  { %v3616_v27 = vadd.f32 %v3615_v26, %v2364_v24  ;;  %v3617_v28 = vpop.f32.mrb[21].mxu1 }
 0x60d   :  { %v3618_v29 = vadd.f32 %v3617_v28, %v2368_v25  ;;  %v3619_v30 = vpop.f32.mrb[22].mxu1 }
 0x60e   :  { %v3763_v31 = vmin.f32 %v3616_v27, 0.0  ;;  %v3620_v32 = vpop.f32.mrb[23].mxu1  ;;  %vm3750_vm0 = vcmp.gt.f32.partialorder %v3616_v27, 0.0 }
 0x60f   :  { %v3764_v33 = vmin.f32 %v3618_v29, 0.0  ;;  %vm3751_vm1 = vcmp.gt.f32.partialorder %v3618_v29, 0.0 }
 0x610   :  { %v3782_v34 = vmul.f32 1.442695, %v3763_v31 }
 0x611   :  { %v3784_v35 = vmul.f32 1.442695, %v3764_v33 }
 0x612   :  { %5162 = vpow2.f32 %v3782_v34 }
 0x613   :  { %5164 = vpow2.f32 %v3784_v35 }
 0x61c   :  { %v5163_v36 = vpop.eup %5162 }
 0x61d   :  { %v5165_v37 = vpop.eup %5164  ;;  %v4394_v38 = vadd.f32 -1.0, %v5163_v36 }
 0x61e   :  { %v4395_v39 = vadd.f32 -1.0, %v5165_v37 }
 0x61f   :  { %v3815_v40 = vsel %vm3750_vm0, %v3616_v27, %v4394_v38 }
 0x620   :  { %v3816_v55 = vsel %vm3751_vm1, %v3618_v29, %v4395_v39 }
 0x621   :  { %v3856_v41 = vcombine.low %v3815_v40, %v3816_v55 }
 0x623   :  { %v3870_v46 = vrot.slane %v3856_v41, %v6630_v44 }
 0x625   :  { %v3871_v48 = vcombine.low %v3863_v42, %v3870_v46 }
 0x627   :  { %3901 = vst [vmem:[%s6849_s14 + $0x8] sm:$0xff] %v3871_v48 }
 0x628   :  { %5185 = shalt.err (!%p5182_p4)
}
 0x629   :  { %s5186_s19 = scalar_lea.hbm %s6847_s12, 32 }
 0x62a   :  { %p5187_p5 = scmp.ne.s32.totalorder %s6847_s12, %s5186_s19  ;;  %p5190_p6 = scmp.lt.u32.totalorder %s5186_s19, %s6847_s12 }
 0x62c   :  { %p5192_p7 = pnand %p5190_p6, %p5187_p5 }
 0x62e   :  { %5195 = shalt.err (!%p5192_p7)
}
 0x62f   :  { %3914 = dma.vmem_to_hbm [thread:$0]  %s3912_s30, 32, %s6847_s12, [#allocation3]  }
 0x630   :  { %s5196_s1 = scalar_lea.vmem %s3922_s11, 32  ;;  %p5201_p9 = scmp.lt.s32.totalorder %s3922_s11, %s3922_s11 }
 0x631   :  { %p5197_p8 = scmp.ne.s32.totalorder %s3922_s11, %s5196_s1  ;;  %p5202_p10 = scmp.lt.s32.totalorder %s5196_s1, %s5196_s1 }
 0x633   :  { %p5203_p11 = por %p5202_p10, %p5201_p9 }
 0x635   :  { %p5204_p12 = pnand %p5203_p11, %p5197_p8 }
 0x637   :  { %5207 = shalt.err (!%p5204_p12)
}
 0x638   :  { %s5208_s23 = scalar_lea.hbm %s6848_s13, 32 }
 0x639   :  { %p5209_p13 = scmp.ne.s32.totalorder %s6848_s13, %s5208_s23  ;;  %p5212_p0 = scmp.lt.u32.totalorder %s5208_s23, %s6848_s13 }
 0x63b   :  { %p5214_p1 = pnand %p5212_p0, %p5209_p13 }
 0x63d   :  { %5217 = shalt.err (!%p5214_p1)
}
 0x63e   :  { %3924 = dma.vmem_to_hbm [thread:$0]  %s3922_s11, 32, %s6848_s13, [#allocation5]   ;;  %v2372_v20 = vrot.slane %v6584_v59, %v6021_v61  ;;  %v2376_v49 = vrot.slane %v6584_v59, %v6027_v63  ;;  %v2380_v2 = vrot.slane %v6584_v59, %v2347_v7  ;;  %v2384_v3 = vrot.slane %v6584_v59, %v2351_v10 }
 0x64b   :  { %v3656_v50 = vpop.f32.mrb[24].mxu1 }
 0x64c   :  { %v3657_v51 = vadd.f32 %v3656_v50, %v2372_v20  ;;  %v3658_v16 = vpop.f32.mrb[25].mxu1 }
 0x64d   :  { %v3659_v52 = vadd.f32 %v3658_v16, %v2376_v49  ;;  %v3660_v53 = vpop.f32.mrb[26].mxu1 }
 0x64e   :  { %v3765_v54 = vmin.f32 %v3657_v51, 0.0  ;;  %v3661_v43 = vpop.f32.mrb[27].mxu1  ;;  %vm3752_vm2 = vcmp.gt.f32.partialorder %v3657_v51, 0.0 }
 0x64f   :  { %v3766_v45 = vmin.f32 %v3659_v52, 0.0  ;;  %vm3753_vm3 = vcmp.gt.f32.partialorder %v3659_v52, 0.0 }
 0x650   :  { %v3786_v47 = vmul.f32 1.442695, %v3765_v54 }
 0x651   :  { %v3788_v56 = vmul.f32 1.442695, %v3766_v45 }
 0x652   :  { %5166 = vpow2.f32 %v3786_v47 }
 0x653   :  { %5168 = vpow2.f32 %v3788_v56 }
 0x65c   :  { %v5167_v58 = vpop.eup %5166 }
 0x65d   :  { %v5169_v60 = vpop.eup %5168  ;;  %v4396_v62 = vadd.f32 -1.0, %v5167_v58 }
 0x65e   :  { %v4397_v61 = vadd.f32 -1.0, %v5169_v60 }
 0x65f   :  { %v3817_v0 = vsel %vm3752_vm2, %v3657_v51, %v4396_v62 }
 0x660   :  { %v3818_v63 = vsel %vm3753_vm3, %v3659_v52, %v4397_v61 }
 0x661   :  { %v3872_v1 = vcombine.low %v3817_v0, %v3818_v63 }
 0x663   :  { %v3880_v21 = vrot.slane %v3872_v1, %v6630_v44 }
 0x68b   :  { %v3697_v4 = vpop.f32.mrb[28].mxu1 }
 0x68c   :  { %v3698_v6 = vadd.f32 %v3697_v4, %v2380_v2  ;;  %v3699_v5 = vpop.f32.mrb[29].mxu1 }
 0x68d   :  { %v3700_v9 = vadd.f32 %v3699_v5, %v2384_v3  ;;  %v3701_v11 = vpop.f32.mrb[30].mxu1 }
 0x68e   :  { %v3767_v13 = vmin.f32 %v3698_v6, 0.0  ;;  %v3702_v14 = vpop.f32.mrb[31].mxu1  ;;  %vm3754_vm4 = vcmp.gt.f32.partialorder %v3698_v6, 0.0 }
 0x68f   :  { %v3768_v8 = vmin.f32 %v3700_v9, 0.0  ;;  %vm3755_vm5 = vcmp.gt.f32.partialorder %v3700_v9, 0.0 }
 0x690   :  { %v3790_v15 = vmul.f32 1.442695, %v3767_v13 }
 0x691   :  { %v3792_v17 = vmul.f32 1.442695, %v3768_v8 }
 0x692   :  { %5170 = vpow2.f32 %v3790_v15 }
 0x693   :  { %5172 = vpow2.f32 %v3792_v17 }
 0x69c   :  { %v5171_v18 = vpop.eup %5170 }
 0x69d   :  { %v5173_v57 = vpop.eup %5172  ;;  %v4398_v19 = vadd.f32 -1.0, %v5171_v18 }
 0x69e   :  { %v4399_v7 = vadd.f32 -1.0, %v5173_v57 }
 0x69f   :  { %v3819_v12 = vsel %vm3754_vm4, %v3698_v6, %v4398_v19 }
 0x6a0   :  { %v3820_v59 = vsel %vm3755_vm5, %v3700_v9, %v4399_v7 }
 0x6a1   :  { %v3873_v10 = vcombine.low %v3819_v12, %v3820_v59 }
 0x6a3   :  { %v3887_v22 = vrot.slane %v3873_v10, %v6630_v44 }
 0x6a5   :  { %v3888_v23 = vcombine.low %v3880_v21, %v3887_v22 }
 0x6a7   :  { %3902 = vst [vmem:[%s6849_s14 + $0x10] sm:$0xff] %v3888_v23 }
 0x6a8   :  { %5218 = dma.done.wait [#allocation3], 32  }
 0x6a9   :  { %5219 = vsyncadd [#allocation3], 4294967264 }
 0x6aa   :  { %5220 = dma.done.wait [#allocation5], 32  }
 0x6ab   :  { %5221 = vsyncadd [#allocation5], 4294967264 }
 0x6ac   :  { %3935 = vsyncpa [#allocation3], 1 }
 0x6ad   :  { %3936 = vsyncpa [#allocation5], 1 }

// kernel: vae_forward.9
= control target key start
LH: loop header
LB: loop body
LE: loop exit
PB: predicated region body
PF: predicated region fallthrough
CT: control target
= control target key end

     0   :  { %s1965_s15 = smov 0   ;;  %s2292_s0 = inlined_call_operand.vmem [shape: bf16[2,576,144], index: 0, kind: input, shape index: {}]   ;;  %s2293_s1 = inlined_call_operand.vmem [shape: bf16[32,576], index: 1, kind: input, shape index: {}]   ;;  %s2294_s2 = inlined_call_operand.vmem [shape: f32[32,1], index: 2, kind: input, shape index: {}]   ;;  %s2295_s3 = inlined_call_operand.vmem [shape: bf16[144,576], index: 3, kind: input, shape index: {}]   ;;  %s2296_s4 = inlined_call_operand.vmem [shape: bf16[2,32,576], index: 4, kind: output, shape index: {}]  }
   0x1 LB: > { %s1517_s16 = sadd.s32 4294967295, %s1937_s15   ;;  %p1521_p0 = scmp.ge.s32.totalorder %s1937_s15, 1  ;;  %s1937_s15 = sphi %s1965_s15, %s14_s15  }
   0x2   : > { %p162_p1 = scmp.lt.s32.totalorder %s1937_s15, 3 }
   0x4   : > { %p163_p2 = pnand %p1521_p0, %p162_p1 }
   0x5   : > { %p188_p3 = scmp.lt.s32.totalorder (!%p163_p2), %s1517_s16, 1  ;;  %v1780_v0 = vld [vmem:[%s2293_s1 + $0x4] ss:$20 sps:$4 sm:$0xff] (!%p163_p2)   ;;  %v1939_v2 = vmov (!%p163_p2), 0   ;;  %v212_v41 = vld [vmem:[%s2294_s2 + $0x8] sm:$0xff] (!%p163_p2)  ;;  %v213_v42 = vld [vmem:[%s2294_s2 + $0x10] sm:$0xff] (!%p163_p2) }
   0x6   : > { %166 = sbr.rel (%p163_p2) target bundleno = 683 (0x2ab), region = 36  ;;  %810 = vmatprep.mubr.bf16.mxu0 (!%p163_p2), %v1780_v0  ;;  %916 = vmatprep.mubr.bf16.mxu1 (!%p163_p2), %v1939_v2  ;;  %v211_v38 = vld [vmem:[%s2294_s2] sm:$0xff] (!%p163_p2)  ;;  %v214_v43 = vld [vmem:[%s2294_s2 + $0x18] sm:$0xff] (!%p163_p2)  ;;  %vm771_vm0 = vcmask (!%p163_p2), 523264   ;;  %vm1223_vm5 = vcmask (!%p163_p2), 130048   ;;  %vm1451_vm10 = vcmask (!%p163_p2), 519168  }
   0x7   : > { %1728 = vset.pattern.permute.xlu0 (!%p163_p2), %v1939_v2  ;;  %1729 = vset.pattern.permute.xlu1 (!%p163_p2), %v1939_v2  ;;  %v1847_v40 = vld [vmem:[%s2293_s1 + $0x10] ss:$20 sps:$4 sm:$0xff] (!%p163_p2)   ;;  %v1852_v45 = vld [vmem:[%s2295_s3] ss:$20 sps:$4 sm:$0xff] (!%p163_p2)   ;;  %v1855_v49 = vld [vmem:[%s2295_s3 + $0x28] ss:$20 sps:$4 sm:$0xff] (!%p163_p2)  }
   0x8   : > { %343 = vperm.xlu0 (!%p163_p2), %1728, %v211_v38   ;;  %353 = vperm.xlu1 (!%p163_p2), %1729, %v213_v42   ;;  %v1854_v44 = vld [vmem:[%s2295_s3 + $0x4] ss:$20 sps:$4 sm:$0xff] (!%p163_p2)   ;;  %v1857_v46 = vld [vmem:[%s2295_s3 + $0x2c] ss:$20 sps:$4 sm:$0xff] (!%p163_p2)   ;;  %v1833_v59 = vld [vmem:[%s2293_s1 + $0x28] ss:$20 sps:$4 sm:$0xff] (!%p163_p2)  }
   0x9   : > { %v1851_v52 = vld [vmem:[%s2293_s1 + $0x38] ss:$20 sps:$4 sm:$0xff] (!%p163_p2)   ;;  %v1778_v53 = vld [vmem:[%s2293_s1] ss:$20 sps:$4 sm:$0xff] (!%p163_p2)   ;;  %v1875_v38 = vld [vmem:[%s2295_s3 + $0x11c] ss:$20 sps:$4 sm:$0xff] (!%p163_p2)  }
   0xa   : > { %v1829_v55 = vld [vmem:[%s2293_s1 + $0x2c] ss:$20 sps:$4 sm:$0xff] (!%p163_p2)  }
   0xb   : > { %v1846_v61 = vld [vmem:[%s2293_s1 + $0xc] ss:$20 sps:$4 sm:$0xff] (!%p163_p2)  }
   0xc   : > { %348 = vperm.xlu0 (!%p163_p2), %1728, %v212_v41   ;;  %358 = vperm.xlu1 (!%p163_p2), %1729, %v214_v43   ;;  %v1876_v41 = vld [vmem:[%s2295_s3 + $0x140] ss:$20 sps:$4 sm:$0xff] (!%p163_p2)  }
   0xd   : > { %s2298_s16 = smov (!%p188_p3, %s1517_s16), 1  ;;  %v1881_v42 = vld [vmem:[%s2295_s3 + $0xc] ss:$20 sps:$4 sm:$0xff]  }
   0xe   : > { %s1717_s19 = smul.u32 576, %s2298_s16 }
  0x10   : > { %s1982_s22 = scalar_lea.vmem %s2292_s0, %s1717_s19  ;;  %s1718_s19 = smul.u32 80, %s2298_s16 }
  0x11   : > { %v1730_v1 = vld [vmem:[%s1982_s22 + $0x4] ss:$8 sps:$4 sm:$0xff]   ;;  %v1732_v3 = vld [vmem:[%s1982_s22] ss:$8 sps:$4 sm:$0xff]   ;;  %v1733_v4 = vld [vmem:[%s1982_s22 + $0x14] ss:$8 sps:$4 sm:$0xff]  }
  0x12   : > { %778 = vmatprep.subr.bf16.mxu0 %v1730_v1  ;;  %v1735_v5 = vld [vmem:[%s1982_s22 + $0x10] ss:$8 sps:$4 sm:$0xff]   ;;  %v1736_v6 = vld [vmem:[%s1982_s22 + $0x24] ss:$8 sps:$4 sm:$0xff]   ;;  %v1738_v7 = vld [vmem:[%s1982_s22 + $0x20] ss:$8 sps:$4 sm:$0xff]   ;;  %s2275_s23 = scalar_lea.vmem %s2296_s4, %s1718_s19 }
  0x13   : > { %779 = vmatpush1.bf16.msra.mxu0 %v1732_v3  ;;  %v1739_v8 = vld [vmem:[%s1982_s22 + $0x34] ss:$8 sps:$4 sm:$0xff]   ;;  %v1741_v9 = vld [vmem:[%s1982_s22 + $0x30] ss:$8 sps:$4 sm:$0xff]   ;;  %v1742_v10 = vld [vmem:[%s1982_s22 + $0x44] ss:$8 sps:$4 sm:$0xff]  }
  0x14   : > { %780 = vmatprep.subr.bf16.mxu0 %v1733_v4  ;;  %v1744_v11 = vld [vmem:[%s1982_s22 + $0x40] ss:$8 sps:$4 sm:$0xff]   ;;  %v1745_v12 = vld [vmem:[%s1982_s22 + $0x54] ss:$8 sps:$4 sm:$0xff]   ;;  %v1747_v13 = vld [vmem:[%s1982_s22 + $0x50] ss:$8 sps:$4 sm:$0xff]  }
  0x15   : > { %v1748_v14 = vld [vmem:[%s1982_s22 + $0x64] ss:$8 sps:$4 sm:$0xff]   ;;  %v1750_v15 = vld [vmem:[%s1982_s22 + $0x60] ss:$8 sps:$4 sm:$0xff]   ;;  %v1751_v16 = vld [vmem:[%s1982_s22 + $0x74] ss:$8 sps:$4 sm:$0xff]  }
  0x16   : > { %v1753_v17 = vld [vmem:[%s1982_s22 + $0x70] ss:$8 sps:$4 sm:$0xff]   ;;  %v1754_v18 = vld [vmem:[%s1982_s22 + $0x84] ss:$8 sps:$4 sm:$0xff]   ;;  %v1756_v19 = vld [vmem:[%s1982_s22 + $0x80] ss:$8 sps:$4 sm:$0xff]  }
  0x17   : > { %781 = vmatpush1.bf16.msra.mxu0 %v1735_v5  ;;  %v1757_v20 = vld [vmem:[%s1982_s22 + $0x94] ss:$8 sps:$4 sm:$0xff]   ;;  %v1759_v21 = vld [vmem:[%s1982_s22 + $0x90] ss:$8 sps:$4 sm:$0xff]   ;;  %v1760_v22 = vld [vmem:[%s1982_s22 + $0xa4] ss:$8 sps:$4 sm:$0xff]  }
  0x18   : > { %782 = vmatprep.subr.bf16.mxu0 %v1736_v6  ;;  %v1817_v23 = vld [vmem:[%s1982_s22 + $0x204] ss:$8 sps:$4 sm:$0xff]   ;;  %v1762_v24 = vld [vmem:[%s1982_s22 + $0xa0] ss:$8 sps:$4 sm:$0xff]   ;;  %v1763_v25 = vld [vmem:[%s1982_s22 + $0xb4] ss:$8 sps:$4 sm:$0xff]  }
  0x19   : > { %v1822_v26 = vld [vmem:[%s1982_s22 + $0x200] ss:$8 sps:$4 sm:$0xff]   ;;  %884 = vmatprep.subr.bf16.mxu1 %v1817_v23  ;;  %v1823_v27 = vld [vmem:[%s1982_s22 + $0x214] ss:$8 sps:$4 sm:$0xff]   ;;  %v1765_v28 = vld [vmem:[%s1982_s22 + $0xb0] ss:$8 sps:$4 sm:$0xff]  }
  0x1a   : > { %885 = vmatpush1.bf16.msra.mxu1 %v1822_v26  ;;  %v1828_v29 = vld [vmem:[%s1982_s22 + $0x210] ss:$8 sps:$4 sm:$0xff]   ;;  %v1831_v30 = vld [vmem:[%s1982_s22 + $0x224] ss:$8 sps:$4 sm:$0xff]   ;;  %v1837_v32 = vld [vmem:[%s1982_s22 + $0x220] ss:$8 sps:$4 sm:$0xff]  }
  0x1b   : > { %783 = vmatpush1.bf16.msra.mxu0 %v1738_v7  ;;  %886 = vmatprep.subr.bf16.mxu1 %v1823_v27  ;;  %v1766_v31 = vld [vmem:[%s1982_s22 + $0xc4] ss:$8 sps:$4 sm:$0xff]   ;;  %v1838_v33 = vld [vmem:[%s1982_s22 + $0x234] ss:$8 sps:$4 sm:$0xff]   ;;  %v1768_v34 = vld [vmem:[%s1982_s22 + $0xc0] ss:$8 sps:$4 sm:$0xff]  }
  0x1c   : > { %784 = vmatprep.subr.bf16.mxu0 %v1739_v8  ;;  %v1769_v35 = vld [vmem:[%s1982_s22 + $0xd4] ss:$8 sps:$4 sm:$0xff]   ;;  %v1771_v36 = vld [vmem:[%s1982_s22 + $0xd0] ss:$8 sps:$4 sm:$0xff]   ;;  %v1772_v39 = vld [vmem:[%s1982_s22 + $0xe4] ss:$8 sps:$4 sm:$0xff]  }
  0x1d   : > { %v1843_v37 = vld [vmem:[%s1982_s22 + $0x230] ss:$8 sps:$4 sm:$0xff]   ;;  %v1774_v47 = vld [vmem:[%s1982_s22 + $0xe0] ss:$8 sps:$4 sm:$0xff]   ;;  %v1775_v48 = vld [vmem:[%s1982_s22 + $0xf4] ss:$8 sps:$4 sm:$0xff]  }
  0x1e   : > { %887 = vmatpush1.bf16.msra.mxu1 %v1828_v29  ;;  %v1777_v50 = vld [vmem:[%s1982_s22 + $0xf0] ss:$8 sps:$4 sm:$0xff]   ;;  %v1783_v51 = vld [vmem:[%s1982_s22 + $0x104] ss:$8 sps:$4 sm:$0xff]   ;;  %v1781_v54 = vld [vmem:[%s1982_s22 + $0x100] ss:$8 sps:$4 sm:$0xff]  }
  0x1f   : > { %785 = vmatpush1.bf16.msra.mxu0 %v1741_v9  ;;  %888 = vmatprep.subr.bf16.mxu1 %v1831_v30  ;;  %v1786_v56 = vld [vmem:[%s1982_s22 + $0x114] ss:$8 sps:$4 sm:$0xff]   ;;  %v1784_v57 = vld [vmem:[%s1982_s22 + $0x110] ss:$8 sps:$4 sm:$0xff]   ;;  %v1789_v58 = vld [vmem:[%s1982_s22 + $0x124] ss:$8 sps:$4 sm:$0xff]  }
  0x20   : > { %786 = vmatprep.subr.bf16.mxu0 %v1742_v10  ;;  %v1787_v60 = vld [vmem:[%s1982_s22 + $0x120] ss:$8 sps:$4 sm:$0xff]   ;;  %v1792_v62 = vld [vmem:[%s1982_s22 + $0x134] ss:$8 sps:$4 sm:$0xff]   ;;  %v1790_v63 = vld [vmem:[%s1982_s22 + $0x130] ss:$8 sps:$4 sm:$0xff]  }
  0x21   : > { %v1795_v0 = vld [vmem:[%s1982_s22 + $0x144] ss:$8 sps:$4 sm:$0xff]   ;;  %v1793_v1 = vld [vmem:[%s1982_s22 + $0x140] ss:$8 sps:$4 sm:$0xff]   ;;  %v1798_v3 = vld [vmem:[%s1982_s22 + $0x154] ss:$8 sps:$4 sm:$0xff]  }
  0x22   : > { %889 = vmatpush1.bf16.msra.mxu1 %v1837_v32  ;;  %v1796_v4 = vld [vmem:[%s1982_s22 + $0x150] ss:$8 sps:$4 sm:$0xff]   ;;  %v1801_v5 = vld [vmem:[%s1982_s22 + $0x164] ss:$8 sps:$4 sm:$0xff]   ;;  %v1799_v6 = vld [vmem:[%s1982_s22 + $0x160] ss:$8 sps:$4 sm:$0xff]  }
  0x23   : > { %787 = vmatpush1.bf16.msra.mxu0 %v1744_v11  ;;  %890 = vmatprep.subr.bf16.mxu1 %v1838_v33  ;;  %v1804_v7 = vld [vmem:[%s1982_s22 + $0x174] ss:$8 sps:$4 sm:$0xff]   ;;  %v1802_v8 = vld [vmem:[%s1982_s22 + $0x170] ss:$8 sps:$4 sm:$0xff]   ;;  %v1807_v9 = vld [vmem:[%s1982_s22 + $0x184] ss:$8 sps:$4 sm:$0xff]  }
  0x24   : > { %788 = vmatprep.subr.bf16.mxu0 %v1745_v12  ;;  %v1805_v10 = vld [vmem:[%s1982_s22 + $0x180] ss:$8 sps:$4 sm:$0xff]   ;;  %v1810_v11 = vld [vmem:[%s1982_s22 + $0x194] ss:$8 sps:$4 sm:$0xff]   ;;  %v1808_v12 = vld [vmem:[%s1982_s22 + $0x190] ss:$8 sps:$4 sm:$0xff]  }
  0x25   : > { %v1842_v23 = vld [vmem:[%s1982_s22 + $0x1f4] ss:$8 sps:$4 sm:$0xff]   ;;  %v1850_v27 = vld [vmem:[%s2293_s1 + $0x30] ss:$20 sps:$4 sm:$0xff]  }
  0x26   : > { %891 = vmatpush1.bf16.msra.mxu1 %v1843_v37  ;;  %v1848_v26 = vld [vmem:[%s2293_s1 + $0x34] ss:$20 sps:$4 sm:$0xff]   ;;  %v1858_v29 = vld [vmem:[%s2295_s3 + $0x50] ss:$20 sps:$4 sm:$0xff]  }
  0x27   : > { %789 = vmatpush1.bf16.msra.mxu0 %v1747_v13  ;;  %1230 = vmatprep.subr.bf16.mxu1 %v1854_v44  ;;  %v1813_v13 = vld [vmem:[%s1982_s22 + $0x1a4] ss:$8 sps:$4 sm:$0xff]   ;;  %v1863_v30 = vld [vmem:[%s2295_s3 + $0x7c] ss:$20 sps:$4 sm:$0xff]   ;;  %v1864_v33 = vld [vmem:[%s2295_s3 + $0xa0] ss:$20 sps:$4 sm:$0xff]  }
  0x28   : > { %790 = vmatprep.subr.bf16.mxu0 %v1748_v14  ;;  %v1811_v14 = vld [vmem:[%s1982_s22 + $0x1a0] ss:$8 sps:$4 sm:$0xff]   ;;  %v1866_v32 = vld [vmem:[%s2295_s3 + $0xa4] ss:$20 sps:$4 sm:$0xff]  }
  0x29   : > { %1606 = vmatmul.mubr.msk.bf16.vlgmr.msra.gmra.mrb[0].mxu1 %vm771_vm0, %v1847_v40  ;;  %v1870_v37 = vld [vmem:[%s2295_s3 + $0xf0] ss:$20 sps:$4 sm:$0xff]  }
  0x2a   : > { %926 = vmatprep.mubr.bf16.mxu1 %v1939_v2  ;;  %1231 = vmatpush1.bf16.msra.mxu1 %v1852_v45  ;;  %v1878_v40 = vld [vmem:[%s2295_s3 + $0x144] ss:$20 sps:$4 sm:$0xff]  }
  0x2b   : > { %791 = vmatpush1.bf16.msra.mxu0 %v1750_v15  ;;  %1232 = vmatprep.subr.bf16.mxu1 %v1857_v46  ;;  %v1816_v15 = vld [vmem:[%s1982_s22 + $0x1b4] ss:$8 sps:$4 sm:$0xff]  }
  0x2c   : > { %792 = vmatprep.subr.bf16.mxu0 %v1751_v16  ;;  %v1814_v16 = vld [vmem:[%s1982_s22 + $0x1b0] ss:$8 sps:$4 sm:$0xff]  }
  0x2e   : > { %1233 = vmatpush1.bf16.msra.mxu1 %v1855_v49 }
  0x2f   : > { %793 = vmatpush1.bf16.msra.mxu0 %v1753_v17  ;;  %v1821_v17 = vld [vmem:[%s1982_s22 + $0x1c4] ss:$8 sps:$4 sm:$0xff]  }
  0x30   : > { %794 = vmatprep.subr.bf16.mxu0 %v1754_v18  ;;  %v1819_v18 = vld [vmem:[%s1982_s22 + $0x1c0] ss:$8 sps:$4 sm:$0xff]  }
  0x31   : > { %1607 = vmatmul.mubr.msk.bf16.gmra.mrb[4].mxu1 %vm771_vm0, %v1851_v52 }
  0x33   : > { %795 = vmatpush1.bf16.msra.mxu0 %v1756_v19  ;;  %v1827_v19 = vld [vmem:[%s1982_s22 + $0x1d4] ss:$8 sps:$4 sm:$0xff]  }
  0x34   : > { %796 = vmatprep.subr.bf16.mxu0 %v1757_v20  ;;  %v1825_v20 = vld [vmem:[%s1982_s22 + $0x1d0] ss:$8 sps:$4 sm:$0xff]  }
  0x37   : > { %797 = vmatpush1.bf16.msra.mxu0 %v1759_v21  ;;  %v1836_v21 = vld [vmem:[%s1982_s22 + $0x1e4] ss:$8 sps:$4 sm:$0xff]  }
  0x38   : > { %798 = vmatprep.subr.bf16.mxu0 %v1760_v22  ;;  %v1834_v22 = vld [vmem:[%s1982_s22 + $0x1e0] ss:$8 sps:$4 sm:$0xff]  }
  0x3b   : > { %799 = vmatpush1.bf16.msra.mxu0 %v1762_v24  ;;  %v1840_v24 = vld [vmem:[%s1982_s22 + $0x1f0] ss:$8 sps:$4 sm:$0xff]  }
  0x3c   : > { %800 = vmatprep.subr.bf16.mxu0 %v1763_v25  ;;  %v1844_v25 = vld [vmem:[%s2293_s1 + $0x8] ss:$20 sps:$4 sm:$0xff]  }
  0x3f   : > { %801 = vmatpush1.bf16.msra.mxu0 %v1765_v28  ;;  %v1860_v28 = vld [vmem:[%s2295_s3 + $0x54] ss:$20 sps:$4 sm:$0xff]  }
  0x40   : > { %802 = vmatprep.subr.bf16.mxu0 %v1766_v31  ;;  %1234 = vmatprep.subr.bf16.mxu1 %v1860_v28  ;;  %v1861_v31 = vld [vmem:[%s2295_s3 + $0x78] ss:$20 sps:$4 sm:$0xff]  }
  0x41   : > { %1235 = vmatpush1.bf16.msra.mxu1 %v1858_v29 }
  0x42   : > { %1236 = vmatprep.subr.bf16.mxu1 %v1863_v30 }
  0x43   : > { %803 = vmatpush1.bf16.msra.mxu0 %v1768_v34  ;;  %v1869_v34 = vld [vmem:[%s2295_s3 + $0xcc] ss:$20 sps:$4 sm:$0xff]  }
  0x44   : > { %804 = vmatprep.subr.bf16.mxu0 %v1769_v35  ;;  %v1867_v35 = vld [vmem:[%s2295_s3 + $0xc8] ss:$20 sps:$4 sm:$0xff]  }
  0x45   : > { %1237 = vmatpush1.bf16.msra.mxu1 %v1861_v31 }
  0x46   : > { %1238 = vmatprep.subr.bf16.mxu1 %v1866_v32 }
  0x47   : > { %805 = vmatpush1.bf16.msra.mxu0 %v1771_v36  ;;  %v1872_v36 = vld [vmem:[%s2295_s3 + $0xf4] ss:$20 sps:$4 sm:$0xff]  }
  0x48   : > { %806 = vmatprep.subr.bf16.mxu0 %v1772_v39  ;;  %v1873_v39 = vld [vmem:[%s2295_s3 + $0x118] ss:$20 sps:$4 sm:$0xff]  }
  0x49   : > { %1239 = vmatpush1.bf16.msra.mxu1 %v1864_v33 }
  0x4a   : > { %1240 = vmatprep.subr.bf16.mxu1 %v1869_v34 }
  0x4b   : > { %807 = vmatpush1.bf16.msra.mxu0 %v1774_v47 }
  0x4c   : > { %808 = vmatprep.subr.bf16.mxu0 %v1775_v48 }
  0x4d   : > { %1241 = vmatpush1.bf16.msra.mxu1 %v1867_v35 }
  0x4e   : > { %1242 = vmatprep.subr.bf16.mxu1 %v1872_v36 }
  0x4f   : > { %809 = vmatpush1.bf16.msra.mxu0 %v1777_v50 }
  0x50   : > { %831 = vmatprep.subr.bf16.mxu0 %v1783_v51 }
  0x51   : > { %1243 = vmatpush1.bf16.msra.mxu1 %v1870_v37 }
  0x52   : > { %811 = vmatmul.mubr.bf16.vlgmr.msra.gmra.mrb[0].mxu0 %v1778_v53  ;;  %1244 = vmatprep.subr.bf16.mxu1 %v1875_v38 }
  0x53   : > { %832 = vmatpush1.bf16.msra.mxu0 %v1781_v54  ;;  %820 = vmatprep.mubr.bf16.mxu0 %v1829_v55 }
  0x54   : > { %833 = vmatprep.subr.bf16.mxu0 %v1786_v56 }
  0x55   : > { %1245 = vmatpush1.bf16.msra.mxu1 %v1873_v39 }
  0x56   : > { %1246 = vmatprep.subr.bf16.mxu1 %v1878_v40 }
  0x57   : > { %834 = vmatpush1.bf16.msra.mxu0 %v1784_v57 }
  0x58   : > { %835 = vmatprep.subr.bf16.mxu0 %v1789_v58 }
  0x59   : > { %1247 = vmatpush1.bf16.msra.mxu1 %v1876_v41 }
  0x5a   : > { %821 = vmatmul.mubr.bf16.gmra.mrb[4].mxu0 %v1833_v59  ;;  %1283 = vmatprep.subr.bf16.mxu1 %v1881_v42 }
  0x5b   : > { %836 = vmatpush1.bf16.msra.mxu0 %v1787_v60  ;;  %863 = vmatprep.mubr.bf16.mxu0 %v1846_v61 }
  0x5c   : > { %837 = vmatprep.subr.bf16.mxu0 %v1792_v62 }
  0x5f   : > { %838 = vmatpush1.bf16.msra.mxu0 %v1790_v63 }
  0x60   : > { %839 = vmatprep.subr.bf16.mxu0 %v1795_v0 }
  0x63   : > { %840 = vmatpush1.bf16.msra.mxu0 %v1793_v1 }
  0x64   : > { %841 = vmatprep.subr.bf16.mxu0 %v1798_v3 }
  0x67   : > { %842 = vmatpush1.bf16.msra.mxu0 %v1796_v4 }
  0x68   : > { %843 = vmatprep.subr.bf16.mxu0 %v1801_v5 }
  0x6b   : > { %844 = vmatpush1.bf16.msra.mxu0 %v1799_v6 }
  0x6c   : > { %845 = vmatprep.subr.bf16.mxu0 %v1804_v7 }
  0x6f   : > { %846 = vmatpush1.bf16.msra.mxu0 %v1802_v8 }
  0x70   : > { %847 = vmatprep.subr.bf16.mxu0 %v1807_v9 }
  0x73   : > { %848 = vmatpush1.bf16.msra.mxu0 %v1805_v10 }
  0x74   : > { %849 = vmatprep.subr.bf16.mxu0 %v1810_v11 }
  0x77   : > { %850 = vmatpush1.bf16.msra.mxu0 %v1808_v12 }
  0x78   : > { %851 = vmatprep.subr.bf16.mxu0 %v1813_v13 }
  0x7b   : > { %852 = vmatpush1.bf16.msra.mxu0 %v1811_v14 }
  0x7c   : > { %853 = vmatprep.subr.bf16.mxu0 %v1816_v15 }
  0x7f   : > { %854 = vmatpush1.bf16.msra.mxu0 %v1814_v16 }
  0x80   : > { %855 = vmatprep.subr.bf16.mxu0 %v1821_v17 }
  0x83   : > { %856 = vmatpush1.bf16.msra.mxu0 %v1819_v18 }
  0x84   : > { %857 = vmatprep.subr.bf16.mxu0 %v1827_v19 }
  0x87   : > { %858 = vmatpush1.bf16.msra.mxu0 %v1825_v20  ;;  %v344_v51 = vpop.permute.xlu0 %343  ;;  %v354_v58 = vpop.permute.xlu1 %353 }
  0x88   : > { %859 = vmatprep.subr.bf16.mxu0 %v1836_v21 }
  0x8b   : > { %860 = vmatpush1.bf16.msra.mxu0 %v1834_v22  ;;  %v349_v53 = vpop.permute.xlu0 %348  ;;  %v359_v10 = vpop.permute.xlu1 %358 }
  0x8c   : > { %861 = vmatprep.subr.bf16.mxu0 %v1842_v23 }
  0x8f   : > { %862 = vmatpush1.bf16.msra.mxu0 %v1840_v24 }
  0x92   : > { %864 = vmatmul.mubr.bf16.vlgmr.msra.gmra.mrb[0].mxu0 %v1844_v25 }
  0x93   : > { %873 = vmatprep.mubr.bf16.mxu0 %v1848_v26 }
  0x9a   : > { %874 = vmatmul.mubr.bf16.gmra.mrb[4].mxu0 %v1850_v27 }
  0xfc   : > { %v918_v43 = vpop.f32.mrb[0].mxu1 }
  0xfd   : > { %v920_v44 = vpop.f32.mrb[1].mxu1 }
  0xfe   : > { %v922_v45 = vpop.f32.mrb[2].mxu1 }
  0xff   : > { %v924_v46 = vpop.f32.mrb[3].mxu1 }
 0x104   : > { %v928_v47 = vpop.f32.mrb[4].mxu1 }
 0x105   : > { %v930_v48 = vpop.f32.mrb[5].mxu1 }
 0x106   : > { %v932_v49 = vpop.f32.mrb[6].mxu1 }
 0x107   : > { %v934_v50 = vpop.f32.mrb[7].mxu1 }
 0x165   : > { %v865_v52 = vpop.f32.mrb[0].mxu0 }
 0x166   : > { %v1693_v54 = vadd.f32 %v865_v52, %v344_v51  ;;  %v867_v55 = vpop.f32.mrb[1].mxu0 }
 0x167   : > { %v1695_v56 = vadd.f32 %v867_v55, %v344_v51  ;;  %v869_v57 = vpop.f32.mrb[2].mxu0  ;;  %v1882_v55 = vld [vmem:[%s2295_s3 + $0x30] ss:$20 sps:$4 sm:$0xff]  }
 0x168   : > { %v1694_v59 = vadd.f32 %v1693_v54, %v918_v43  ;;  %v1697_v60 = vadd.f32 %v869_v57, %v349_v53  ;;  %v871_v61 = vpop.f32.mrb[3].mxu0  ;;  %v1887_v57 = vld [vmem:[%s2295_s3 + $0x5c] ss:$20 sps:$4 sm:$0xff]  }
 0x169   : > { %v1696_v62 = vadd.f32 %v1695_v56, %v920_v44  ;;  %v1699_v63 = vadd.f32 %v871_v61, %v349_v53 }
 0x16a   : > { %v945_v0 = vmin.f32 %v1694_v59, 0.0  ;;  %v1698_v1 = vadd.f32 %v1697_v60, %v922_v45  ;;  %vm937_vm1 = vcmp.gt.f32.partialorder %v1694_v59, 0.0 }
 0x16b   : > { %v946_v3 = vmin.f32 %v1696_v62, 0.0  ;;  %v1700_v4 = vadd.f32 %v1699_v63, %v924_v46  ;;  %vm938_vm3 = vcmp.gt.f32.partialorder %v1696_v62, 0.0  ;;  %v1879_v46 = vld [vmem:[%s2295_s3 + $0x8] ss:$20 sps:$4 sm:$0xff]  }
 0x16c   : > { %v953_v5 = vmul.f32 1.442695, %v945_v0  ;;  %v947_v6 = vmin.f32 %v1698_v1, 0.0  ;;  %vm939_vm2 = vcmp.gt.f32.partialorder %v1698_v1, 0.0  ;;  %v1885_v0 = vld [vmem:[%s2295_s3 + $0x58] ss:$20 sps:$4 sm:$0xff]  }
 0x16d   : > { %v955_v7 = vmul.f32 1.442695, %v946_v3  ;;  %v948_v8 = vmin.f32 %v1700_v4, 0.0  ;;  %v875_v9 = vpop.f32.mrb[4].mxu0  ;;  %vm940_vm4 = vcmp.gt.f32.partialorder %v1700_v4, 0.0 }
 0x16e   : > { %1915 = vpow2.f32 %v953_v5  ;;  %v957_v11 = vmul.f32 1.442695, %v947_v6  ;;  %v1701_v12 = vadd.f32 %v875_v9, %v354_v58  ;;  %v877_v13 = vpop.f32.mrb[5].mxu0  ;;  %v1888_v3 = vld [vmem:[%s2295_s3 + $0x80] ss:$20 sps:$4 sm:$0xff]  }
 0x16f   : > { %1917 = vpow2.f32 %v955_v7  ;;  %v959_v14 = vmul.f32 1.442695, %v948_v8  ;;  %v1703_v15 = vadd.f32 %v877_v13, %v354_v58  ;;  %v879_v16 = vpop.f32.mrb[6].mxu0  ;;  %v1891_v5 = vld [vmem:[%s2295_s3 + $0xa8] ss:$20 sps:$4 sm:$0xff]  }
 0x170   : > { %1919 = vpow2.f32 %v957_v11  ;;  %v1705_v17 = vadd.f32 %v879_v16, %v359_v10  ;;  %v1702_v18 = vadd.f32 %v1701_v12, %v928_v47  ;;  %v881_v19 = vpop.f32.mrb[7].mxu0  ;;  %v1896_v6 = vld [vmem:[%s2295_s3 + $0xd4] ss:$20 sps:$4 sm:$0xff]   ;;  %v1894_v7 = vld [vmem:[%s2295_s3 + $0xd0] ss:$20 sps:$4 sm:$0xff]  }
 0x171   : > { %1921 = vpow2.f32 %v959_v14  ;;  %v1707_v20 = vadd.f32 %v881_v19, %v359_v10  ;;  %v1704_v21 = vadd.f32 %v1703_v15, %v930_v48  ;;  %v1884_v48 = vld [vmem:[%s2295_s3 + $0x34] ss:$20 sps:$4 sm:$0xff]   ;;  %v1899_v8 = vld [vmem:[%s2295_s3 + $0xfc] ss:$20 sps:$4 sm:$0xff]   ;;  %v1897_v9 = vld [vmem:[%s2295_s3 + $0xf8] ss:$20 sps:$4 sm:$0xff]  }
 0x172   : > { %v949_v22 = vmin.f32 %v1702_v18, 0.0  ;;  %v1706_v23 = vadd.f32 %v1705_v17, %v932_v49  ;;  %vm941_vm6 = vcmp.gt.f32.partialorder %v1702_v18, 0.0  ;;  %v1902_v10 = vld [vmem:[%s2295_s3 + $0x124] ss:$20 sps:$4 sm:$0xff]   ;;  %v1900_v11 = vld [vmem:[%s2295_s3 + $0x120] ss:$20 sps:$4 sm:$0xff]  }
 0x173   : > { %v950_v24 = vmin.f32 %v1704_v21, 0.0  ;;  %v1708_v25 = vadd.f32 %v1707_v20, %v934_v50  ;;  %vm942_vm8 = vcmp.gt.f32.partialorder %v1704_v21, 0.0  ;;  %v1905_v12 = vld [vmem:[%s2295_s3 + $0x14c] ss:$20 sps:$4 sm:$0xff]   ;;  %v1903_v13 = vld [vmem:[%s2295_s3 + $0x148] ss:$20 sps:$4 sm:$0xff]  }
 0x174   : > { %v961_v26 = vmul.f32 1.442695, %v949_v22  ;;  %v951_v27 = vmin.f32 %v1706_v23, 0.0  ;;  %vm943_vm7 = vcmp.gt.f32.partialorder %v1706_v23, 0.0  ;;  %v1906_v14 = vld [vmem:[%s2295_s3 + $0x10] ss:$20 sps:$4 sm:$0xff]  }
 0x175   : > { %v963_v28 = vmul.f32 1.442695, %v950_v24  ;;  %v952_v29 = vmin.f32 %v1708_v25, 0.0  ;;  %vm944_vm9 = vcmp.gt.f32.partialorder %v1708_v25, 0.0  ;;  %v1907_v15 = vld [vmem:[%s2295_s3 + $0x38] ss:$20 sps:$4 sm:$0xff]  }
 0x176   : > { %1923 = vpow2.f32 %v961_v26  ;;  %v965_v30 = vmul.f32 1.442695, %v951_v27  ;;  %v1908_v16 = vld [vmem:[%s2295_s3 + $0x60] ss:$20 sps:$4 sm:$0xff]   ;;  %v1909_v17 = vld [vmem:[%s2295_s3 + $0x88] ss:$20 sps:$4 sm:$0xff]  }
 0x177   : > { %1925 = vpow2.f32 %v963_v28  ;;  %v967_v31 = vmul.f32 1.442695, %v952_v29  ;;  %v1911_v19 = vld [vmem:[%s2295_s3 + $0xd8] ss:$20 sps:$4 sm:$0xff]   ;;  %v1912_v20 = vld [vmem:[%s2295_s3 + $0x100] ss:$20 sps:$4 sm:$0xff]  }
 0x178   : > { %v1916_v32 = vpop.eup %1915  ;;  %1927 = vpow2.f32 %v965_v30  ;;  %v1914_v22 = vld [vmem:[%s2295_s3 + $0x150] ss:$20 sps:$4 sm:$0xff]  }
 0x179   : > { %v1918_v33 = vpop.eup %1917  ;;  %v1608_v34 = vadd.f32 -1.0, %v1916_v32  ;;  %1929 = vpow2.f32 %v967_v31 }
 0x17a   : > { %v1920_v35 = vpop.eup %1919  ;;  %v1609_v36 = vadd.f32 -1.0, %v1918_v33 }
 0x17b   : > { %v1922_v37 = vpop.eup %1921  ;;  %v1610_v38 = vadd.f32 -1.0, %v1920_v35  ;;  %v977_v40 = vsel %vm937_vm1, %v1694_v59, %v1608_v34 }
 0x17c   : > { %v1611_v39 = vadd.f32 -1.0, %v1922_v37  ;;  %v978_v42 = vsel %vm938_vm3, %v1696_v62, %v1609_v36 }
 0x17d   : > { %v979_v41 = vsel %vm939_vm2, %v1698_v1, %v1610_v38  ;;  %v1890_v1 = vld [vmem:[%s2295_s3 + $0x84] ss:$20 sps:$4 sm:$0xff]  }
 0x17e   : > { %v2158_v43 = vpack.c.bf16 %v979_v41, %v977_v40  ;;  %v980_v44 = vsel %vm940_vm4, %v1700_v4, %v1611_v39  ;;  %v1893_v4 = vld [vmem:[%s2295_s3 + $0xac] ss:$20 sps:$4 sm:$0xff]  }
 0x17f   : > { %v2160_v45 = vpack.c.bf16 %v980_v44, %v978_v42 }
 0x180   : > { %v1924_v47 = vpop.eup %1923 }
 0x181   : > { %v1926_v49 = vpop.eup %1925  ;;  %v1612_v50 = vadd.f32 -1.0, %v1924_v47  ;;  %1661 = vmatprep.mubr.msk.bf16.mxu1 %vm1223_vm5, %v2160_v45 }
 0x182   : > { %v1928_v51 = vpop.eup %1927  ;;  %v1613_v52 = vadd.f32 -1.0, %v1926_v49  ;;  %1263 = vmatmul.mubr.bf16.vlgmr.msra.gmra.mrb[8].mxu1 %v2158_v43 }
 0x183   : > { %v1930_v53 = vpop.eup %1929  ;;  %v1614_v54 = vadd.f32 -1.0, %v1928_v51  ;;  %1284 = vmatpush1.bf16.msra.mxu1 %v1879_v46  ;;  %v981_v58 = vsel %vm941_vm6, %v1702_v18, %v1612_v50  ;;  %v1910_v18 = vld [vmem:[%s2295_s3 + $0xb0] ss:$20 sps:$4 sm:$0xff]  }
 0x184   : > { %v1615_v56 = vadd.f32 -1.0, %v1930_v53  ;;  %1285 = vmatprep.subr.bf16.mxu1 %v1884_v48  ;;  %v982_v60 = vsel %vm942_vm8, %v1704_v21, %v1613_v52  ;;  %v1913_v21 = vld [vmem:[%s2295_s3 + $0x128] ss:$20 sps:$4 sm:$0xff]  }
 0x185   : > { %v983_v59 = vsel %vm943_vm7, %v1706_v23, %v1614_v54 }
 0x186   : > { %v984_v61 = vsel %vm944_vm9, %v1708_v25, %v1615_v56  ;;  %v2177_v62 = vpack.c.bf16 %v983_v59, %v981_v58 }
 0x187   : > { %v2179_v63 = vpack.c.bf16 %v984_v61, %v982_v60  ;;  %1286 = vmatpush1.bf16.msra.mxu1 %v1882_v55 }
 0x188   : > { %1287 = vmatprep.subr.bf16.mxu1 %v1887_v57 }
 0x189   : > { %1662 = vmatprep.mubr.msk.bf16.mxu1 %vm1223_vm5, %v2179_v63 }
 0x18a   : > { %1273 = vmatmul.mubr.bf16.gmra.mrb[12].mxu1 %v2177_v62 }
 0x18b   : > { %1288 = vmatpush1.bf16.msra.mxu1 %v1885_v0  ;;  %1663 = vmatprep.mubr.msk.bf16.mxu1 %vm1223_vm5, %v2160_v45 }
 0x18c   : > { %1289 = vmatprep.subr.bf16.mxu1 %v1890_v1 }
 0x18f   : > { %1290 = vmatpush1.bf16.msra.mxu1 %v1888_v3 }
 0x190   : > { %1291 = vmatprep.subr.bf16.mxu1 %v1893_v4 }
 0x193   : > { %1292 = vmatpush1.bf16.msra.mxu1 %v1891_v5 }
 0x194   : > { %1293 = vmatprep.subr.bf16.mxu1 %v1896_v6 }
 0x197   : > { %1294 = vmatpush1.bf16.msra.mxu1 %v1894_v7 }
 0x198   : > { %1295 = vmatprep.subr.bf16.mxu1 %v1899_v8 }
 0x19b   : > { %1296 = vmatpush1.bf16.msra.mxu1 %v1897_v9 }
 0x19c   : > { %1297 = vmatprep.subr.bf16.mxu1 %v1902_v10 }
 0x19f   : > { %1298 = vmatpush1.bf16.msra.mxu1 %v1900_v11 }
 0x1a0   : > { %1299 = vmatprep.subr.bf16.mxu1 %v1905_v12 }
 0x1a3   : > { %1300 = vmatpush1.bf16.msra.mxu1 %v1903_v13 }
 0x1a4   : > { %1336 = vmatprep.subr.bf16.mxu1 %v1939_v2 }
 0x1a6   : > { %1316 = vmatmul.mubr.bf16.vlgmr.msra.gmra.mrb[16].mxu1 %v2158_v43 }
 0x1a7   : > { %1664 = vmatprep.mubr.msk.bf16.mxu1 %vm1223_vm5, %v2179_v63  ;;  %1337 = vmatpush1.bf16.msra.mxu1 %v1906_v14 }
 0x1a8   : > { %1338 = vmatprep.subr.bf16.mxu1 %v1939_v2 }
 0x1ab   : > { %1339 = vmatpush1.bf16.msra.mxu1 %v1907_v15 }
 0x1ac   : > { %1340 = vmatprep.subr.bf16.mxu1 %v1939_v2 }
 0x1ae   : > { %1326 = vmatmul.mubr.bf16.gmra.mrb[20].mxu1 %v2177_v62 }
 0x1af   : > { %1341 = vmatpush1.bf16.msra.mxu1 %v1908_v16  ;;  %1665 = vmatprep.mubr.msk.bf16.mxu1 %vm1223_vm5, %v2160_v45 }
 0x1b0   : > { %1342 = vmatprep.subr.bf16.mxu1 %v1939_v2 }
 0x1b3   : > { %1343 = vmatpush1.bf16.msra.mxu1 %v1909_v17 }
 0x1b4   : > { %1344 = vmatprep.subr.bf16.mxu1 %v1939_v2 }
 0x1b7   : > { %1345 = vmatpush1.bf16.msra.mxu1 %v1910_v18 }
 0x1b8   : > { %1346 = vmatprep.subr.bf16.mxu1 %v1939_v2 }
 0x1bb   : > { %1347 = vmatpush1.bf16.msra.mxu1 %v1911_v19 }
 0x1bc   : > { %1348 = vmatprep.subr.bf16.mxu1 %v1939_v2 }
 0x1bf   : > { %1349 = vmatpush1.bf16.msra.mxu1 %v1912_v20 }
 0x1c0   : > { %1350 = vmatprep.subr.bf16.mxu1 %v1939_v2 }
 0x1c3   : > { %1351 = vmatpush1.bf16.msra.mxu1 %v1913_v21 }
 0x1c4   : > { %1352 = vmatprep.subr.bf16.mxu1 %v1939_v2 }
 0x1c7   : > { %1353 = vmatpush1.bf16.msra.mxu1 %v1914_v22 }
 0x1ca   : > { %1369 = vmatmul.mubr.bf16.vlgmr.msra.gmra.mrb[24].mxu1 %v2158_v43 }
 0x1cb   : > { %1666 = vmatprep.mubr.msk.bf16.mxu1 %vm1223_vm5, %v2179_v63 }
 0x1d2   : > { %1377 = vmatmul.mubr.bf16.gmra.mrb[28].mxu1 %v2177_v62 }
 0x255   : > { %v1264_v23 = vpop.f32.mrb[8].mxu1 }
 0x256   : > { %v1266_v2 = vpop.f32.mrb[9].mxu1 }
 0x257   : > { %v1681_v24 = vpack.c.bf16 %v1266_v2, %v1264_v23  ;;  %v1268_v25 = vpop.f32.mrb[10].mxu1 }
 0x258   : > { %v1270_v26 = vpop.f32.mrb[11].mxu1 }
 0x259   : > { %1449 = vst [vmem:[%s2275_s23] sm:$0xff] %v1681_v24  ;;  %v1684_v27 = vpack.c.bf16 %v1270_v26, %v1268_v25 }
 0x25b   : > { %1453 = vst [vmem:[%s2275_s23 + $0x14] sm:$0xff] %v1684_v27 }
 0x25d   : > { %v1274_v28 = vpop.f32.mrb[12].mxu1 }
 0x25e   : > { %v1276_v29 = vpop.f32.mrb[13].mxu1 }
 0x25f   : > { %v1687_v30 = vpack.c.bf16 %v1276_v29, %v1274_v28  ;;  %v1278_v31 = vpop.f32.mrb[14].mxu1 }
 0x260   : > { %v1280_v32 = vpop.f32.mrb[15].mxu1 }
 0x261   : > { %1456 = vst [vmem:[%s2275_s23 + $0x28] sm:$0xff] %v1687_v30  ;;  %v1690_v33 = vpack.c.bf16 %v1280_v32, %v1278_v31 }
 0x263   : > { %1459 = vst [vmem:[%s2275_s23 + $0x3c] sm:$0xff] %v1690_v33 }
 0x279   : > { %v1317_v34 = vpop.f32.mrb[16].mxu1 }
 0x27a   : > { %v1319_v35 = vpop.f32.mrb[17].mxu1 }
 0x27b   : > { %v1682_v36 = vpack.c.bf16 %v1319_v35, %v1317_v34  ;;  %v1321_v37 = vpop.f32.mrb[18].mxu1 }
 0x27c   : > { %v1323_v38 = vpop.f32.mrb[19].mxu1 }
 0x27d   : > { %1450 = vst [vmem:[%s2275_s23 + $0x8] sm:$0xff] %v1682_v36  ;;  %v1685_v39 = vpack.c.bf16 %v1323_v38, %v1321_v37 }
 0x27f   : > { %1454 = vst [vmem:[%s2275_s23 + $0x1c] sm:$0xff] %v1685_v39 }
 0x281   : > { %v1327_v40 = vpop.f32.mrb[20].mxu1 }
 0x282   : > { %v1329_v41 = vpop.f32.mrb[21].mxu1 }
 0x283   : > { %v1688_v42 = vpack.c.bf16 %v1329_v41, %v1327_v40  ;;  %v1331_v43 = vpop.f32.mrb[22].mxu1 }
 0x284   : > { %v1333_v44 = vpop.f32.mrb[23].mxu1 }
 0x285   : > { %1457 = vst [vmem:[%s2275_s23 + $0x30] sm:$0xff] %v1688_v42  ;;  %v1691_v45 = vpack.c.bf16 %v1333_v44, %v1331_v43 }
 0x287   : > { %1460 = vst [vmem:[%s2275_s23 + $0x44] sm:$0xff] %v1691_v45 }
 0x29d   : > { %v1370_v46 = vpop.f32.mrb[24].mxu1 }
 0x29e   : > { %v1683_v47 = vpack.c.bf16 %v1370_v46, %v1370_v46  ;;  %v1372_v48 = vpop.f32.mrb[25].mxu1 }
 0x29f   : > { %v1373_v49 = vpop.f32.mrb[26].mxu1 }
 0x2a0   : > { %1452 = vst.msk [vmem:[%s2275_s23 + $0x10] sm:$0xf] %vm1451_vm10, %v1683_v47  ;;  %v1686_v50 = vpack.c.bf16 %v1373_v49, %v1373_v49  ;;  %v1375_v51 = vpop.f32.mrb[27].mxu1 }
 0x2a2   : > { %1455 = vst.msk [vmem:[%s2275_s23 + $0x24] sm:$0xf] %vm1451_vm10, %v1686_v50 }
 0x2a5   : > { %v1378_v52 = vpop.f32.mrb[28].mxu1 }
 0x2a6   : > { %v1689_v53 = vpack.c.bf16 %v1378_v52, %v1378_v52  ;;  %v1380_v54 = vpop.f32.mrb[29].mxu1 }
 0x2a7   : > { %v1381_v55 = vpop.f32.mrb[30].mxu1 }
 0x2a8   : > { %1458 = vst.msk [vmem:[%s2275_s23 + $0x38] sm:$0xf] %vm1451_vm10, %v1689_v53  ;;  %v1692_v56 = vpack.c.bf16 %v1381_v55, %v1381_v55  ;;  %v1383_v57 = vpop.f32.mrb[31].mxu1 }
 0x2aa   : > { %1461 = vst.msk [vmem:[%s2275_s23 + $0x4c] sm:$0xf] %vm1451_vm10, %v1692_v56 }
 0x2ab PF: > { %s14_s15 = sadd.s32 1, %s1937_s15  }
 0x2ac   : > { %p11_p4 = scmp.ge.s32.totalorder %s14_s15, 4  }
 0x2ae   :  { %13 = sbr.rel (!%p11_p4) target bundleno = 1 (0x1), region = 66 }

// kernel: vae_forward.10
= control target key start
LH: loop header
LB: loop body
LE: loop exit
PB: predicated region body
PF: predicated region fallthrough
CT: control target
= control target key end

     0   :  { %s1687_s12 = smov 0   ;;  %s1891_s0 = inlined_call_operand.vmem [shape: bf16[2,288,676], index: 0, kind: input, shape index: {}]   ;;  %s1892_s1 = inlined_call_operand.vmem [shape: bf16[16,288], index: 1, kind: input, shape index: {}]   ;;  %s1893_s2 = inlined_call_operand.vmem [shape: f32[16,1], index: 2, kind: input, shape index: {}]   ;;  %s1894_s3 = inlined_call_operand.vmem [shape: bf16[2,16,676], index: 3, kind: output, shape index: {}]  }
   0x1 LB: > { %s1285_s13 = sadd.s32 4294967295, %s1664_s12   ;;  %p1289_p0 = scmp.ge.s32.totalorder %s1664_s12, 1  ;;  %s1664_s12 = sphi %s1687_s12, %s13_s12  }
   0x2   : > { %p137_p1 = scmp.lt.s32.totalorder %s1664_s12, 3 }
   0x4   : > { %p138_p2 = pnand %p1289_p0, %p137_p1 }
   0x5   : > { %p161_p3 = scmp.lt.s32.totalorder (!%p138_p2), %s1285_s13, 1  ;;  %v1666_v0 = vmov (!%p138_p2), 0   ;;  %v1702_v1 = vld [vmem:[%s1892_s1 + $0x4] ss:$12 sps:$4 sm:$0xff] (!%p138_p2)   ;;  %v1724_v12 = vld [vmem:[%s1892_s1 + $0x8] ss:$12 sps:$4 sm:$0xff] (!%p138_p2)  }
   0x6   : > { %141 = sbr.rel (%p138_p2) target bundleno = 386 (0x182), region = 32  ;;  %930 = vmatprep.mubr.bf16.mxu0 (!%p138_p2), %v1666_v0  ;;  %1467 = vset.pattern.permute.xlu0 (!%p138_p2), %v1666_v0  ;;  %vm851_vm0 = vcmask (!%p138_p2), 261120   ;;  %vm1223_vm7 = vcmask (!%p138_p2), 1043456   ;;  %vm1224_vm8 = vcmask (!%p138_p2), 293892  }
   0x7   : > { %887 = vmatprep.mubr.bf16.mxu1 (!%p138_p2), %v1702_v1  ;;  %vm1225_vm11 = vmor (!%p138_p2), %vm1224_vm8, %vm1223_vm7 }
   0xd   : > { %s1896_s13 = smov (!%p161_p3, %s1285_s13), 1 }
   0xe   : > { %s1456_s16 = smul.u32 864, %s1896_s13 }
   0xf   : > { %s1457_s28 = smul.u32 48, %s1896_s13 }
  0x10   : > { %s1709_s19 = scalar_lea.vmem %s1891_s0, %s1456_s16 }
  0x11   : > { %v1468_v2 = vld [vmem:[%s1709_s19 + $0x4] ss:$24 sps:$4 sm:$0xff]   ;;  %v1470_v3 = vld [vmem:[%s1709_s19] ss:$24 sps:$4 sm:$0xff]   ;;  %v1471_v4 = vld [vmem:[%s1709_s19 + $0x34] ss:$24 sps:$4 sm:$0xff]   ;;  %s1868_s4 = scalar_lea.vmem %s1894_s3, %s1457_s28 }
  0x12   : > { %855 = vmatprep.subr.bf16.mxu1 %v1468_v2  ;;  %v1473_v5 = vld [vmem:[%s1709_s19 + $0x30] ss:$24 sps:$4 sm:$0xff]   ;;  %v1474_v6 = vld [vmem:[%s1709_s19 + $0x304] ss:$24 sps:$4 sm:$0xff]   ;;  %v1476_v7 = vld [vmem:[%s1709_s19 + $0x300] ss:$24 sps:$4 sm:$0xff]  }
  0x13   : > { %856 = vmatpush1.bf16.msra.mxu1 %v1470_v3  ;;  %v1477_v8 = vld [vmem:[%s1709_s19 + $0x64] ss:$24 sps:$4 sm:$0xff]   ;;  %898 = vmatprep.subr.bf16.mxu0 %v1474_v6  ;;  %v1480_v9 = vld [vmem:[%s1709_s19 + $0x334] ss:$24 sps:$4 sm:$0xff]   ;;  %v1482_v10 = vld [vmem:[%s1709_s19 + $0x330] ss:$24 sps:$4 sm:$0xff]  }
  0x14   : > { %857 = vmatprep.subr.bf16.mxu1 %v1471_v4  ;;  %899 = vmatpush1.bf16.msra.mxu0 %v1476_v7  ;;  %v1479_v11 = vld [vmem:[%s1709_s19 + $0x60] ss:$24 sps:$4 sm:$0xff]   ;;  %v1483_v13 = vld [vmem:[%s1709_s19 + $0x94] ss:$24 sps:$4 sm:$0xff]   ;;  %v1485_v16 = vld [vmem:[%s1709_s19 + $0x90] ss:$24 sps:$4 sm:$0xff]  }
  0x15   : > { %900 = vmatprep.subr.bf16.mxu0 %v1480_v9  ;;  %v1488_v14 = vld [vmem:[%s1709_s19 + $0x30c] ss:$24 sps:$4 sm:$0xff]   ;;  %v1486_v15 = vld [vmem:[%s1709_s19 + $0x308] ss:$24 sps:$4 sm:$0xff]   ;;  %v1495_v17 = vld [vmem:[%s1709_s19 + $0x33c] ss:$24 sps:$4 sm:$0xff]  }
  0x16   : > { %v1490_v18 = vld [vmem:[%s1709_s19 + $0xc4] ss:$24 sps:$4 sm:$0xff]   ;;  %v1493_v19 = vld [vmem:[%s1709_s19 + $0x338] ss:$24 sps:$4 sm:$0xff]   ;;  %v1501_v21 = vld [vmem:[%s1709_s19 + $0x14] ss:$24 sps:$4 sm:$0xff]  }
  0x17   : > { %858 = vmatpush1.bf16.msra.mxu1 %v1473_v5  ;;  %v1492_v20 = vld [vmem:[%s1709_s19 + $0xc0] ss:$24 sps:$4 sm:$0xff]   ;;  %v1496_v22 = vld [vmem:[%s1709_s19 + $0xf4] ss:$24 sps:$4 sm:$0xff]   ;;  %v1499_v23 = vld [vmem:[%s1709_s19 + $0x10] ss:$24 sps:$4 sm:$0xff]  }
  0x18   : > { %859 = vmatprep.subr.bf16.mxu1 %v1477_v8  ;;  %901 = vmatpush1.bf16.msra.mxu0 %v1482_v10  ;;  %v1498_v24 = vld [vmem:[%s1709_s19 + $0xf0] ss:$24 sps:$4 sm:$0xff]   ;;  %v1507_v25 = vld [vmem:[%s1709_s19 + $0x44] ss:$24 sps:$4 sm:$0xff]   ;;  %v1505_v27 = vld [vmem:[%s1709_s19 + $0x40] ss:$24 sps:$4 sm:$0xff]  }
  0x19   : > { %984 = vmatprep.subr.bf16.mxu0 %v1488_v14  ;;  %v1502_v26 = vld [vmem:[%s1709_s19 + $0x124] ss:$24 sps:$4 sm:$0xff]   ;;  %v1504_v28 = vld [vmem:[%s1709_s19 + $0x120] ss:$24 sps:$4 sm:$0xff]   ;;  %v1513_v29 = vld [vmem:[%s1709_s19 + $0x74] ss:$24 sps:$4 sm:$0xff]  }
  0x1a   : > { %v1508_v30 = vld [vmem:[%s1709_s19 + $0x154] ss:$24 sps:$4 sm:$0xff]   ;;  %v1511_v31 = vld [vmem:[%s1709_s19 + $0x70] ss:$24 sps:$4 sm:$0xff]   ;;  %v1519_v33 = vld [vmem:[%s1709_s19 + $0xa4] ss:$24 sps:$4 sm:$0xff]  }
  0x1b   : > { %860 = vmatpush1.bf16.msra.mxu1 %v1479_v11  ;;  %1403 = vmatmul.mubr.msk.bf16.vlgmr.msra.gmra.mrb[0].mxu0 %vm851_vm0, %v1724_v12  ;;  %v1510_v32 = vld [vmem:[%s1709_s19 + $0x150] ss:$24 sps:$4 sm:$0xff]   ;;  %v1514_v34 = vld [vmem:[%s1709_s19 + $0x184] ss:$24 sps:$4 sm:$0xff]   ;;  %v1517_v35 = vld [vmem:[%s1709_s19 + $0xa0] ss:$24 sps:$4 sm:$0xff]  }
  0x1c   : > { %861 = vmatprep.subr.bf16.mxu1 %v1483_v13  ;;  %985 = vmatpush1.bf16.msra.mxu0 %v1486_v15  ;;  %v1516_v36 = vld [vmem:[%s1709_s19 + $0x180] ss:$24 sps:$4 sm:$0xff]   ;;  %v1525_v37 = vld [vmem:[%s1709_s19 + $0xd4] ss:$24 sps:$4 sm:$0xff]   ;;  %v1523_v39 = vld [vmem:[%s1709_s19 + $0xd0] ss:$24 sps:$4 sm:$0xff]  }
  0x1d   : > { %1016 = vmatprep.mubr.bf16.mxu0 %v1666_v0  ;;  %986 = vmatprep.subr.bf16.mxu0 %v1495_v17  ;;  %v1520_v38 = vld [vmem:[%s1709_s19 + $0x1b4] ss:$24 sps:$4 sm:$0xff]   ;;  %v1522_v40 = vld [vmem:[%s1709_s19 + $0x1b0] ss:$24 sps:$4 sm:$0xff]   ;;  %v1531_v41 = vld [vmem:[%s1709_s19 + $0x104] ss:$24 sps:$4 sm:$0xff]  }
  0x1e   : > { %v1526_v42 = vld [vmem:[%s1709_s19 + $0x1e4] ss:$24 sps:$4 sm:$0xff]   ;;  %v1529_v43 = vld [vmem:[%s1709_s19 + $0x100] ss:$24 sps:$4 sm:$0xff]   ;;  %v1537_v45 = vld [vmem:[%s1709_s19 + $0x134] ss:$24 sps:$4 sm:$0xff]  }
  0x1f   : > { %862 = vmatpush1.bf16.msra.mxu1 %v1485_v16  ;;  %v1528_v44 = vld [vmem:[%s1709_s19 + $0x1e0] ss:$24 sps:$4 sm:$0xff]   ;;  %v1532_v46 = vld [vmem:[%s1709_s19 + $0x214] ss:$24 sps:$4 sm:$0xff]   ;;  %v1535_v47 = vld [vmem:[%s1709_s19 + $0x130] ss:$24 sps:$4 sm:$0xff]  }
  0x20   : > { %863 = vmatprep.subr.bf16.mxu1 %v1490_v18  ;;  %987 = vmatpush1.bf16.msra.mxu0 %v1493_v19  ;;  %v1534_v48 = vld [vmem:[%s1709_s19 + $0x210] ss:$24 sps:$4 sm:$0xff]   ;;  %v1543_v49 = vld [vmem:[%s1709_s19 + $0x164] ss:$24 sps:$4 sm:$0xff]   ;;  %v1541_v51 = vld [vmem:[%s1709_s19 + $0x160] ss:$24 sps:$4 sm:$0xff]  }
  0x21   : > { %1027 = vmatprep.subr.bf16.mxu0 %v1501_v21  ;;  %v1538_v50 = vld [vmem:[%s1709_s19 + $0x244] ss:$24 sps:$4 sm:$0xff]   ;;  %v1540_v52 = vld [vmem:[%s1709_s19 + $0x240] ss:$24 sps:$4 sm:$0xff]   ;;  %v1549_v53 = vld [vmem:[%s1709_s19 + $0x194] ss:$24 sps:$4 sm:$0xff]  }
  0x22   : > { %v1544_v54 = vld [vmem:[%s1709_s19 + $0x274] ss:$24 sps:$4 sm:$0xff]   ;;  %v1547_v55 = vld [vmem:[%s1709_s19 + $0x190] ss:$24 sps:$4 sm:$0xff]   ;;  %v1555_v57 = vld [vmem:[%s1709_s19 + $0x1c4] ss:$24 sps:$4 sm:$0xff]  }
  0x23   : > { %864 = vmatpush1.bf16.msra.mxu1 %v1492_v20  ;;  %1404 = vmatmul.mubr.msk.bf16.vlgmr.msra.gmra.mrb[4].mxu0 %vm851_vm0, %v1724_v12  ;;  %v1546_v56 = vld [vmem:[%s1709_s19 + $0x270] ss:$24 sps:$4 sm:$0xff]   ;;  %v1550_v58 = vld [vmem:[%s1709_s19 + $0x2a4] ss:$24 sps:$4 sm:$0xff]   ;;  %v1553_v59 = vld [vmem:[%s1709_s19 + $0x1c0] ss:$24 sps:$4 sm:$0xff]  }
  0x24   : > { %865 = vmatprep.subr.bf16.mxu1 %v1496_v22  ;;  %1028 = vmatpush1.bf16.msra.mxu0 %v1499_v23  ;;  %v1552_v60 = vld [vmem:[%s1709_s19 + $0x2a0] ss:$24 sps:$4 sm:$0xff]   ;;  %v1561_v61 = vld [vmem:[%s1709_s19 + $0x1f4] ss:$24 sps:$4 sm:$0xff]   ;;  %v1559_v63 = vld [vmem:[%s1709_s19 + $0x1f0] ss:$24 sps:$4 sm:$0xff]  }
  0x25   : > { %1059 = vmatprep.mubr.bf16.mxu0 %v1702_v1  ;;  %1029 = vmatprep.subr.bf16.mxu0 %v1507_v25  ;;  %v1556_v62 = vld [vmem:[%s1709_s19 + $0x2d4] ss:$24 sps:$4 sm:$0xff]   ;;  %v1558_v2 = vld [vmem:[%s1709_s19 + $0x2d0] ss:$24 sps:$4 sm:$0xff]   ;;  %v1570_v3 = vld [vmem:[%s1709_s19 + $0x224] ss:$24 sps:$4 sm:$0xff]  }
  0x26   : > { %v1567_v4 = vld [vmem:[%s1709_s19 + $0xc] ss:$24 sps:$4 sm:$0xff]   ;;  %v1568_v6 = vld [vmem:[%s1709_s19 + $0x220] ss:$24 sps:$4 sm:$0xff]   ;;  %v1573_v9 = vld [vmem:[%s1709_s19 + $0x3c] ss:$24 sps:$4 sm:$0xff]  }
  0x27   : > { %866 = vmatpush1.bf16.msra.mxu1 %v1498_v24  ;;  %v1789_v5 = vld [vmem:[%s1892_s1] ss:$12 sps:$4 sm:$0xff]   ;;  %v1574_v10 = vld [vmem:[%s1709_s19 + $0x250] ss:$24 sps:$4 sm:$0xff]   ;;  %v1582_v13 = vld [vmem:[%s1709_s19 + $0x284] ss:$24 sps:$4 sm:$0xff]  }
  0x28   : > { %867 = vmatprep.subr.bf16.mxu1 %v1502_v26  ;;  %1030 = vmatpush1.bf16.msra.mxu0 %v1505_v27  ;;  %v1565_v7 = vld [vmem:[%s1709_s19 + $0x8] ss:$24 sps:$4 sm:$0xff]   ;;  %v1576_v8 = vld [vmem:[%s1709_s19 + $0x254] ss:$24 sps:$4 sm:$0xff]   ;;  %v1571_v11 = vld [vmem:[%s1709_s19 + $0x38] ss:$24 sps:$4 sm:$0xff]  }
  0x29   : > { %1031 = vmatprep.subr.bf16.mxu0 %v1513_v29  ;;  %v1579_v14 = vld [vmem:[%s1709_s19 + $0x6c] ss:$24 sps:$4 sm:$0xff]   ;;  %v1580_v15 = vld [vmem:[%s1709_s19 + $0x280] ss:$24 sps:$4 sm:$0xff]   ;;  %v1585_v18 = vld [vmem:[%s1709_s19 + $0x9c] ss:$24 sps:$4 sm:$0xff]  }
  0x2a   : > { %v1577_v16 = vld [vmem:[%s1709_s19 + $0x68] ss:$24 sps:$4 sm:$0xff]   ;;  %v1588_v17 = vld [vmem:[%s1709_s19 + $0x2b4] ss:$24 sps:$4 sm:$0xff]   ;;  %v1583_v21 = vld [vmem:[%s1709_s19 + $0x98] ss:$24 sps:$4 sm:$0xff]  }
  0x2b   : > { %868 = vmatpush1.bf16.msra.mxu1 %v1504_v28  ;;  %v176_v19 = vld [vmem:[%s1893_s2] sm:$0xff]  ;;  %v177_v20 = vld [vmem:[%s1893_s2 + $0x8] sm:$0xff]  ;;  %v1597_v27 = vld [vmem:[%s1709_s19 + $0xfc] ss:$24 sps:$4 sm:$0xff]  }
  0x2c   : > { %869 = vmatprep.subr.bf16.mxu1 %v1508_v30  ;;  %1032 = vmatpush1.bf16.msra.mxu0 %v1511_v31  ;;  %v1594_v22 = vld [vmem:[%s1709_s19 + $0x2e4] ss:$24 sps:$4 sm:$0xff]   ;;  %v1592_v24 = vld [vmem:[%s1709_s19 + $0x2e0] ss:$24 sps:$4 sm:$0xff]   ;;  %v1603_v26 = vld [vmem:[%s1709_s19 + $0x314] ss:$24 sps:$4 sm:$0xff]  }
  0x2d   : > { %1033 = vmatprep.subr.bf16.mxu0 %v1519_v33  ;;  %288 = vperm.xlu0 %1467, %v176_v19   ;;  %v1591_v23 = vld [vmem:[%s1709_s19 + $0xcc] ss:$24 sps:$4 sm:$0xff]   ;;  %v1589_v25 = vld [vmem:[%s1709_s19 + $0xc8] ss:$24 sps:$4 sm:$0xff]   ;;  %v1595_v29 = vld [vmem:[%s1709_s19 + $0xf8] ss:$24 sps:$4 sm:$0xff]  }
  0x2e   : > { %v1601_v28 = vld [vmem:[%s1709_s19 + $0x310] ss:$24 sps:$4 sm:$0xff]   ;;  %v1609_v30 = vld [vmem:[%s1709_s19 + $0x344] ss:$24 sps:$4 sm:$0xff]  }
  0x2f   : > { %870 = vmatpush1.bf16.msra.mxu1 %v1510_v32  ;;  %v1600_v31 = vld [vmem:[%s1709_s19 + $0x12c] ss:$24 sps:$4 sm:$0xff]   ;;  %v1607_v32 = vld [vmem:[%s1709_s19 + $0x340] ss:$24 sps:$4 sm:$0xff]  }
  0x30   : > { %871 = vmatprep.subr.bf16.mxu1 %v1514_v34  ;;  %1034 = vmatpush1.bf16.msra.mxu0 %v1517_v35  ;;  %v1598_v33 = vld [vmem:[%s1709_s19 + $0x128] ss:$24 sps:$4 sm:$0xff]   ;;  %v1606_v34 = vld [vmem:[%s1709_s19 + $0x15c] ss:$24 sps:$4 sm:$0xff]   ;;  %v1604_v35 = vld [vmem:[%s1709_s19 + $0x158] ss:$24 sps:$4 sm:$0xff]  }
  0x31   : > { %1035 = vmatprep.subr.bf16.mxu0 %v1525_v37  ;;  %293 = vperm.xlu0 %1467, %v177_v20   ;;  %v1610_v37 = vld [vmem:[%s1709_s19 + $0x188] ss:$24 sps:$4 sm:$0xff]  }
  0x33   : > { %872 = vmatpush1.bf16.msra.mxu1 %v1516_v36  ;;  %v1612_v36 = vld [vmem:[%s1709_s19 + $0x18c] ss:$24 sps:$4 sm:$0xff]  }
  0x34   : > { %873 = vmatprep.subr.bf16.mxu1 %v1520_v38  ;;  %1036 = vmatpush1.bf16.msra.mxu0 %v1523_v39  ;;  %v1613_v38 = vld [vmem:[%s1709_s19 + $0x1b8] ss:$24 sps:$4 sm:$0xff]   ;;  %v1618_v39 = vld [vmem:[%s1709_s19 + $0x1ec] ss:$24 sps:$4 sm:$0xff]  }
  0x35   : > { %1037 = vmatprep.subr.bf16.mxu0 %v1531_v41  ;;  %v1621_v41 = vld [vmem:[%s1709_s19 + $0x21c] ss:$24 sps:$4 sm:$0xff]  }
  0x37   : > { %874 = vmatpush1.bf16.msra.mxu1 %v1522_v40  ;;  %v1616_v40 = vld [vmem:[%s1709_s19 + $0x1e8] ss:$24 sps:$4 sm:$0xff]  }
  0x38   : > { %875 = vmatprep.subr.bf16.mxu1 %v1526_v42  ;;  %1038 = vmatpush1.bf16.msra.mxu0 %v1529_v43  ;;  %v1619_v42 = vld [vmem:[%s1709_s19 + $0x218] ss:$24 sps:$4 sm:$0xff]   ;;  %v1624_v43 = vld [vmem:[%s1709_s19 + $0x24c] ss:$24 sps:$4 sm:$0xff]  }
  0x39   : > { %1039 = vmatprep.subr.bf16.mxu0 %v1537_v45  ;;  %v1625_v45 = vld [vmem:[%s1709_s19 + $0x278] ss:$24 sps:$4 sm:$0xff]  }
  0x3b   : > { %876 = vmatpush1.bf16.msra.mxu1 %v1528_v44  ;;  %v1627_v44 = vld [vmem:[%s1709_s19 + $0x27c] ss:$24 sps:$4 sm:$0xff]  }
  0x3c   : > { %877 = vmatprep.subr.bf16.mxu1 %v1532_v46  ;;  %1040 = vmatpush1.bf16.msra.mxu0 %v1535_v47  ;;  %v1630_v46 = vld [vmem:[%s1709_s19 + $0x2ac] ss:$24 sps:$4 sm:$0xff]   ;;  %v1628_v47 = vld [vmem:[%s1709_s19 + $0x2a8] ss:$24 sps:$4 sm:$0xff]  }
  0x3d   : > { %1041 = vmatprep.subr.bf16.mxu0 %v1543_v49  ;;  %v1631_v49 = vld [vmem:[%s1709_s19 + $0x2d8] ss:$24 sps:$4 sm:$0xff]  }
  0x3f   : > { %878 = vmatpush1.bf16.msra.mxu1 %v1534_v48  ;;  %v1633_v48 = vld [vmem:[%s1709_s19 + $0x2dc] ss:$24 sps:$4 sm:$0xff]  }
  0x40   : > { %879 = vmatprep.subr.bf16.mxu1 %v1538_v50  ;;  %1042 = vmatpush1.bf16.msra.mxu0 %v1541_v51 }
  0x41   : > { %1043 = vmatprep.subr.bf16.mxu0 %v1549_v53 }
  0x43   : > { %880 = vmatpush1.bf16.msra.mxu1 %v1540_v52 }
  0x44   : > { %881 = vmatprep.subr.bf16.mxu1 %v1544_v54  ;;  %1044 = vmatpush1.bf16.msra.mxu0 %v1547_v55 }
  0x45   : > { %1045 = vmatprep.subr.bf16.mxu0 %v1555_v57 }
  0x47   : > { %882 = vmatpush1.bf16.msra.mxu1 %v1546_v56 }
  0x48   : > { %883 = vmatprep.subr.bf16.mxu1 %v1550_v58  ;;  %1046 = vmatpush1.bf16.msra.mxu0 %v1553_v59 }
  0x49   : > { %1047 = vmatprep.subr.bf16.mxu0 %v1561_v61 }
  0x4b   : > { %884 = vmatpush1.bf16.msra.mxu1 %v1552_v60 }
  0x4c   : > { %885 = vmatprep.subr.bf16.mxu1 %v1556_v62  ;;  %1048 = vmatpush1.bf16.msra.mxu0 %v1559_v63 }
  0x4d   : > { %1049 = vmatprep.subr.bf16.mxu0 %v1570_v3 }
  0x4f   : > { %886 = vmatpush1.bf16.msra.mxu1 %v1558_v2 }
  0x50   : > { %941 = vmatprep.subr.bf16.mxu1 %v1567_v4  ;;  %1050 = vmatpush1.bf16.msra.mxu0 %v1568_v6 }
  0x51   : > { %1051 = vmatprep.subr.bf16.mxu0 %v1576_v8 }
  0x52   : > { %888 = vmatmul.mubr.bf16.vlgmr.msra.gmra.mrb[0].mxu1 %v1789_v5 }
  0x53   : > { %942 = vmatpush1.bf16.msra.mxu1 %v1565_v7  ;;  %973 = vmatprep.mubr.bf16.mxu1 %v1702_v1  ;;  %v1586_v1 = vld [vmem:[%s1709_s19 + $0x2b0] ss:$24 sps:$4 sm:$0xff]  }
  0x54   : > { %943 = vmatprep.subr.bf16.mxu1 %v1573_v9  ;;  %1052 = vmatpush1.bf16.msra.mxu0 %v1574_v10 }
  0x55   : > { %1053 = vmatprep.subr.bf16.mxu0 %v1582_v13 }
  0x57   : > { %944 = vmatpush1.bf16.msra.mxu1 %v1571_v11 }
  0x58   : > { %945 = vmatprep.subr.bf16.mxu1 %v1579_v14  ;;  %1054 = vmatpush1.bf16.msra.mxu0 %v1580_v15 }
  0x59   : > { %1055 = vmatprep.subr.bf16.mxu0 %v1588_v17 }
  0x5b   : > { %946 = vmatpush1.bf16.msra.mxu1 %v1577_v16 }
  0x5c   : > { %947 = vmatprep.subr.bf16.mxu1 %v1585_v18  ;;  %1056 = vmatpush1.bf16.msra.mxu0 %v1586_v1 }
  0x5d   : > { %1057 = vmatprep.subr.bf16.mxu0 %v1594_v22 }
  0x5f   : > { %948 = vmatpush1.bf16.msra.mxu1 %v1583_v21 }
  0x60   : > { %949 = vmatprep.subr.bf16.mxu1 %v1591_v23  ;;  %1058 = vmatpush1.bf16.msra.mxu0 %v1592_v24 }
  0x61   : > { %1070 = vmatprep.subr.bf16.mxu0 %v1603_v26 }
  0x63   : > { %950 = vmatpush1.bf16.msra.mxu1 %v1589_v25  ;;  %1060 = vmatmul.mubr.bf16.vlgmr.msra.gmra.mrb[8].mxu0 %v1789_v5 }
  0x64   : > { %951 = vmatprep.subr.bf16.mxu1 %v1597_v27  ;;  %1071 = vmatpush1.bf16.msra.mxu0 %v1601_v28 }
  0x65   : > { %1102 = vmatprep.mubr.bf16.mxu0 %v1666_v0  ;;  %1072 = vmatprep.subr.bf16.mxu0 %v1609_v30  ;;  %v1615_v0 = vld [vmem:[%s1709_s19 + $0x1bc] ss:$24 sps:$4 sm:$0xff]  }
  0x67   : > { %952 = vmatpush1.bf16.msra.mxu1 %v1595_v29 }
  0x68   : > { %953 = vmatprep.subr.bf16.mxu1 %v1600_v31  ;;  %1073 = vmatpush1.bf16.msra.mxu0 %v1607_v32 }
  0x6b   : > { %954 = vmatpush1.bf16.msra.mxu1 %v1598_v33 }
  0x6c   : > { %955 = vmatprep.subr.bf16.mxu1 %v1606_v34 }
  0x6f   : > { %956 = vmatpush1.bf16.msra.mxu1 %v1604_v35  ;;  %1405 = vmatmul.mubr.msk.bf16.vlgmr.msra.gmra.mrb[8].mxu0 %vm851_vm0, %v1724_v12  ;;  %v1622_v12 = vld [vmem:[%s1709_s19 + $0x248] ss:$24 sps:$4 sm:$0xff]  }
  0x70   : > { %957 = vmatprep.subr.bf16.mxu1 %v1612_v36 }
  0x73   : > { %958 = vmatpush1.bf16.msra.mxu1 %v1610_v37 }
  0x74   : > { %959 = vmatprep.subr.bf16.mxu1 %v1615_v0 }
  0x77   : > { %960 = vmatpush1.bf16.msra.mxu1 %v1613_v38 }
  0x78   : > { %961 = vmatprep.subr.bf16.mxu1 %v1618_v39 }
  0x7b   : > { %962 = vmatpush1.bf16.msra.mxu1 %v1616_v40 }
  0x7c   : > { %963 = vmatprep.subr.bf16.mxu1 %v1621_v41 }
  0x7f   : > { %964 = vmatpush1.bf16.msra.mxu1 %v1619_v42 }
  0x80   : > { %965 = vmatprep.subr.bf16.mxu1 %v1624_v43 }
  0x83   : > { %966 = vmatpush1.bf16.msra.mxu1 %v1622_v12 }
  0x84   : > { %967 = vmatprep.subr.bf16.mxu1 %v1627_v44 }
  0x87   : > { %968 = vmatpush1.bf16.msra.mxu1 %v1625_v45 }
  0x88   : > { %969 = vmatprep.subr.bf16.mxu1 %v1630_v46 }
  0x8b   : > { %970 = vmatpush1.bf16.msra.mxu1 %v1628_v47 }
  0x8c   : > { %971 = vmatprep.subr.bf16.mxu1 %v1633_v48 }
  0x8f   : > { %972 = vmatpush1.bf16.msra.mxu1 %v1631_v49 }
  0x92   : > { %974 = vmatmul.mubr.bf16.vlgmr.msra.gmra.mrb[4].mxu1 %v1789_v5 }
  0xac   : > { %v1856_v58 = vpop.permute.xlu0 %288 }
  0xb0   : > { %v1858_v60 = vpop.permute.xlu0 %293 }
  0xee   : > { %v932_v50 = vpop.f32.mrb[0].mxu0 }
  0xef   : > { %v934_v51 = vpop.f32.mrb[1].mxu0 }
  0xf0   : > { %v936_v52 = vpop.f32.mrb[2].mxu0 }
  0xf1   : > { %v938_v53 = vpop.f32.mrb[3].mxu0 }
  0xf6   : > { %v1848_v54 = vpop.f32.mrb[4].mxu0 }
  0xf7   : > { %v1850_v55 = vpop.f32.mrb[5].mxu0 }
  0xf8   : > { %v1852_v56 = vpop.f32.mrb[6].mxu0 }
  0xf9   : > { %v1854_v57 = vpop.f32.mrb[7].mxu0 }
 0x125   : > { %v889_v59 = vpop.f32.mrb[0].mxu1 }
 0x126   : > { %v890_v61 = vadd.f32 %v889_v59, %v1856_v58  ;;  %v891_v62 = vpop.f32.mrb[1].mxu1 }
 0x127   : > { %v892_v63 = vadd.f32 %v891_v62, %v1856_v58  ;;  %v893_v2 = vpop.f32.mrb[2].mxu1 }
 0x128   : > { %v933_v3 = vadd.f32 %v932_v50, %v890_v61  ;;  %v894_v4 = vadd.f32 %v893_v2, %v1858_v60  ;;  %v895_v5 = vpop.f32.mrb[3].mxu1 }
 0x129   : > { %v935_v6 = vadd.f32 %v934_v51, %v892_v63  ;;  %v896_v7 = vadd.f32 %v895_v5, %v1858_v60 }
 0x12a   : > { %v1125_v8 = vmin.f32 %v933_v3, 0.0  ;;  %v937_v9 = vadd.f32 %v936_v52, %v894_v4  ;;  %vm1113_vm1 = vcmp.gt.f32.partialorder %v933_v3, 0.0 }
 0x12b   : > { %v1126_v10 = vmin.f32 %v935_v6, 0.0  ;;  %v939_v11 = vadd.f32 %v938_v53, %v896_v7  ;;  %vm1114_vm2 = vcmp.gt.f32.partialorder %v935_v6, 0.0 }
 0x12c   : > { %v1137_v13 = vmul.f32 1.442695, %v1125_v8  ;;  %v1131_v14 = vmin.f32 %v937_v9, 0.0  ;;  %vm1119_vm3 = vcmp.gt.f32.partialorder %v937_v9, 0.0 }
 0x12d   : > { %v1139_v15 = vmul.f32 1.442695, %v1126_v10  ;;  %v1132_v16 = vmin.f32 %v939_v11, 0.0  ;;  %vm1120_vm4 = vcmp.gt.f32.partialorder %v939_v11, 0.0 }
 0x12e   : > { %1634 = vpow2.f32 %v1137_v13  ;;  %v1149_v17 = vmul.f32 1.442695, %v1131_v14 }
 0x12f   : > { %1636 = vpow2.f32 %v1139_v15  ;;  %v1151_v18 = vmul.f32 1.442695, %v1132_v16 }
 0x130   : > { %1638 = vpow2.f32 %v1149_v17 }
 0x131   : > { %1640 = vpow2.f32 %v1151_v18 }
 0x138   : > { %v1635_v19 = vpop.eup %1634 }
 0x139   : > { %v1637_v1 = vpop.eup %1636  ;;  %v1406_v20 = vadd.f32 -1.0, %v1635_v19 }
 0x13a   : > { %v1639_v21 = vpop.eup %1638  ;;  %v1407_v22 = vadd.f32 -1.0, %v1637_v1 }
 0x13b   : > { %v1641_v23 = vpop.eup %1640  ;;  %v1173_v24 = vsel %vm1113_vm1, %v933_v3, %v1406_v20  ;;  %v1412_v25 = vadd.f32 -1.0, %v1639_v21 }
 0x13c   : > { %v1174_v26 = vsel %vm1114_vm2, %v935_v6, %v1407_v22  ;;  %v1413_v27 = vadd.f32 -1.0, %v1641_v23 }
 0x13d   : > { %v1426_v28 = vpack.c.bf16 %v1174_v26, %v1173_v24  ;;  %v1179_v29 = vsel %vm1119_vm3, %v937_v9, %v1412_v25 }
 0x13e   : > { %v1180_v30 = vsel %vm1120_vm4, %v939_v11, %v1413_v27 }
 0x13f   : > { %1221 = vst [vmem:[%s1868_s4] sm:$0xff] %v1426_v28  ;;  %v1429_v31 = vpack.c.bf16 %v1180_v30, %v1179_v29 }
 0x141   : > { %1227 = vst [vmem:[%s1868_s4 + $0x18] sm:$0xff] %v1429_v31 }
 0x142   : > { %v1104_v32 = vpop.f32.mrb[8].mxu0 }
 0x143   : > { %v1448_v33 = vadd.f32 %v1104_v32, %v1856_v58  ;;  %v1106_v34 = vpop.f32.mrb[9].mxu0 }
 0x144   : > { %v1449_v35 = vadd.f32 %v1106_v34, %v1856_v58  ;;  %v1108_v36 = vpop.f32.mrb[10].mxu0 }
 0x145   : > { %v1129_v37 = vmin.f32 %v1448_v33, 0.0  ;;  %v1450_v0 = vadd.f32 %v1108_v36, %v1858_v60  ;;  %v1110_v38 = vpop.f32.mrb[11].mxu0  ;;  %vm1117_vm5 = vcmp.gt.f32.partialorder %v1448_v33, 0.0 }
 0x146   : > { %v1130_v39 = vmin.f32 %v1449_v35, 0.0  ;;  %v1451_v40 = vadd.f32 %v1110_v38, %v1858_v60  ;;  %vm1118_vm6 = vcmp.gt.f32.partialorder %v1449_v35, 0.0 }
 0x147   : > { %v1145_v41 = vmul.f32 1.442695, %v1129_v37  ;;  %v1135_v42 = vmin.f32 %v1450_v0, 0.0  ;;  %vm1123_vm9 = vcmp.gt.f32.partialorder %v1450_v0, 0.0 }
 0x148   : > { %v1147_v43 = vmul.f32 1.442695, %v1130_v39  ;;  %v1136_v12 = vmin.f32 %v1451_v40, 0.0  ;;  %vm1124_vm10 = vcmp.gt.f32.partialorder %v1451_v40, 0.0 }
 0x149   : > { %1642 = vpow2.f32 %v1145_v41  ;;  %v1157_v44 = vmul.f32 1.442695, %v1135_v42 }
 0x14a   : > { %1644 = vpow2.f32 %v1147_v43  ;;  %v1159_v45 = vmul.f32 1.442695, %v1136_v12 }
 0x14b   : > { %1646 = vpow2.f32 %v1157_v44 }
 0x14c   : > { %1648 = vpow2.f32 %v1159_v45 }
 0x153   : > { %v1643_v46 = vpop.eup %1642 }
 0x154   : > { %v1645_v47 = vpop.eup %1644  ;;  %v1410_v48 = vadd.f32 -1.0, %v1643_v46 }
 0x155   : > { %v1647_v49 = vpop.eup %1646  ;;  %v1411_v50 = vadd.f32 -1.0, %v1645_v47 }
 0x156   : > { %v1649_v51 = vpop.eup %1648  ;;  %v1177_v52 = vsel %vm1117_vm5, %v1448_v33, %v1410_v48  ;;  %v1416_v53 = vadd.f32 -1.0, %v1647_v49 }
 0x157   : > { %v1178_v59 = vsel %vm1118_vm6, %v1449_v35, %v1411_v50  ;;  %v1417_v61 = vadd.f32 -1.0, %v1649_v51 }
 0x158   : > { %v1428_v62 = vpack.c.bf16 %v1178_v59, %v1177_v52  ;;  %v1183_v63 = vsel %vm1123_vm9, %v1450_v0, %v1416_v53 }
 0x159   : > { %v1184_v2 = vsel %vm1124_vm10, %v1451_v40, %v1417_v61 }
 0x15a   : > { %1226 = vst.msk [vmem:[%s1868_s4 + $0x10] sm:$0xff] %vm1225_vm11, %v1428_v62  ;;  %v1431_v3 = vpack.c.bf16 %v1184_v2, %v1183_v63 }
 0x15c   : > { %1229 = vst.msk [vmem:[%s1868_s4 + $0x28] sm:$0xff] %vm1225_vm11, %v1431_v3 }
 0x165   : > { %v975_v4 = vpop.f32.mrb[4].mxu1 }
 0x166   : > { %v976_v5 = vadd.f32 %v975_v4, %v1856_v58  ;;  %v977_v6 = vpop.f32.mrb[5].mxu1 }
 0x167   : > { %v978_v7 = vadd.f32 %v977_v6, %v1856_v58  ;;  %v979_v8 = vpop.f32.mrb[6].mxu1 }
 0x168   : > { %v1019_v9 = vadd.f32 %v1848_v54, %v976_v5  ;;  %v980_v10 = vadd.f32 %v979_v8, %v1858_v60  ;;  %v981_v11 = vpop.f32.mrb[7].mxu1 }
 0x169   : > { %v1021_v13 = vadd.f32 %v1850_v55, %v978_v7  ;;  %v982_v14 = vadd.f32 %v981_v11, %v1858_v60 }
 0x16a   : > { %v1127_v15 = vmin.f32 %v1019_v9, 0.0  ;;  %v1023_v16 = vadd.f32 %v1852_v56, %v980_v10  ;;  %vm1115_vm12 = vcmp.gt.f32.partialorder %v1019_v9, 0.0 }
 0x16b   : > { %v1128_v17 = vmin.f32 %v1021_v13, 0.0  ;;  %v1025_v18 = vadd.f32 %v1854_v57, %v982_v14  ;;  %vm1116_vm13 = vcmp.gt.f32.partialorder %v1021_v13, 0.0 }
 0x16c   : > { %v1141_v19 = vmul.f32 1.442695, %v1127_v15  ;;  %v1133_v1 = vmin.f32 %v1023_v16, 0.0  ;;  %vm1121_vm14 = vcmp.gt.f32.partialorder %v1023_v16, 0.0 }
 0x16d   : > { %v1143_v20 = vmul.f32 1.442695, %v1128_v17  ;;  %v1134_v58 = vmin.f32 %v1025_v18, 0.0  ;;  %vm1122_vm15 = vcmp.gt.f32.partialorder %v1025_v18, 0.0 }
 0x16e   : > { %1650 = vpow2.f32 %v1141_v19  ;;  %v1153_v21 = vmul.f32 1.442695, %v1133_v1 }
 0x16f   : > { %1652 = vpow2.f32 %v1143_v20  ;;  %v1155_v54 = vmul.f32 1.442695, %v1134_v58 }
 0x170   : > { %1654 = vpow2.f32 %v1153_v21 }
 0x171   : > { %1656 = vpow2.f32 %v1155_v54 }
 0x178   : > { %v1651_v22 = vpop.eup %1650 }
 0x179   : > { %v1653_v55 = vpop.eup %1652  ;;  %v1408_v60 = vadd.f32 -1.0, %v1651_v22 }
 0x17a   : > { %v1655_v23 = vpop.eup %1654  ;;  %v1409_v56 = vadd.f32 -1.0, %v1653_v55 }
 0x17b   : > { %v1657_v24 = vpop.eup %1656  ;;  %v1175_v57 = vsel %vm1115_vm12, %v1019_v9, %v1408_v60  ;;  %v1414_v25 = vadd.f32 -1.0, %v1655_v23 }
 0x17c   : > { %v1176_v26 = vsel %vm1116_vm13, %v1021_v13, %v1409_v56  ;;  %v1415_v27 = vadd.f32 -1.0, %v1657_v24 }
 0x17d   : > { %v1427_v28 = vpack.c.bf16 %v1176_v26, %v1175_v57  ;;  %v1181_v29 = vsel %vm1121_vm14, %v1023_v16, %v1414_v25 }
 0x17e   : > { %v1182_v30 = vsel %vm1122_vm15, %v1025_v18, %v1415_v27 }
 0x17f   : > { %1222 = vst [vmem:[%s1868_s4 + $0x8] sm:$0xff] %v1427_v28  ;;  %v1430_v31 = vpack.c.bf16 %v1182_v30, %v1181_v29 }
 0x181   : > { %1228 = vst [vmem:[%s1868_s4 + $0x20] sm:$0xff] %v1430_v31 }
 0x182 PF: > { %s13_s12 = sadd.s32 1, %s1664_s12  }
 0x183   : > { %p10_p4 = scmp.ge.s32.totalorder %s13_s12, 4  }
 0x185   :  { %12 = sbr.rel (!%p10_p4) target bundleno = 1 (0x1), region = 62 }

// kernel: vae_forward.11
= control target key start
LH: loop header
LB: loop body
LE: loop exit
PB: predicated region body
PF: predicated region fallthrough
CT: control target
= control target key end

     0   :  { %v1464_v20 = vmov 1966171168   ;;  %v157_v22 = vlaneseq  ;;  %vm763_vm0 = vcmask 130048   ;;  %s1891_s0 = inlined_call_operand.vmem [shape: bf16[144,1568], index: 0, kind: input, shape index: {}]   ;;  %s1892_s1 = inlined_call_operand.vmem [shape: bf16[1,144], index: 1, kind: input, shape index: {}]   ;;  %s1893_s2 = inlined_call_operand.<no memory space> [shape: f32[1,1], index: 2, kind: input, shape index: {}]   ;;  %s1894_s3 = inlined_call_operand.vmem [shape: f32[1,1568], index: 3, kind: output, shape index: {}]  }
   0x1   :  { %v1293_v0 = vld [vmem:[%s1891_s0 + $0x4] ss:$52 sps:$4 sm:$0xff]   ;;  %v1295_v1 = vld [vmem:[%s1891_s0 + $0xc] ss:$52 sps:$4 sm:$0xff]   ;;  %v1298_v3 = vld [vmem:[%s1891_s0 + $0x8] ss:$52 sps:$4 sm:$0xff]   ;;  %v155_v21 = vunpack.c.l.s4 %v1464_v20 }
   0x2   :  { %767 = vmatprep.subr.bf16.mxu0 %v1293_v0  ;;  %v1297_v2 = vld [vmem:[%s1891_s0] ss:$52 sps:$4 sm:$0xff]   ;;  %808 = vmatprep.subr.bf16.mxu1 %v1295_v1  ;;  %v1303_v6 = vld [vmem:[%s1891_s0 + $0x68] ss:$52 sps:$4 sm:$0xff]   ;;  %v1304_v7 = vld [vmem:[%s1891_s0 + $0x70] ss:$52 sps:$4 sm:$0xff]  }
   0x3   :  { %v1299_v4 = vld [vmem:[%s1891_s0 + $0x6c] ss:$52 sps:$4 sm:$0xff]   ;;  %768 = vmatpush1.bf16.msra.mxu0 %v1297_v2  ;;  %809 = vmatpush1.bf16.msra.mxu1 %v1298_v3  ;;  %v1301_v5 = vld [vmem:[%s1891_s0 + $0x74] ss:$52 sps:$4 sm:$0xff]   ;;  %v1307_v9 = vld [vmem:[%s1891_s0 + $0xdc] ss:$52 sps:$4 sm:$0xff]   ;;  %v156_v26 = vunpack.c.0.s8 %v155_v21 }
   0x4   :  { %769 = vmatprep.subr.bf16.mxu0 %v1299_v4  ;;  %810 = vmatprep.subr.bf16.mxu1 %v1301_v5  ;;  %v1305_v8 = vld [vmem:[%s1891_s0 + $0xd4] ss:$52 sps:$4 sm:$0xff]   ;;  %v1309_v10 = vld [vmem:[%s1891_s0 + $0xd0] ss:$52 sps:$4 sm:$0xff]   ;;  %v1310_v11 = vld [vmem:[%s1891_s0 + $0xd8] ss:$52 sps:$4 sm:$0xff]  }
   0x5   :  { %v1311_v12 = vld [vmem:[%s1891_s0 + $0x13c] ss:$52 sps:$4 sm:$0xff]   ;;  %v1313_v13 = vld [vmem:[%s1891_s0 + $0x144] ss:$52 sps:$4 sm:$0xff]   ;;  %v1316_v15 = vld [vmem:[%s1891_s0 + $0x140] ss:$52 sps:$4 sm:$0xff]  }
   0x6   :  { %v1315_v14 = vld [vmem:[%s1891_s0 + $0x138] ss:$52 sps:$4 sm:$0xff]   ;;  %v1321_v18 = vld [vmem:[%s1891_s0 + $0x1a0] ss:$52 sps:$4 sm:$0xff]   ;;  %v1322_v19 = vld [vmem:[%s1891_s0 + $0x1a8] ss:$52 sps:$4 sm:$0xff]  }
   0x7   :  { %770 = vmatpush1.bf16.msra.mxu0 %v1303_v6  ;;  %811 = vmatpush1.bf16.msra.mxu1 %v1304_v7  ;;  %v1317_v16 = vld [vmem:[%s1891_s0 + $0x1a4] ss:$52 sps:$4 sm:$0xff]   ;;  %v1319_v17 = vld [vmem:[%s1891_s0 + $0x1ac] ss:$52 sps:$4 sm:$0xff]   ;;  %v1325_v24 = vld [vmem:[%s1891_s0 + $0x214] ss:$52 sps:$4 sm:$0xff]  }
   0x8   :  { %771 = vmatprep.subr.bf16.mxu0 %v1305_v8  ;;  %812 = vmatprep.subr.bf16.mxu1 %v1307_v9  ;;  %v1323_v23 = vld [vmem:[%s1891_s0 + $0x20c] ss:$52 sps:$4 sm:$0xff]   ;;  %v1327_v25 = vld [vmem:[%s1891_s0 + $0x208] ss:$52 sps:$4 sm:$0xff]   ;;  %v158_v27 = vshrl.u32 %v157_v22, 7  ;;  %vm1159_vm1 = vcmp.lt.s32.totalorder %v157_v22, 544 }
   0x9   :  { %v1328_v28 = vld [vmem:[%s1891_s0 + $0x210] ss:$52 sps:$4 sm:$0xff]   ;;  %v1329_v29 = vld [vmem:[%s1891_s0 + $0x274] ss:$52 sps:$4 sm:$0xff]   ;;  %v1334_v32 = vld [vmem:[%s1891_s0 + $0x278] ss:$52 sps:$4 sm:$0xff]  }
   0xa   :  { %v1331_v30 = vld [vmem:[%s1891_s0 + $0x27c] ss:$52 sps:$4 sm:$0xff]   ;;  %v1571_v33 = vsub.s32 %v156_v26, %v158_v27  ;;  %v1166_v34 = vld.sshfl [vmem:[%s1892_s1] sm:$0x11 pattern:$0x75316420] }
   0xb   :  { %772 = vmatpush1.bf16.msra.mxu0 %v1309_v10  ;;  %813 = vmatpush1.bf16.msra.mxu1 %v1310_v11  ;;  %v1333_v31 = vld [vmem:[%s1891_s0 + $0x270] ss:$52 sps:$4 sm:$0xff]   ;;  %v153_v37 = vcombine.high %v1166_v34, %v1166_v34  ;;  %v1339_v38 = vld [vmem:[%s1891_s0 + $0x2d8] ss:$52 sps:$4 sm:$0xff]   ;;  %v1340_v40 = vld [vmem:[%s1891_s0 + $0x2e0] ss:$52 sps:$4 sm:$0xff]  }
   0xc   :  { %773 = vmatprep.subr.bf16.mxu0 %v1311_v12  ;;  %814 = vmatprep.subr.bf16.mxu1 %v1313_v13  ;;  %v1335_v35 = vld [vmem:[%s1891_s0 + $0x2dc] ss:$52 sps:$4 sm:$0xff]   ;;  %v1337_v36 = vld [vmem:[%s1891_s0 + $0x2e4] ss:$52 sps:$4 sm:$0xff]   ;;  %v1343_v42 = vld [vmem:[%s1891_s0 + $0x34c] ss:$52 sps:$4 sm:$0xff]   ;;  %v1614_v47 = vrot.slane %v1166_v34, %v1571_v33 }
   0xd   :  { %v1586_v39 = vrot.slane %v153_v37, %v1571_v33  ;;  %v1341_v41 = vld [vmem:[%s1891_s0 + $0x344] ss:$52 sps:$4 sm:$0xff]   ;;  %v1345_v43 = vld [vmem:[%s1891_s0 + $0x340] ss:$52 sps:$4 sm:$0xff]   ;;  %v1346_v44 = vld [vmem:[%s1891_s0 + $0x348] ss:$52 sps:$4 sm:$0xff]  }
   0xe   :  { %v1349_v45 = vld [vmem:[%s1891_s0 + $0x14] ss:$52 sps:$4 sm:$0xff]   ;;  %v1352_v46 = vld [vmem:[%s1891_s0 + $0x1c] ss:$52 sps:$4 sm:$0xff]   ;;  %v1350_v49 = vld [vmem:[%s1891_s0 + $0x18] ss:$52 sps:$4 sm:$0xff]  }
   0xf   :  { %774 = vmatpush1.bf16.msra.mxu0 %v1315_v14  ;;  %815 = vmatpush1.bf16.msra.mxu1 %v1316_v15  ;;  %v1347_v48 = vld [vmem:[%s1891_s0 + $0x10] ss:$52 sps:$4 sm:$0xff]   ;;  %v1353_v52 = vld [vmem:[%s1891_s0 + $0x78] ss:$52 sps:$4 sm:$0xff]   ;;  %v1356_v53 = vld [vmem:[%s1891_s0 + $0x80] ss:$52 sps:$4 sm:$0xff]  }
  0x10   :  { %775 = vmatprep.subr.bf16.mxu0 %v1317_v16  ;;  %816 = vmatprep.subr.bf16.mxu1 %v1319_v17  ;;  %v1355_v50 = vld [vmem:[%s1891_s0 + $0x7c] ss:$52 sps:$4 sm:$0xff]   ;;  %v1358_v51 = vld [vmem:[%s1891_s0 + $0x84] ss:$52 sps:$4 sm:$0xff]   ;;  %v1364_v55 = vld [vmem:[%s1891_s0 + $0xec] ss:$52 sps:$4 sm:$0xff]  }
  0x11   :  { %1284 = vmatprep.mubr.msk.bf16.mxu0 %vm763_vm0, %v1586_v39  ;;  %1285 = vmatprep.mubr.msk.bf16.mxu1 %vm763_vm0, %v1586_v39  ;;  %v1361_v54 = vld [vmem:[%s1891_s0 + $0xe4] ss:$52 sps:$4 sm:$0xff]   ;;  %v1359_v56 = vld [vmem:[%s1891_s0 + $0xe0] ss:$52 sps:$4 sm:$0xff]   ;;  %v1362_v57 = vld [vmem:[%s1891_s0 + $0xe8] ss:$52 sps:$4 sm:$0xff]  }
  0x12   :  { %v1367_v58 = vld [vmem:[%s1891_s0 + $0x14c] ss:$52 sps:$4 sm:$0xff]   ;;  %v1370_v59 = vld [vmem:[%s1891_s0 + $0x154] ss:$52 sps:$4 sm:$0xff]   ;;  %v1368_v61 = vld [vmem:[%s1891_s0 + $0x150] ss:$52 sps:$4 sm:$0xff]  }
  0x13   :  { %776 = vmatpush1.bf16.msra.mxu0 %v1321_v18  ;;  %817 = vmatpush1.bf16.msra.mxu1 %v1322_v19  ;;  %v1365_v60 = vld [vmem:[%s1891_s0 + $0x148] ss:$52 sps:$4 sm:$0xff]   ;;  %v1371_v0 = vld [vmem:[%s1891_s0 + $0x1b0] ss:$52 sps:$4 sm:$0xff]   ;;  %v1374_v1 = vld [vmem:[%s1891_s0 + $0x1b8] ss:$52 sps:$4 sm:$0xff]  }
  0x14   :  { %777 = vmatprep.subr.bf16.mxu0 %v1323_v23  ;;  %818 = vmatprep.subr.bf16.mxu1 %v1325_v24  ;;  %v1373_v62 = vld [vmem:[%s1891_s0 + $0x1b4] ss:$52 sps:$4 sm:$0xff]   ;;  %v1376_v63 = vld [vmem:[%s1891_s0 + $0x1bc] ss:$52 sps:$4 sm:$0xff]   ;;  %v1382_v3 = vld [vmem:[%s1891_s0 + $0x224] ss:$52 sps:$4 sm:$0xff]  }
  0x15   :  { %v1379_v2 = vld [vmem:[%s1891_s0 + $0x21c] ss:$52 sps:$4 sm:$0xff]   ;;  %v1377_v4 = vld [vmem:[%s1891_s0 + $0x218] ss:$52 sps:$4 sm:$0xff]   ;;  %v1380_v5 = vld [vmem:[%s1891_s0 + $0x220] ss:$52 sps:$4 sm:$0xff]  }
  0x16   :  { %v1385_v6 = vld [vmem:[%s1891_s0 + $0x284] ss:$52 sps:$4 sm:$0xff]   ;;  %v1388_v7 = vld [vmem:[%s1891_s0 + $0x28c] ss:$52 sps:$4 sm:$0xff]   ;;  %v1386_v9 = vld [vmem:[%s1891_s0 + $0x288] ss:$52 sps:$4 sm:$0xff]  }
  0x17   :  { %778 = vmatpush1.bf16.msra.mxu0 %v1327_v25  ;;  %819 = vmatpush1.bf16.msra.mxu1 %v1328_v28  ;;  %v1383_v8 = vld [vmem:[%s1891_s0 + $0x280] ss:$52 sps:$4 sm:$0xff]   ;;  %v1389_v12 = vld [vmem:[%s1891_s0 + $0x2e8] ss:$52 sps:$4 sm:$0xff]   ;;  %v1392_v13 = vld [vmem:[%s1891_s0 + $0x2f0] ss:$52 sps:$4 sm:$0xff]  }
  0x18   :  { %779 = vmatprep.subr.bf16.mxu0 %v1329_v29  ;;  %820 = vmatprep.subr.bf16.mxu1 %v1331_v30  ;;  %v1391_v10 = vld [vmem:[%s1891_s0 + $0x2ec] ss:$52 sps:$4 sm:$0xff]   ;;  %v1394_v11 = vld [vmem:[%s1891_s0 + $0x2f4] ss:$52 sps:$4 sm:$0xff]   ;;  %v1400_v15 = vld [vmem:[%s1891_s0 + $0x35c] ss:$52 sps:$4 sm:$0xff]  }
  0x19   :  { %v1397_v14 = vld [vmem:[%s1891_s0 + $0x354] ss:$52 sps:$4 sm:$0xff]   ;;  %v1395_v16 = vld [vmem:[%s1891_s0 + $0x350] ss:$52 sps:$4 sm:$0xff]   ;;  %v1398_v17 = vld [vmem:[%s1891_s0 + $0x358] ss:$52 sps:$4 sm:$0xff]  }
  0x1a   :  { %v1403_v18 = vld [vmem:[%s1891_s0 + $0x24] ss:$52 sps:$4 sm:$0xff]   ;;  %v1406_v19 = vld [vmem:[%s1891_s0 + $0x2c] ss:$52 sps:$4 sm:$0xff]   ;;  %v1404_v21 = vld [vmem:[%s1891_s0 + $0x28] ss:$52 sps:$4 sm:$0xff]  }
  0x1b   :  { %780 = vmatpush1.bf16.msra.mxu0 %v1333_v31  ;;  %821 = vmatpush1.bf16.msra.mxu1 %v1334_v32  ;;  %v1401_v20 = vld [vmem:[%s1891_s0 + $0x20] ss:$52 sps:$4 sm:$0xff]   ;;  %v1407_v25 = vld [vmem:[%s1891_s0 + $0x88] ss:$52 sps:$4 sm:$0xff]   ;;  %v1410_v26 = vld [vmem:[%s1891_s0 + $0x90] ss:$52 sps:$4 sm:$0xff]  }
  0x1c   :  { %781 = vmatprep.subr.bf16.mxu0 %v1335_v35  ;;  %822 = vmatprep.subr.bf16.mxu1 %v1337_v36  ;;  %v1409_v23 = vld [vmem:[%s1891_s0 + $0x8c] ss:$52 sps:$4 sm:$0xff]   ;;  %v1412_v24 = vld [vmem:[%s1891_s0 + $0x94] ss:$52 sps:$4 sm:$0xff]   ;;  %v1418_v28 = vld [vmem:[%s1891_s0 + $0xfc] ss:$52 sps:$4 sm:$0xff]  }
  0x1d   :  { %v1415_v27 = vld [vmem:[%s1891_s0 + $0xf4] ss:$52 sps:$4 sm:$0xff]   ;;  %v1413_v29 = vld [vmem:[%s1891_s0 + $0xf0] ss:$52 sps:$4 sm:$0xff]   ;;  %v1416_v30 = vld [vmem:[%s1891_s0 + $0xf8] ss:$52 sps:$4 sm:$0xff]  }
  0x1e   :  { %v1421_v31 = vld [vmem:[%s1891_s0 + $0x15c] ss:$52 sps:$4 sm:$0xff]   ;;  %v1424_v32 = vld [vmem:[%s1891_s0 + $0x164] ss:$52 sps:$4 sm:$0xff]   ;;  %v1422_v35 = vld [vmem:[%s1891_s0 + $0x160] ss:$52 sps:$4 sm:$0xff]  }
  0x1f   :  { %782 = vmatpush1.bf16.msra.mxu0 %v1339_v38  ;;  %823 = vmatpush1.bf16.msra.mxu1 %v1340_v40  ;;  %v1419_v34 = vld [vmem:[%s1891_s0 + $0x158] ss:$52 sps:$4 sm:$0xff]   ;;  %v1425_v38 = vld [vmem:[%s1891_s0 + $0x1c0] ss:$52 sps:$4 sm:$0xff]   ;;  %v1428_v40 = vld [vmem:[%s1891_s0 + $0x1c8] ss:$52 sps:$4 sm:$0xff]  }
  0x20   :  { %783 = vmatprep.subr.bf16.mxu0 %v1341_v41  ;;  %824 = vmatprep.subr.bf16.mxu1 %v1343_v42  ;;  %v1427_v36 = vld [vmem:[%s1891_s0 + $0x1c4] ss:$52 sps:$4 sm:$0xff]   ;;  %v1430_v37 = vld [vmem:[%s1891_s0 + $0x1cc] ss:$52 sps:$4 sm:$0xff]   ;;  %v1436_v42 = vld [vmem:[%s1891_s0 + $0x234] ss:$52 sps:$4 sm:$0xff]  }
  0x21   :  { %v1433_v41 = vld [vmem:[%s1891_s0 + $0x22c] ss:$52 sps:$4 sm:$0xff]  }
  0x23   :  { %784 = vmatpush1.bf16.msra.mxu0 %v1345_v43  ;;  %825 = vmatpush1.bf16.msra.mxu1 %v1346_v44  ;;  %v1431_v43 = vld [vmem:[%s1891_s0 + $0x228] ss:$52 sps:$4 sm:$0xff]   ;;  %v1434_v44 = vld [vmem:[%s1891_s0 + $0x230] ss:$52 sps:$4 sm:$0xff]  }
  0x24   :  { %849 = vmatprep.subr.bf16.mxu0 %v1349_v45  ;;  %890 = vmatprep.subr.bf16.mxu1 %v1352_v46  ;;  %v1439_v45 = vld [vmem:[%s1891_s0 + $0x294] ss:$52 sps:$4 sm:$0xff]   ;;  %v1442_v46 = vld [vmem:[%s1891_s0 + $0x29c] ss:$52 sps:$4 sm:$0xff]  }
  0x26   :  { %800 = vmatmul.mubr.bf16.vlgmr.msra.gmra.mrb[0].mxu0 %v1614_v47  ;;  %841 = vmatmul.mubr.bf16.vlgmr.msra.gmra.mrb[0].mxu1 %v1614_v47 }
  0x27   :  { %850 = vmatpush1.bf16.msra.mxu0 %v1347_v48  ;;  %891 = vmatpush1.bf16.msra.mxu1 %v1350_v49  ;;  %v1437_v48 = vld [vmem:[%s1891_s0 + $0x290] ss:$52 sps:$4 sm:$0xff]   ;;  %v1440_v49 = vld [vmem:[%s1891_s0 + $0x298] ss:$52 sps:$4 sm:$0xff]  }
  0x28   :  { %851 = vmatprep.subr.bf16.mxu0 %v1355_v50  ;;  %892 = vmatprep.subr.bf16.mxu1 %v1358_v51  ;;  %v1445_v50 = vld [vmem:[%s1891_s0 + $0x2fc] ss:$52 sps:$4 sm:$0xff]   ;;  %v1448_v51 = vld [vmem:[%s1891_s0 + $0x304] ss:$52 sps:$4 sm:$0xff]  }
  0x29   :  { %1286 = vmatprep.mubr.msk.bf16.mxu0 %vm763_vm0, %v1586_v39  ;;  %1287 = vmatprep.mubr.msk.bf16.mxu1 %vm763_vm0, %v1586_v39 }
  0x2b   :  { %852 = vmatpush1.bf16.msra.mxu0 %v1353_v52  ;;  %893 = vmatpush1.bf16.msra.mxu1 %v1356_v53  ;;  %v1443_v52 = vld [vmem:[%s1891_s0 + $0x2f8] ss:$52 sps:$4 sm:$0xff]   ;;  %v1446_v53 = vld [vmem:[%s1891_s0 + $0x300] ss:$52 sps:$4 sm:$0xff]  }
  0x2c   :  { %853 = vmatprep.subr.bf16.mxu0 %v1361_v54  ;;  %894 = vmatprep.subr.bf16.mxu1 %v1364_v55  ;;  %v1451_v54 = vld [vmem:[%s1891_s0 + $0x364] ss:$52 sps:$4 sm:$0xff]   ;;  %v1454_v55 = vld [vmem:[%s1891_s0 + $0x36c] ss:$52 sps:$4 sm:$0xff]  }
  0x2f   :  { %854 = vmatpush1.bf16.msra.mxu0 %v1359_v56  ;;  %895 = vmatpush1.bf16.msra.mxu1 %v1362_v57  ;;  %v1449_v56 = vld [vmem:[%s1891_s0 + $0x360] ss:$52 sps:$4 sm:$0xff]   ;;  %v1452_v57 = vld [vmem:[%s1891_s0 + $0x368] ss:$52 sps:$4 sm:$0xff]  }
  0x30   :  { %855 = vmatprep.subr.bf16.mxu0 %v1367_v58  ;;  %896 = vmatprep.subr.bf16.mxu1 %v1370_v59  ;;  %v1455_v58 = vld [vmem:[%s1891_s0 + $0x30] ss:$52 sps:$4 sm:$0xff]   ;;  %v1465_v59 = vmov 0  }
  0x33   :  { %856 = vmatpush1.bf16.msra.mxu0 %v1365_v60  ;;  %897 = vmatpush1.bf16.msra.mxu1 %v1368_v61  ;;  %v1456_v60 = vld [vmem:[%s1891_s0 + $0x98] ss:$52 sps:$4 sm:$0xff]   ;;  %v1457_v61 = vld [vmem:[%s1891_s0 + $0x100] ss:$52 sps:$4 sm:$0xff]  }
  0x34   :  { %857 = vmatprep.subr.bf16.mxu0 %v1373_v62  ;;  %898 = vmatprep.subr.bf16.mxu1 %v1376_v63  ;;  %v1458_v62 = vld [vmem:[%s1891_s0 + $0x168] ss:$52 sps:$4 sm:$0xff]   ;;  %v1459_v63 = vld [vmem:[%s1891_s0 + $0x1d0] ss:$52 sps:$4 sm:$0xff]  }
  0x37   :  { %858 = vmatpush1.bf16.msra.mxu0 %v1371_v0  ;;  %899 = vmatpush1.bf16.msra.mxu1 %v1374_v1  ;;  %v1461_v0 = vld [vmem:[%s1891_s0 + $0x2a0] ss:$52 sps:$4 sm:$0xff]   ;;  %v1462_v1 = vld [vmem:[%s1891_s0 + $0x308] ss:$52 sps:$4 sm:$0xff]  }
  0x38   :  { %859 = vmatprep.subr.bf16.mxu0 %v1379_v2  ;;  %900 = vmatprep.subr.bf16.mxu1 %v1382_v3  ;;  %v1463_v2 = vld [vmem:[%s1891_s0 + $0x370] ss:$52 sps:$4 sm:$0xff]   ;;  %v144_v3 = vstv %s1893_s2 }
  0x3b   :  { %860 = vmatpush1.bf16.msra.mxu0 %v1377_v4  ;;  %901 = vmatpush1.bf16.msra.mxu1 %v1380_v5 }
  0x3c   :  { %861 = vmatprep.subr.bf16.mxu0 %v1385_v6  ;;  %902 = vmatprep.subr.bf16.mxu1 %v1388_v7 }
  0x3f   :  { %862 = vmatpush1.bf16.msra.mxu0 %v1383_v8  ;;  %903 = vmatpush1.bf16.msra.mxu1 %v1386_v9 }
  0x40   :  { %863 = vmatprep.subr.bf16.mxu0 %v1391_v10  ;;  %904 = vmatprep.subr.bf16.mxu1 %v1394_v11 }
  0x43   :  { %864 = vmatpush1.bf16.msra.mxu0 %v1389_v12  ;;  %905 = vmatpush1.bf16.msra.mxu1 %v1392_v13 }
  0x44   :  { %865 = vmatprep.subr.bf16.mxu0 %v1397_v14  ;;  %906 = vmatprep.subr.bf16.mxu1 %v1400_v15 }
  0x47   :  { %866 = vmatpush1.bf16.msra.mxu0 %v1395_v16  ;;  %907 = vmatpush1.bf16.msra.mxu1 %v1398_v17 }
  0x48   :  { %931 = vmatprep.subr.bf16.mxu0 %v1403_v18  ;;  %972 = vmatprep.subr.bf16.mxu1 %v1406_v19 }
  0x4a   :  { %882 = vmatmul.mubr.bf16.vlgmr.msra.gmra.mrb[4].mxu0 %v1614_v47  ;;  %923 = vmatmul.mubr.bf16.vlgmr.msra.gmra.mrb[4].mxu1 %v1614_v47 }
  0x4b   :  { %932 = vmatpush1.bf16.msra.mxu0 %v1401_v20  ;;  %973 = vmatpush1.bf16.msra.mxu1 %v1404_v21 }
  0x4c   :  { %933 = vmatprep.subr.bf16.mxu0 %v1409_v23  ;;  %974 = vmatprep.subr.bf16.mxu1 %v1412_v24 }
  0x4d   :  { %1288 = vmatprep.mubr.msk.bf16.mxu0 %vm763_vm0, %v1586_v39  ;;  %1289 = vmatprep.mubr.msk.bf16.mxu1 %vm763_vm0, %v1586_v39 }
  0x4f   :  { %934 = vmatpush1.bf16.msra.mxu0 %v1407_v25  ;;  %975 = vmatpush1.bf16.msra.mxu1 %v1410_v26 }
  0x50   :  { %935 = vmatprep.subr.bf16.mxu0 %v1415_v27  ;;  %976 = vmatprep.subr.bf16.mxu1 %v1418_v28 }
  0x53   :  { %936 = vmatpush1.bf16.msra.mxu0 %v1413_v29  ;;  %977 = vmatpush1.bf16.msra.mxu1 %v1416_v30 }
  0x54   :  { %937 = vmatprep.subr.bf16.mxu0 %v1421_v31  ;;  %978 = vmatprep.subr.bf16.mxu1 %v1424_v32 }
  0x57   :  { %938 = vmatpush1.bf16.msra.mxu0 %v1419_v34  ;;  %979 = vmatpush1.bf16.msra.mxu1 %v1422_v35 }
  0x58   :  { %939 = vmatprep.subr.bf16.mxu0 %v1427_v36  ;;  %980 = vmatprep.subr.bf16.mxu1 %v1430_v37 }
  0x5b   :  { %940 = vmatpush1.bf16.msra.mxu0 %v1425_v38  ;;  %981 = vmatpush1.bf16.msra.mxu1 %v1428_v40 }
  0x5c   :  { %941 = vmatprep.subr.bf16.mxu0 %v1433_v41  ;;  %982 = vmatprep.subr.bf16.mxu1 %v1436_v42 }
  0x5f   :  { %942 = vmatpush1.bf16.msra.mxu0 %v1431_v43  ;;  %983 = vmatpush1.bf16.msra.mxu1 %v1434_v44 }
  0x60   :  { %943 = vmatprep.subr.bf16.mxu0 %v1439_v45  ;;  %984 = vmatprep.subr.bf16.mxu1 %v1442_v46 }
  0x63   :  { %944 = vmatpush1.bf16.msra.mxu0 %v1437_v48  ;;  %985 = vmatpush1.bf16.msra.mxu1 %v1440_v49 }
  0x64   :  { %945 = vmatprep.subr.bf16.mxu0 %v1445_v50  ;;  %986 = vmatprep.subr.bf16.mxu1 %v1448_v51 }
  0x67   :  { %946 = vmatpush1.bf16.msra.mxu0 %v1443_v52  ;;  %987 = vmatpush1.bf16.msra.mxu1 %v1446_v53 }
  0x68   :  { %947 = vmatprep.subr.bf16.mxu0 %v1451_v54  ;;  %988 = vmatprep.subr.bf16.mxu1 %v1454_v55 }
  0x6b   :  { %948 = vmatpush1.bf16.msra.mxu0 %v1449_v56  ;;  %989 = vmatpush1.bf16.msra.mxu1 %v1452_v57 }
  0x6c   :  { %1013 = vmatprep.subr.bf16.mxu0 %v1465_v59 }
  0x6e   :  { %964 = vmatmul.mubr.bf16.vlgmr.msra.gmra.mrb[8].mxu0 %v1614_v47  ;;  %1005 = vmatmul.mubr.bf16.vlgmr.msra.gmra.mrb[8].mxu1 %v1614_v47 }
  0x6f   :  { %1014 = vmatpush1.bf16.msra.mxu0 %v1455_v58  ;;  %1290 = vmatprep.mubr.msk.bf16.mxu0 %vm763_vm0, %v1586_v39  ;;  %v1460_v39 = vld [vmem:[%s1891_s0 + $0x238] ss:$52 sps:$4 sm:$0xff]  }
  0x70   :  { %1015 = vmatprep.subr.bf16.mxu0 %v1465_v59 }
  0x73   :  { %1016 = vmatpush1.bf16.msra.mxu0 %v1456_v60 }
  0x74   :  { %1017 = vmatprep.subr.bf16.mxu0 %v1465_v59 }
  0x77   :  { %1018 = vmatpush1.bf16.msra.mxu0 %v1457_v61 }
  0x78   :  { %1019 = vmatprep.subr.bf16.mxu0 %v1465_v59 }
  0x7b   :  { %1020 = vmatpush1.bf16.msra.mxu0 %v1458_v62 }
  0x7c   :  { %1021 = vmatprep.subr.bf16.mxu0 %v1465_v59 }
  0x7f   :  { %1022 = vmatpush1.bf16.msra.mxu0 %v1459_v63 }
  0x80   :  { %1023 = vmatprep.subr.bf16.mxu0 %v1465_v59 }
  0x83   :  { %1024 = vmatpush1.bf16.msra.mxu0 %v1460_v39 }
  0x84   :  { %1025 = vmatprep.subr.bf16.mxu0 %v1465_v59 }
  0x87   :  { %1026 = vmatpush1.bf16.msra.mxu0 %v1461_v0 }
  0x88   :  { %1027 = vmatprep.subr.bf16.mxu0 %v1465_v59 }
  0x8b   :  { %1028 = vmatpush1.bf16.msra.mxu0 %v1462_v1 }
  0x8c   :  { %1029 = vmatprep.subr.bf16.mxu0 %v1465_v59 }
  0x8f   :  { %1030 = vmatpush1.bf16.msra.mxu0 %v1463_v2 }
  0x92   :  { %1046 = vmatmul.mubr.bf16.vlgmr.msra.gmra.mrb[12].mxu0 %v1614_v47 }
  0xf9   :  { %v801_v4 = vpop.f32.mrb[0].mxu0  ;;  %v842_v5 = vpop.f32.mrb[0].mxu1 }
  0xfa   :  { %v802_v6 = vadd.f32 %v801_v4, %v144_v3  ;;  %v843_v7 = vadd.f32 %v842_v5, %v144_v3  ;;  %v803_v8 = vpop.f32.mrb[1].mxu0  ;;  %v844_v9 = vpop.f32.mrb[1].mxu1 }
  0xfb   :  { %v804_v10 = vadd.f32 %v803_v8, %v144_v3  ;;  %v845_v11 = vadd.f32 %v844_v9, %v144_v3  ;;  %v805_v12 = vpop.f32.mrb[2].mxu0  ;;  %v846_v13 = vpop.f32.mrb[2].mxu1 }
  0xfc   :  { %v806_v14 = vpop.f32.mrb[3].mxu0  ;;  %v847_v15 = vpop.f32.mrb[3].mxu1 }
  0xfd   :  { %v1066_v16 = vcombine.low %v802_v6, %v804_v10  ;;  %v1067_v17 = vcombine.low %v843_v7, %v845_v11 }
  0xff   :  { %v1076_v47 = vrot.slane %v1066_v16, %v1571_v33  ;;  %v1083_v18 = vrot.slane %v1067_v17, %v1571_v33 }
 0x101   :  { %v1098_v19 = vcombine.low %v1076_v47, %v1083_v18 }
 0x103   :  { %v1106_v40 = vrot.slane %v1098_v19, %v1571_v33 }
 0x11d   :  { %v883_v20 = vpop.f32.mrb[4].mxu0  ;;  %v924_v21 = vpop.f32.mrb[4].mxu1 }
 0x11e   :  { %v884_v23 = vadd.f32 %v883_v20, %v144_v3  ;;  %v925_v24 = vadd.f32 %v924_v21, %v144_v3  ;;  %v885_v25 = vpop.f32.mrb[5].mxu0  ;;  %v926_v26 = vpop.f32.mrb[5].mxu1 }
 0x11f   :  { %v886_v27 = vadd.f32 %v885_v25, %v144_v3  ;;  %v927_v28 = vadd.f32 %v926_v26, %v144_v3  ;;  %v887_v29 = vpop.f32.mrb[6].mxu0  ;;  %v928_v30 = vpop.f32.mrb[6].mxu1 }
 0x120   :  { %v888_v31 = vpop.f32.mrb[7].mxu0  ;;  %v929_v32 = vpop.f32.mrb[7].mxu1 }
 0x121   :  { %v1068_v34 = vcombine.low %v884_v23, %v886_v27  ;;  %v1069_v35 = vcombine.low %v925_v24, %v927_v28 }
 0x123   :  { %v1090_v36 = vrot.slane %v1068_v34, %v1571_v33  ;;  %v1097_v37 = vrot.slane %v1069_v35, %v1571_v33 }
 0x125   :  { %v1099_v38 = vcombine.low %v1090_v36, %v1097_v37 }
 0x127   :  { %v1113_v41 = vrot.slane %v1099_v38, %v1571_v33 }
 0x129   :  { %v1114_v42 = vcombine.low %v1106_v40, %v1113_v41 }
 0x12b   :  { %1156 = vst [vmem:[%s1894_s3] sm:$0xff] %v1114_v42 }
 0x141   :  { %v965_v43 = vpop.f32.mrb[8].mxu0  ;;  %v1006_v44 = vpop.f32.mrb[8].mxu1 }
 0x142   :  { %v966_v45 = vadd.f32 %v965_v43, %v144_v3  ;;  %v1007_v46 = vadd.f32 %v1006_v44, %v144_v3  ;;  %v967_v48 = vpop.f32.mrb[9].mxu0  ;;  %v1008_v49 = vpop.f32.mrb[9].mxu1 }
 0x143   :  { %v968_v50 = vadd.f32 %v967_v48, %v144_v3  ;;  %v1009_v51 = vadd.f32 %v1008_v49, %v144_v3  ;;  %v969_v52 = vpop.f32.mrb[10].mxu0  ;;  %v1010_v53 = vpop.f32.mrb[10].mxu1 }
 0x144   :  { %v970_v54 = vpop.f32.mrb[11].mxu0  ;;  %v1011_v55 = vpop.f32.mrb[11].mxu1 }
 0x145   :  { %v1115_v56 = vcombine.low %v966_v45, %v968_v50  ;;  %v1116_v57 = vcombine.low %v1007_v46, %v1009_v51 }
 0x147   :  { %v1123_v58 = vrot.slane %v1115_v56, %v1571_v33  ;;  %v1130_v59 = vrot.slane %v1116_v57, %v1571_v33 }
 0x149   :  { %v1138_v60 = vcombine.low %v1123_v58, %v1130_v59 }
 0x14b   :  { %v1145_v2 = vrot.slane %v1138_v60, %v1571_v33 }
 0x165   :  { %v1047_v61 = vpop.f32.mrb[12].mxu0 }
 0x166   :  { %v1048_v62 = vadd.f32 %v1047_v61, %v144_v3  ;;  %v1049_v63 = vpop.f32.mrb[13].mxu0 }
 0x167   :  { %v1050_v39 = vpop.f32.mrb[14].mxu0 }
 0x168   :  { %v1137_v0 = vrot.slane %v1048_v62, %v1571_v33  ;;  %v1051_v1 = vpop.f32.mrb[15].mxu0 }
 0x16a   :  { %v1152_v4 = vrot.slane %v1137_v0, %v1571_v33 }
 0x16c   :  { %v1153_v5 = vcombine.low %v1145_v2, %v1152_v4 }
 0x16e   :  { %1161 = vst.msk [vmem:[%s1894_s3 + $0x8] sm:$0x1f] %vm1159_vm1, %v1153_v5 }

</bundles_post_ra>
